<compile_context>
chip_gen: v5e
topology: v5e:2x2
jax: 0.10.0
libtpu: 0.0.40
codegen_flags: <defaults>
</compile_context>

<pallas_src>
import jax
import jax.numpy as jnp
from jax.experimental import pallas as pl
from jax.experimental.pallas import tpu as pltpu

NEG_SLOPE = 1.0  # matches nn.LeakyReLU(True) -> negative_slope == True == 1.0


def _make_bblock_kernel(H, W, KH, KW, Cin, Cout, nb, neg_slope):
    ph, pw = KH // 2, KW // 2
    HW = H * W
    margin = ph * W + pw           # max |flat tap shift|
    flat_len = HW + 2 * margin

    def kernel(w_sref, b_sref, x_ref, o_ref, xpad_ref):
        # w_sref : (Cout*Cin*KH*KW,) f32 SMEM (scalar-prefetched once for the grid)
        # b_sref : (Cout,)           f32 SMEM
        # x_ref  : (nb, Cin, H*W)    VMEM input block (lane-dense flattened spatial)
        # o_ref  : (nb, Cout, H*W)   VMEM output block
        # xpad_ref: (nb, Cin, margin + H*W + margin) VMEM flat scratch, zero margins.

        # Zero only the tiny margins, every step (megacore-safe; interior is always
        # fully overwritten below, margins cost ~2*margin lanes per channel).
        if margin > 0:
            xpad_ref[:, :, :margin] = jnp.zeros((nb, Cin, margin), jnp.float32)
            xpad_ref[:, :, margin + HW:] = jnp.zeros((nb, Cin, margin), jnp.float32)

        # Fused interior copy: one lane-dense 3-D store of the whole block.
        xpad_ref[:, :, margin:margin + HW] = x_ref[...].astype(jnp.float32)

        # Horizontal edge masks.  Flat vertical shifts read the zero margins, so only
        # |dw| > 0 taps need masking; any vertically-invalid position that does not hit
        # a margin is always horizontally invalid too, hence covered by these masks.
        masks = {}
        if pw > 0:
            col = jax.lax.broadcasted_iota(jnp.int32, (nb, HW), 1) % W
            for dw in range(-pw, pw + 1):
                if dw < 0:
                    masks[dw] = col >= -dw
                elif dw > 0:
                    masks[dw] = col < W - dw

        # Bias folded into accumulator init; only the Cout accumulators (plus one
        # transient patch) stay live across the tap loops.
        accs = [jnp.full((nb, HW), b_sref[co], dtype=jnp.float32) for co in range(Cout)]

        for kh in range(KH):
            for kw in range(KW):
                dw = kw - pw
                off = margin + (kh - ph) * W + dw
                mask = masks.get(dw)
                for ci in range(Cin):
                    patch = xpad_ref[:, ci, off:off + HW]   # (nb, H*W), lane-dense
                    if mask is not None:
                        patch = jnp.where(mask, patch, 0.0)
                    for co in range(Cout):                  # Cout innermost: patch reuse
                        widx = ((co * Cin + ci) * KH + kh) * KW + kw
                        accs[co] = accs[co] + w_sref[widx] * patch

        for co in range(Cout):
            acc = accs[co]
            # LeakyReLU; slope 1.0 (nn.LeakyReLU(True)) is identity -> skipped at trace time.
            if neg_slope != 1.0:
                acc = jnp.where(acc >= 0, acc, neg_slope * acc)
            o_ref[:, co, :] = acc.astype(o_ref.dtype)       # lane-dense (multiple of 128)

    return kernel


def _pick_batch_block(N, per_image_bytes, vmem_budget=8 << 20):
    """Images per grid step: >=2 steps when N>=2 (both v7x TCs get work), otherwise as
    large as the VMEM budget allows to amortize per-step overhead on v5e/v6e."""
    if N <= 1:
        return 1
    nb = max(1, N // 2)
    nb = max(1, min(nb, vmem_budget // max(per_image_bytes, 1)))
    while N % nb:
        nb -= 1
    return nb


def bblock_forward(x_nchw, weight_oihw, bias, *, neg_slope=NEG_SLOPE):
    """BBlock forward: conv2d (stride 1, 'same' padding k//2, bias) + LeakyReLU(neg_slope).

    x_nchw:      (N, Cin, H, W)   float32
    weight_oihw: (Cout, Cin, KH, KW)
    bias:        (Cout,)
    returns:     (N, Cout, H, W)
    """
    N, Cin, H, W = x_nchw.shape
    Cout, Cin_w, KH, KW = weight_oihw.shape
    assert Cin == Cin_w
    HW = H * W
    flat_len = HW + 2 * ((KH // 2) * W + (KW // 2))

    # in + out (double-buffered) + flat scratch, per image, f32.
    per_image_bytes = 4 * (2 * Cin * HW + 2 * Cout * HW + Cin * flat_len)
    nb = _pick_batch_block(N, per_image_bytes)
    grid = (N // nb,)

    kernel = _make_bblock_kernel(H, W, KH, KW, Cin, Cout, nb, float(neg_slope))

    # Free metadata reshapes on contiguous NCHW: lane-dense (..., H*W) blocks in and out.
    x_flat = x_nchw.reshape(N, Cin, HW)
    # Weights flattened (co, ci, kh, kw) row-major; conv2d is cross-correlation (no flip).
    w_flat = weight_oihw.astype(jnp.float32).reshape(-1)
    b_vec = bias.astype(jnp.float32).reshape(-1)

    out_flat = pl.pallas_call(
        kernel,
        out_shape=jax.ShapeDtypeStruct((N, Cout, HW), x_nchw.dtype),
        grid_spec=pltpu.PrefetchScalarGridSpec(
            num_scalar_prefetch=2,                  # weights + bias -> SMEM, loaded once
            grid=grid,
            in_specs=[
                pl.BlockSpec((nb, Cin, HW), lambda n, w_s, b_s: (n, 0, 0)),
            ],
            out_specs=pl.BlockSpec((nb, Cout, HW), lambda n, w_s, b_s: (n, 0, 0)),
            scratch_shapes=[
                pltpu.VMEM((nb, Cin, flat_len), jnp.float32),
            ],
        ),
        compiler_params=pltpu.CompilerParams(
            dimension_semantics=("parallel",),
        ),
    )(w_flat, b_vec, x_flat)

    return out_flat.reshape(N, Cout, H, W)


def _reference_forward(x_nchw, weight_oihw, bias, neg_slope=NEG_SLOPE):
    """Plain-JAX reference (conv2d same padding + bias + leaky relu) for verification."""
    KH = weight_oihw.shape[2]
    y = jax.lax.conv_general_dilated(
        x_nchw, weight_oihw,
        window_strides=(1, 1),
        padding=[(KH // 2, KH // 2), (KH // 2, KH // 2)],
        dimension_numbers=("NCHW", "OIHW", "NCHW"),
    )
    y = y + bias.reshape(1, -1, 1, 1)
    return jnp.where(y >= 0, y, neg_slope * y)


if __name__ == "__main__":
    # Small shapes consistent with the module: batch=2, channels=4, spatial=16, k=3.
    N, Cin, Cout, H, W, K = 2, 4, 4, 16, 16, 3

    key = jax.random.PRNGKey(0)
    kx, kw, kb = jax.random.split(key, 3)

    x = jax.random.normal(kx, (N, Cin, H, W), dtype=jnp.float32)
    # Deterministic synthetic parameters (not a checkpoint).
    fan_in = Cin * K * K
    weight = jax.random.normal(kw, (Cout, Cin, K, K), dtype=jnp.float32) / jnp.sqrt(fan_in)
    bias = jax.random.normal(kb, (Cout,), dtype=jnp.float32) * 0.1

    out = jax.block_until_ready(bblock_forward(x, weight, bias))

    ref = _reference_forward(x, weight, bias)
    assert out.shape == (N, Cout, H, W)
    assert jnp.allclose(out, ref, atol=1e-4, rtol=1e-4), "mismatch vs reference"

    print("KERNEL_OK")
</pallas_src>

<mosaic_0001>
module attributes {stable_mosaic.version = 11 : i64} {
  func.func @kernel(%arg0: i32, %arg1: memref<144xf32, #tpu.memory_space<smem>>, %arg2: memref<4xf32, #tpu.memory_space<smem>>, %arg3: memref<1x4x256xf32, #tpu.memory_space<vmem>>, %arg4: memref<1x4x256xf32, #tpu.memory_space<vmem>>, %arg5: memref<1x4x290xf32, #tpu.memory_space<vmem>>) attributes {dimension_semantics = [#tpu.dimension_semantics<parallel>], iteration_bounds = array<i64: 2>, scalar_prefetch = 2 : i64, scratch_operands = 1 : i64, tpu.core_type = #tpu.core_type<tc>, window_params = [{transform_indices = @transform_0, window_bounds = array<i64: 1, 4, 256>}, {transform_indices = @transform_1, window_bounds = array<i64: 1, 4, 256>}]} {
    %cst = arith.constant 0.000000e+00 : f32
    %0 = vector.broadcast %cst : f32 to vector<1x4x17xf32>
    %c0 = arith.constant 0 : index
    %c0_0 = arith.constant 0 : index
    %c0_1 = arith.constant 0 : index
    %1 = vector.load %arg5[%c0, %c0_0, %c0_1] : memref<1x4x290xf32, #tpu.memory_space<vmem>>, vector<1x4x17xf32>
    tpu.vector_store %arg5[%c0, %c0_0, %c0_1], %0 {strides = array<i32>} : memref<1x4x290xf32, #tpu.memory_space<vmem>>, vector<1x4x17xf32>,
    %cst_2 = arith.constant 0.000000e+00 : f32
    %2 = vector.broadcast %cst_2 : f32 to vector<1x4x17xf32>
    %c0_3 = arith.constant 0 : index
    %c0_4 = arith.constant 0 : index
    %c273 = arith.constant 273 : index
    %3 = vector.load %arg5[%c0_3, %c0_4, %c273] : memref<1x4x290xf32, #tpu.memory_space<vmem>>, vector<1x4x17xf32>
    tpu.vector_store %arg5[%c0_3, %c0_4, %c273], %2 {strides = array<i32>} : memref<1x4x290xf32, #tpu.memory_space<vmem>>, vector<1x4x17xf32>,
    %c0_5 = arith.constant 0 : index
    %c0_6 = arith.constant 0 : index
    %c0_7 = arith.constant 0 : index
    %4 = vector.load %arg3[%c0_5, %c0_6, %c0_7] : memref<1x4x256xf32, #tpu.memory_space<vmem>>, vector<1x4x256xf32>
    %c0_8 = arith.constant 0 : index
    %c0_9 = arith.constant 0 : index
    %c17 = arith.constant 17 : index
    %5 = vector.load %arg5[%c0_8, %c0_9, %c17] : memref<1x4x290xf32, #tpu.memory_space<vmem>>, vector<1x4x256xf32>
    tpu.vector_store %arg5[%c0_8, %c0_9, %c17], %4 {strides = array<i32>} : memref<1x4x290xf32, #tpu.memory_space<vmem>>, vector<1x4x256xf32>,
    %6 = tpu.iota {dimensions = array<i32: 1>} : vector<1x256xi32>
    %c16_i32 = arith.constant 16 : i32
    %c0_i32 = arith.constant 0 : i32
    %7 = arith.cmpi eq, %c16_i32, %c0_i32 : i32
    %c1_i32 = arith.constant 1 : i32
    %8 = arith.select %7, %c1_i32, %c16_i32 : i32
    %9 = vector.broadcast %8 : i32 to vector<1x256xi32>
    %10 = arith.remsi %6, %9 : vector<1x256xi32>
    %c0_i32_10 = arith.constant 0 : i32
    %11 = vector.broadcast %c0_i32_10 : i32 to vector<1x256xi32>
    %12 = arith.cmpi ne, %10, %11 : vector<1x256xi32>
    %c0_i32_11 = arith.constant 0 : i32
    %13 = vector.broadcast %c0_i32_11 : i32 to vector<1x256xi32>
    %14 = arith.cmpi slt, %10, %13 : vector<1x256xi32>
    %c0_i32_12 = arith.constant 0 : i32
    %15 = arith.cmpi slt, %8, %c0_i32_12 : i32
    %16 = vector.broadcast %15 : i1 to vector<1x256xi1>
    %17 = vector.broadcast %16 : vector<1x256xi1> to vector<1x256xi1>
    %18 = arith.xori %14, %17 : vector<1x256xi1>
    %19 = arith.andi %18, %12 : vector<1x256xi1>
    %20 = vector.broadcast %8 : i32 to vector<1x256xi32>
    %21 = arith.addi %10, %20 : vector<1x256xi32>
    %22 = arith.select %19, %21, %10 : vector<1x256xi1>, vector<1x256xi32>
    %c1_i32_13 = arith.constant 1 : i32
    %23 = vector.broadcast %c1_i32_13 : i32 to vector<1x256xi32>
    %24 = arith.cmpi sge, %22, %23 : vector<1x256xi32>
    %c15_i32 = arith.constant 15 : i32
    %25 = vector.broadcast %c15_i32 : i32 to vector<1x256xi32>
    %26 = arith.cmpi slt, %22, %25 : vector<1x256xi32>
    %c0_14 = arith.constant 0 : index
    %27 = memref.load %arg2[%c0_14] : memref<4xf32, #tpu.memory_space<smem>>
    %28 = vector.broadcast %27 : f32 to vector<1x256xf32>
    %c1 = arith.constant 1 : index
    %29 = memref.load %arg2[%c1] : memref<4xf32, #tpu.memory_space<smem>>
    %30 = vector.broadcast %29 : f32 to vector<1x256xf32>
    %c2 = arith.constant 2 : index
    %31 = memref.load %arg2[%c2] : memref<4xf32, #tpu.memory_space<smem>>
    %32 = vector.broadcast %31 : f32 to vector<1x256xf32>
    %c3 = arith.constant 3 : index
    %33 = memref.load %arg2[%c3] : memref<4xf32, #tpu.memory_space<smem>>
    %34 = vector.broadcast %33 : f32 to vector<1x256xf32>
    %c0_15 = arith.constant 0 : index
    %c0_16 = arith.constant 0 : index
    %c0_17 = arith.constant 0 : index
    %35 = vector.load %arg5[%c0_15, %c0_16, %c0_17] : memref<1x4x290xf32, #tpu.memory_space<vmem>>, vector<1x1x256xf32>
    %36 = vector.shape_cast %35 : vector<1x1x256xf32> to vector<1x256xf32>
    %cst_18 = arith.constant 0.000000e+00 : f32
    %37 = vector.broadcast %cst_18 : f32 to vector<1x256xf32>
    %38 = arith.select %24, %36, %37 : vector<1x256xi1>, vector<1x256xf32>
    %c0_19 = arith.constant 0 : index
    %39 = memref.load %arg1[%c0_19] : memref<144xf32, #tpu.memory_space<smem>>
    %40 = vector.broadcast %39 : f32 to vector<1x256xf32>
    %41 = arith.mulf %40, %38 : vector<1x256xf32>
    %42 = arith.addf %28, %41 : vector<1x256xf32>
    %c36 = arith.constant 36 : index
    %43 = memref.load %arg1[%c36] : memref<144xf32, #tpu.memory_space<smem>>
    %44 = vector.broadcast %43 : f32 to vector<1x256xf32>
    %45 = arith.mulf %44, %38 : vector<1x256xf32>
    %46 = arith.addf %30, %45 : vector<1x256xf32>
    %c72 = arith.constant 72 : index
    %47 = memref.load %arg1[%c72] : memref<144xf32, #tpu.memory_space<smem>>
    %48 = vector.broadcast %47 : f32 to vector<1x256xf32>
    %49 = arith.mulf %48, %38 : vector<1x256xf32>
    %50 = arith.addf %32, %49 : vector<1x256xf32>
    %c108 = arith.constant 108 : index
    %51 = memref.load %arg1[%c108] : memref<144xf32, #tpu.memory_space<smem>>
    %52 = vector.broadcast %51 : f32 to vector<1x256xf32>
    %53 = arith.mulf %52, %38 : vector<1x256xf32>
    %54 = arith.addf %34, %53 : vector<1x256xf32>
    %c0_20 = arith.constant 0 : index
    %c1_21 = arith.constant 1 : index
    %c0_22 = arith.constant 0 : index
    %55 = vector.load %arg5[%c0_20, %c1_21, %c0_22] : memref<1x4x290xf32, #tpu.memory_space<vmem>>, vector<1x1x256xf32>
    %56 = vector.shape_cast %55 : vector<1x1x256xf32> to vector<1x256xf32>
    %cst_23 = arith.constant 0.000000e+00 : f32
    %57 = vector.broadcast %cst_23 : f32 to vector<1x256xf32>
    %58 = arith.select %24, %56, %57 : vector<1x256xi1>, vector<1x256xf32>
    %c9 = arith.constant 9 : index
    %59 = memref.load %arg1[%c9] : memref<144xf32, #tpu.memory_space<smem>>
    %60 = vector.broadcast %59 : f32 to vector<1x256xf32>
    %61 = arith.mulf %60, %58 : vector<1x256xf32>
    %62 = arith.addf %42, %61 : vector<1x256xf32>
    %c45 = arith.constant 45 : index
    %63 = memref.load %arg1[%c45] : memref<144xf32, #tpu.memory_space<smem>>
    %64 = vector.broadcast %63 : f32 to vector<1x256xf32>
    %65 = arith.mulf %64, %58 : vector<1x256xf32>
    %66 = arith.addf %46, %65 : vector<1x256xf32>
    %c81 = arith.constant 81 : index
    %67 = memref.load %arg1[%c81] : memref<144xf32, #tpu.memory_space<smem>>
    %68 = vector.broadcast %67 : f32 to vector<1x256xf32>
    %69 = arith.mulf %68, %58 : vector<1x256xf32>
    %70 = arith.addf %50, %69 : vector<1x256xf32>
    %c117 = arith.constant 117 : index
    %71 = memref.load %arg1[%c117] : memref<144xf32, #tpu.memory_space<smem>>
    %72 = vector.broadcast %71 : f32 to vector<1x256xf32>
    %73 = arith.mulf %72, %58 : vector<1x256xf32>
    %74 = arith.addf %54, %73 : vector<1x256xf32>
    %c0_24 = arith.constant 0 : index
    %c2_25 = arith.constant 2 : index
    %c0_26 = arith.constant 0 : index
    %75 = vector.load %arg5[%c0_24, %c2_25, %c0_26] : memref<1x4x290xf32, #tpu.memory_space<vmem>>, vector<1x1x256xf32>
    %76 = vector.shape_cast %75 : vector<1x1x256xf32> to vector<1x256xf32>
    %cst_27 = arith.constant 0.000000e+00 : f32
    %77 = vector.broadcast %cst_27 : f32 to vector<1x256xf32>
    %78 = arith.select %24, %76, %77 : vector<1x256xi1>, vector<1x256xf32>
    %c18 = arith.constant 18 : index
    %79 = memref.load %arg1[%c18] : memref<144xf32, #tpu.memory_space<smem>>
    %80 = vector.broadcast %79 : f32 to vector<1x256xf32>
    %81 = arith.mulf %80, %78 : vector<1x256xf32>
    %82 = arith.addf %62, %81 : vector<1x256xf32>
    %c54 = arith.constant 54 : index
    %83 = memref.load %arg1[%c54] : memref<144xf32, #tpu.memory_space<smem>>
    %84 = vector.broadcast %83 : f32 to vector<1x256xf32>
    %85 = arith.mulf %84, %78 : vector<1x256xf32>
    %86 = arith.addf %66, %85 : vector<1x256xf32>
    %c90 = arith.constant 90 : index
    %87 = memref.load %arg1[%c90] : memref<144xf32, #tpu.memory_space<smem>>
    %88 = vector.broadcast %87 : f32 to vector<1x256xf32>
    %89 = arith.mulf %88, %78 : vector<1x256xf32>
    %90 = arith.addf %70, %89 : vector<1x256xf32>
    %c126 = arith.constant 126 : index
    %91 = memref.load %arg1[%c126] : memref<144xf32, #tpu.memory_space<smem>>
    %92 = vector.broadcast %91 : f32 to vector<1x256xf32>
    %93 = arith.mulf %92, %78 : vector<1x256xf32>
    %94 = arith.addf %74, %93 : vector<1x256xf32>
    %c0_28 = arith.constant 0 : index
    %c3_29 = arith.constant 3 : index
    %c0_30 = arith.constant 0 : index
    %95 = vector.load %arg5[%c0_28, %c3_29, %c0_30] : memref<1x4x290xf32, #tpu.memory_space<vmem>>, vector<1x1x256xf32>
    %96 = vector.shape_cast %95 : vector<1x1x256xf32> to vector<1x256xf32>
    %cst_31 = arith.constant 0.000000e+00 : f32
    %97 = vector.broadcast %cst_31 : f32 to vector<1x256xf32>
    %98 = arith.select %24, %96, %97 : vector<1x256xi1>, vector<1x256xf32>
    %c27 = arith.constant 27 : index
    %99 = memref.load %arg1[%c27] : memref<144xf32, #tpu.memory_space<smem>>
    %100 = vector.broadcast %99 : f32 to vector<1x256xf32>
    %101 = arith.mulf %100, %98 : vector<1x256xf32>
    %102 = arith.addf %82, %101 : vector<1x256xf32>
    %c63 = arith.constant 63 : index
    %103 = memref.load %arg1[%c63] : memref<144xf32, #tpu.memory_space<smem>>
    %104 = vector.broadcast %103 : f32 to vector<1x256xf32>
    %105 = arith.mulf %104, %98 : vector<1x256xf32>
    %106 = arith.addf %86, %105 : vector<1x256xf32>
    %c99 = arith.constant 99 : index
    %107 = memref.load %arg1[%c99] : memref<144xf32, #tpu.memory_space<smem>>
    %108 = vector.broadcast %107 : f32 to vector<1x256xf32>
    %109 = arith.mulf %108, %98 : vector<1x256xf32>
    %110 = arith.addf %90, %109 : vector<1x256xf32>
    %c135 = arith.constant 135 : index
    %111 = memref.load %arg1[%c135] : memref<144xf32, #tpu.memory_space<smem>>
    %112 = vector.broadcast %111 : f32 to vector<1x256xf32>
    %113 = arith.mulf %112, %98 : vector<1x256xf32>
    %114 = arith.addf %94, %113 : vector<1x256xf32>
    %c0_32 = arith.constant 0 : index
    %c0_33 = arith.constant 0 : index
    %c1_34 = arith.constant 1 : index
    %115 = vector.load %arg5[%c0_32, %c0_33, %c1_34] : memref<1x4x290xf32, #tpu.memory_space<vmem>>, vector<1x1x256xf32>
    %116 = vector.shape_cast %115 : vector<1x1x256xf32> to vector<1x256xf32>
    %c1_35 = arith.constant 1 : index
    %117 = memref.load %arg1[%c1_35] : memref<144xf32, #tpu.memory_space<smem>>
    %118 = vector.broadcast %117 : f32 to vector<1x256xf32>
    %119 = arith.mulf %118, %116 : vector<1x256xf32>
    %120 = arith.addf %102, %119 : vector<1x256xf32>
    %c37 = arith.constant 37 : index
    %121 = memref.load %arg1[%c37] : memref<144xf32, #tpu.memory_space<smem>>
    %122 = vector.broadcast %121 : f32 to vector<1x256xf32>
    %123 = arith.mulf %122, %116 : vector<1x256xf32>
    %124 = arith.addf %106, %123 : vector<1x256xf32>
    %c73 = arith.constant 73 : index
    %125 = memref.load %arg1[%c73] : memref<144xf32, #tpu.memory_space<smem>>
    %126 = vector.broadcast %125 : f32 to vector<1x256xf32>
    %127 = arith.mulf %126, %116 : vector<1x256xf32>
    %128 = arith.addf %110, %127 : vector<1x256xf32>
    %c109 = arith.constant 109 : index
    %129 = memref.load %arg1[%c109] : memref<144xf32, #tpu.memory_space<smem>>
    %130 = vector.broadcast %129 : f32 to vector<1x256xf32>
    %131 = arith.mulf %130, %116 : vector<1x256xf32>
    %132 = arith.addf %114, %131 : vector<1x256xf32>
    %c0_36 = arith.constant 0 : index
    %c1_37 = arith.constant 1 : index
    %c1_38 = arith.constant 1 : index
    %133 = vector.load %arg5[%c0_36, %c1_37, %c1_38] : memref<1x4x290xf32, #tpu.memory_space<vmem>>, vector<1x1x256xf32>
    %134 = vector.shape_cast %133 : vector<1x1x256xf32> to vector<1x256xf32>
    %c10 = arith.constant 10 : index
    %135 = memref.load %arg1[%c10] : memref<144xf32, #tpu.memory_space<smem>>
    %136 = vector.broadcast %135 : f32 to vector<1x256xf32>
    %137 = arith.mulf %136, %134 : vector<1x256xf32>
    %138 = arith.addf %120, %137 : vector<1x256xf32>
    %c46 = arith.constant 46 : index
    %139 = memref.load %arg1[%c46] : memref<144xf32, #tpu.memory_space<smem>>
    %140 = vector.broadcast %139 : f32 to vector<1x256xf32>
    %141 = arith.mulf %140, %134 : vector<1x256xf32>
    %142 = arith.addf %124, %141 : vector<1x256xf32>
    %c82 = arith.constant 82 : index
    %143 = memref.load %arg1[%c82] : memref<144xf32, #tpu.memory_space<smem>>
    %144 = vector.broadcast %143 : f32 to vector<1x256xf32>
    %145 = arith.mulf %144, %134 : vector<1x256xf32>
    %146 = arith.addf %128, %145 : vector<1x256xf32>
    %c118 = arith.constant 118 : index
    %147 = memref.load %arg1[%c118] : memref<144xf32, #tpu.memory_space<smem>>
    %148 = vector.broadcast %147 : f32 to vector<1x256xf32>
    %149 = arith.mulf %148, %134 : vector<1x256xf32>
    %150 = arith.addf %132, %149 : vector<1x256xf32>
    %c0_39 = arith.constant 0 : index
    %c2_40 = arith.constant 2 : index
    %c1_41 = arith.constant 1 : index
    %151 = vector.load %arg5[%c0_39, %c2_40, %c1_41] : memref<1x4x290xf32, #tpu.memory_space<vmem>>, vector<1x1x256xf32>
    %152 = vector.shape_cast %151 : vector<1x1x256xf32> to vector<1x256xf32>
    %c19 = arith.constant 19 : index
    %153 = memref.load %arg1[%c19] : memref<144xf32, #tpu.memory_space<smem>>
    %154 = vector.broadcast %153 : f32 to vector<1x256xf32>
    %155 = arith.mulf %154, %152 : vector<1x256xf32>
    %156 = arith.addf %138, %155 : vector<1x256xf32>
    %c55 = arith.constant 55 : index
    %157 = memref.load %arg1[%c55] : memref<144xf32, #tpu.memory_space<smem>>
    %158 = vector.broadcast %157 : f32 to vector<1x256xf32>
    %159 = arith.mulf %158, %152 : vector<1x256xf32>
    %160 = arith.addf %142, %159 : vector<1x256xf32>
    %c91 = arith.constant 91 : index
    %161 = memref.load %arg1[%c91] : memref<144xf32, #tpu.memory_space<smem>>
    %162 = vector.broadcast %161 : f32 to vector<1x256xf32>
    %163 = arith.mulf %162, %152 : vector<1x256xf32>
    %164 = arith.addf %146, %163 : vector<1x256xf32>
    %c127 = arith.constant 127 : index
    %165 = memref.load %arg1[%c127] : memref<144xf32, #tpu.memory_space<smem>>
    %166 = vector.broadcast %165 : f32 to vector<1x256xf32>
    %167 = arith.mulf %166, %152 : vector<1x256xf32>
    %168 = arith.addf %150, %167 : vector<1x256xf32>
    %c0_42 = arith.constant 0 : index
    %c3_43 = arith.constant 3 : index
    %c1_44 = arith.constant 1 : index
    %169 = vector.load %arg5[%c0_42, %c3_43, %c1_44] : memref<1x4x290xf32, #tpu.memory_space<vmem>>, vector<1x1x256xf32>
    %170 = vector.shape_cast %169 : vector<1x1x256xf32> to vector<1x256xf32>
    %c28 = arith.constant 28 : index
    %171 = memref.load %arg1[%c28] : memref<144xf32, #tpu.memory_space<smem>>
    %172 = vector.broadcast %171 : f32 to vector<1x256xf32>
    %173 = arith.mulf %172, %170 : vector<1x256xf32>
    %174 = arith.addf %156, %173 : vector<1x256xf32>
    %c64 = arith.constant 64 : index
    %175 = memref.load %arg1[%c64] : memref<144xf32, #tpu.memory_space<smem>>
    %176 = vector.broadcast %175 : f32 to vector<1x256xf32>
    %177 = arith.mulf %176, %170 : vector<1x256xf32>
    %178 = arith.addf %160, %177 : vector<1x256xf32>
    %c100 = arith.constant 100 : index
    %179 = memref.load %arg1[%c100] : memref<144xf32, #tpu.memory_space<smem>>
    %180 = vector.broadcast %179 : f32 to vector<1x256xf32>
    %181 = arith.mulf %180, %170 : vector<1x256xf32>
    %182 = arith.addf %164, %181 : vector<1x256xf32>
    %c136 = arith.constant 136 : index
    %183 = memref.load %arg1[%c136] : memref<144xf32, #tpu.memory_space<smem>>
    %184 = vector.broadcast %183 : f32 to vector<1x256xf32>
    %185 = arith.mulf %184, %170 : vector<1x256xf32>
    %186 = arith.addf %168, %185 : vector<1x256xf32>
    %c0_45 = arith.constant 0 : index
    %c0_46 = arith.constant 0 : index
    %c2_47 = arith.constant 2 : index
    %187 = vector.load %arg5[%c0_45, %c0_46, %c2_47] : memref<1x4x290xf32, #tpu.memory_space<vmem>>, vector<1x1x256xf32>
    %188 = vector.shape_cast %187 : vector<1x1x256xf32> to vector<1x256xf32>
    %cst_48 = arith.constant 0.000000e+00 : f32
    %189 = vector.broadcast %cst_48 : f32 to vector<1x256xf32>
    %190 = arith.select %26, %188, %189 : vector<1x256xi1>, vector<1x256xf32>
    %c2_49 = arith.constant 2 : index
    %191 = memref.load %arg1[%c2_49] : memref<144xf32, #tpu.memory_space<smem>>
    %192 = vector.broadcast %191 : f32 to vector<1x256xf32>
    %193 = arith.mulf %192, %190 : vector<1x256xf32>
    %194 = arith.addf %174, %193 : vector<1x256xf32>
    %c38 = arith.constant 38 : index
    %195 = memref.load %arg1[%c38] : memref<144xf32, #tpu.memory_space<smem>>
    %196 = vector.broadcast %195 : f32 to vector<1x256xf32>
    %197 = arith.mulf %196, %190 : vector<1x256xf32>
    %198 = arith.addf %178, %197 : vector<1x256xf32>
    %c74 = arith.constant 74 : index
    %199 = memref.load %arg1[%c74] : memref<144xf32, #tpu.memory_space<smem>>
    %200 = vector.broadcast %199 : f32 to vector<1x256xf32>
    %201 = arith.mulf %200, %190 : vector<1x256xf32>
    %202 = arith.addf %182, %201 : vector<1x256xf32>
    %c110 = arith.constant 110 : index
    %203 = memref.load %arg1[%c110] : memref<144xf32, #tpu.memory_space<smem>>
    %204 = vector.broadcast %203 : f32 to vector<1x256xf32>
    %205 = arith.mulf %204, %190 : vector<1x256xf32>
    %206 = arith.addf %186, %205 : vector<1x256xf32>
    %c0_50 = arith.constant 0 : index
    %c1_51 = arith.constant 1 : index
    %c2_52 = arith.constant 2 : index
    %207 = vector.load %arg5[%c0_50, %c1_51, %c2_52] : memref<1x4x290xf32, #tpu.memory_space<vmem>>, vector<1x1x256xf32>
    %208 = vector.shape_cast %207 : vector<1x1x256xf32> to vector<1x256xf32>
    %cst_53 = arith.constant 0.000000e+00 : f32
    %209 = vector.broadcast %cst_53 : f32 to vector<1x256xf32>
    %210 = arith.select %26, %208, %209 : vector<1x256xi1>, vector<1x256xf32>
    %c11 = arith.constant 11 : index
    %211 = memref.load %arg1[%c11] : memref<144xf32, #tpu.memory_space<smem>>
    %212 = vector.broadcast %211 : f32 to vector<1x256xf32>
    %213 = arith.mulf %212, %210 : vector<1x256xf32>
    %214 = arith.addf %194, %213 : vector<1x256xf32>
    %c47 = arith.constant 47 : index
    %215 = memref.load %arg1[%c47] : memref<144xf32, #tpu.memory_space<smem>>
    %216 = vector.broadcast %215 : f32 to vector<1x256xf32>
    %217 = arith.mulf %216, %210 : vector<1x256xf32>
    %218 = arith.addf %198, %217 : vector<1x256xf32>
    %c83 = arith.constant 83 : index
    %219 = memref.load %arg1[%c83] : memref<144xf32, #tpu.memory_space<smem>>
    %220 = vector.broadcast %219 : f32 to vector<1x256xf32>
    %221 = arith.mulf %220, %210 : vector<1x256xf32>
    %222 = arith.addf %202, %221 : vector<1x256xf32>
    %c119 = arith.constant 119 : index
    %223 = memref.load %arg1[%c119] : memref<144xf32, #tpu.memory_space<smem>>
    %224 = vector.broadcast %223 : f32 to vector<1x256xf32>
    %225 = arith.mulf %224, %210 : vector<1x256xf32>
    %226 = arith.addf %206, %225 : vector<1x256xf32>
    %c0_54 = arith.constant 0 : index
    %c2_55 = arith.constant 2 : index
    %c2_56 = arith.constant 2 : index
    %227 = vector.load %arg5[%c0_54, %c2_55, %c2_56] : memref<1x4x290xf32, #tpu.memory_space<vmem>>, vector<1x1x256xf32>
    %228 = vector.shape_cast %227 : vector<1x1x256xf32> to vector<1x256xf32>
    %cst_57 = arith.constant 0.000000e+00 : f32
    %229 = vector.broadcast %cst_57 : f32 to vector<1x256xf32>
    %230 = arith.select %26, %228, %229 : vector<1x256xi1>, vector<1x256xf32>
    %c20 = arith.constant 20 : index
    %231 = memref.load %arg1[%c20] : memref<144xf32, #tpu.memory_space<smem>>
    %232 = vector.broadcast %231 : f32 to vector<1x256xf32>
    %233 = arith.mulf %232, %230 : vector<1x256xf32>
    %234 = arith.addf %214, %233 : vector<1x256xf32>
    %c56 = arith.constant 56 : index
    %235 = memref.load %arg1[%c56] : memref<144xf32, #tpu.memory_space<smem>>
    %236 = vector.broadcast %235 : f32 to vector<1x256xf32>
    %237 = arith.mulf %236, %230 : vector<1x256xf32>
    %238 = arith.addf %218, %237 : vector<1x256xf32>
    %c92 = arith.constant 92 : index
    %239 = memref.load %arg1[%c92] : memref<144xf32, #tpu.memory_space<smem>>
    %240 = vector.broadcast %239 : f32 to vector<1x256xf32>
    %241 = arith.mulf %240, %230 : vector<1x256xf32>
    %242 = arith.addf %222, %241 : vector<1x256xf32>
    %c128 = arith.constant 128 : index
    %243 = memref.load %arg1[%c128] : memref<144xf32, #tpu.memory_space<smem>>
    %244 = vector.broadcast %243 : f32 to vector<1x256xf32>
    %245 = arith.mulf %244, %230 : vector<1x256xf32>
    %246 = arith.addf %226, %245 : vector<1x256xf32>
    %c0_58 = arith.constant 0 : index
    %c3_59 = arith.constant 3 : index
    %c2_60 = arith.constant 2 : index
    %247 = vector.load %arg5[%c0_58, %c3_59, %c2_60] : memref<1x4x290xf32, #tpu.memory_space<vmem>>, vector<1x1x256xf32>
    %248 = vector.shape_cast %247 : vector<1x1x256xf32> to vector<1x256xf32>
    %cst_61 = arith.constant 0.000000e+00 : f32
    %249 = vector.broadcast %cst_61 : f32 to vector<1x256xf32>
    %250 = arith.select %26, %248, %249 : vector<1x256xi1>, vector<1x256xf32>
    %c29 = arith.constant 29 : index
    %251 = memref.load %arg1[%c29] : memref<144xf32, #tpu.memory_space<smem>>
    %252 = vector.broadcast %251 : f32 to vector<1x256xf32>
    %253 = arith.mulf %252, %250 : vector<1x256xf32>
    %254 = arith.addf %234, %253 : vector<1x256xf32>
    %c65 = arith.constant 65 : index
    %255 = memref.load %arg1[%c65] : memref<144xf32, #tpu.memory_space<smem>>
    %256 = vector.broadcast %255 : f32 to vector<1x256xf32>
    %257 = arith.mulf %256, %250 : vector<1x256xf32>
    %258 = arith.addf %238, %257 : vector<1x256xf32>
    %c101 = arith.constant 101 : index
    %259 = memref.load %arg1[%c101] : memref<144xf32, #tpu.memory_space<smem>>
    %260 = vector.broadcast %259 : f32 to vector<1x256xf32>
    %261 = arith.mulf %260, %250 : vector<1x256xf32>
    %262 = arith.addf %242, %261 : vector<1x256xf32>
    %c137 = arith.constant 137 : index
    %263 = memref.load %arg1[%c137] : memref<144xf32, #tpu.memory_space<smem>>
    %264 = vector.broadcast %263 : f32 to vector<1x256xf32>
    %265 = arith.mulf %264, %250 : vector<1x256xf32>
    %266 = arith.addf %246, %265 : vector<1x256xf32>
    %c0_62 = arith.constant 0 : index
    %c0_63 = arith.constant 0 : index
    %c16 = arith.constant 16 : index
    %267 = vector.load %arg5[%c0_62, %c0_63, %c16] : memref<1x4x290xf32, #tpu.memory_space<vmem>>, vector<1x1x256xf32>
    %268 = vector.shape_cast %267 : vector<1x1x256xf32> to vector<1x256xf32>
    %cst_64 = arith.constant 0.000000e+00 : f32
    %269 = vector.broadcast %cst_64 : f32 to vector<1x256xf32>
    %270 = arith.select %24, %268, %269 : vector<1x256xi1>, vector<1x256xf32>
    %c3_65 = arith.constant 3 : index
    %271 = memref.load %arg1[%c3_65] : memref<144xf32, #tpu.memory_space<smem>>
    %272 = vector.broadcast %271 : f32 to vector<1x256xf32>
    %273 = arith.mulf %272, %270 : vector<1x256xf32>
    %274 = arith.addf %254, %273 : vector<1x256xf32>
    %c39 = arith.constant 39 : index
    %275 = memref.load %arg1[%c39] : memref<144xf32, #tpu.memory_space<smem>>
    %276 = vector.broadcast %275 : f32 to vector<1x256xf32>
    %277 = arith.mulf %276, %270 : vector<1x256xf32>
    %278 = arith.addf %258, %277 : vector<1x256xf32>
    %c75 = arith.constant 75 : index
    %279 = memref.load %arg1[%c75] : memref<144xf32, #tpu.memory_space<smem>>
    %280 = vector.broadcast %279 : f32 to vector<1x256xf32>
    %281 = arith.mulf %280, %270 : vector<1x256xf32>
    %282 = arith.addf %262, %281 : vector<1x256xf32>
    %c111 = arith.constant 111 : index
    %283 = memref.load %arg1[%c111] : memref<144xf32, #tpu.memory_space<smem>>
    %284 = vector.broadcast %283 : f32 to vector<1x256xf32>
    %285 = arith.mulf %284, %270 : vector<1x256xf32>
    %286 = arith.addf %266, %285 : vector<1x256xf32>
    %c0_66 = arith.constant 0 : index
    %c1_67 = arith.constant 1 : index
    %c16_68 = arith.constant 16 : index
    %287 = vector.load %arg5[%c0_66, %c1_67, %c16_68] : memref<1x4x290xf32, #tpu.memory_space<vmem>>, vector<1x1x256xf32>
    %288 = vector.shape_cast %287 : vector<1x1x256xf32> to vector<1x256xf32>
    %cst_69 = arith.constant 0.000000e+00 : f32
    %289 = vector.broadcast %cst_69 : f32 to vector<1x256xf32>
    %290 = arith.select %24, %288, %289 : vector<1x256xi1>, vector<1x256xf32>
    %c12 = arith.constant 12 : index
    %291 = memref.load %arg1[%c12] : memref<144xf32, #tpu.memory_space<smem>>
    %292 = vector.broadcast %291 : f32 to vector<1x256xf32>
    %293 = arith.mulf %292, %290 : vector<1x256xf32>
    %294 = arith.addf %274, %293 : vector<1x256xf32>
    %c48 = arith.constant 48 : index
    %295 = memref.load %arg1[%c48] : memref<144xf32, #tpu.memory_space<smem>>
    %296 = vector.broadcast %295 : f32 to vector<1x256xf32>
    %297 = arith.mulf %296, %290 : vector<1x256xf32>
    %298 = arith.addf %278, %297 : vector<1x256xf32>
    %c84 = arith.constant 84 : index
    %299 = memref.load %arg1[%c84] : memref<144xf32, #tpu.memory_space<smem>>
    %300 = vector.broadcast %299 : f32 to vector<1x256xf32>
    %301 = arith.mulf %300, %290 : vector<1x256xf32>
    %302 = arith.addf %282, %301 : vector<1x256xf32>
    %c120 = arith.constant 120 : index
    %303 = memref.load %arg1[%c120] : memref<144xf32, #tpu.memory_space<smem>>
    %304 = vector.broadcast %303 : f32 to vector<1x256xf32>
    %305 = arith.mulf %304, %290 : vector<1x256xf32>
    %306 = arith.addf %286, %305 : vector<1x256xf32>
    %c0_70 = arith.constant 0 : index
    %c2_71 = arith.constant 2 : index
    %c16_72 = arith.constant 16 : index
    %307 = vector.load %arg5[%c0_70, %c2_71, %c16_72] : memref<1x4x290xf32, #tpu.memory_space<vmem>>, vector<1x1x256xf32>
    %308 = vector.shape_cast %307 : vector<1x1x256xf32> to vector<1x256xf32>
    %cst_73 = arith.constant 0.000000e+00 : f32
    %309 = vector.broadcast %cst_73 : f32 to vector<1x256xf32>
    %310 = arith.select %24, %308, %309 : vector<1x256xi1>, vector<1x256xf32>
    %c21 = arith.constant 21 : index
    %311 = memref.load %arg1[%c21] : memref<144xf32, #tpu.memory_space<smem>>
    %312 = vector.broadcast %311 : f32 to vector<1x256xf32>
    %313 = arith.mulf %312, %310 : vector<1x256xf32>
    %314 = arith.addf %294, %313 : vector<1x256xf32>
    %c57 = arith.constant 57 : index
    %315 = memref.load %arg1[%c57] : memref<144xf32, #tpu.memory_space<smem>>
    %316 = vector.broadcast %315 : f32 to vector<1x256xf32>
    %317 = arith.mulf %316, %310 : vector<1x256xf32>
    %318 = arith.addf %298, %317 : vector<1x256xf32>
    %c93 = arith.constant 93 : index
    %319 = memref.load %arg1[%c93] : memref<144xf32, #tpu.memory_space<smem>>
    %320 = vector.broadcast %319 : f32 to vector<1x256xf32>
    %321 = arith.mulf %320, %310 : vector<1x256xf32>
    %322 = arith.addf %302, %321 : vector<1x256xf32>
    %c129 = arith.constant 129 : index
    %323 = memref.load %arg1[%c129] : memref<144xf32, #tpu.memory_space<smem>>
    %324 = vector.broadcast %323 : f32 to vector<1x256xf32>
    %325 = arith.mulf %324, %310 : vector<1x256xf32>
    %326 = arith.addf %306, %325 : vector<1x256xf32>
    %c0_74 = arith.constant 0 : index
    %c3_75 = arith.constant 3 : index
    %c16_76 = arith.constant 16 : index
    %327 = vector.load %arg5[%c0_74, %c3_75, %c16_76] : memref<1x4x290xf32, #tpu.memory_space<vmem>>, vector<1x1x256xf32>
    %328 = vector.shape_cast %327 : vector<1x1x256xf32> to vector<1x256xf32>
    %cst_77 = arith.constant 0.000000e+00 : f32
    %329 = vector.broadcast %cst_77 : f32 to vector<1x256xf32>
    %330 = arith.select %24, %328, %329 : vector<1x256xi1>, vector<1x256xf32>
    %c30 = arith.constant 30 : index
    %331 = memref.load %arg1[%c30] : memref<144xf32, #tpu.memory_space<smem>>
    %332 = vector.broadcast %331 : f32 to vector<1x256xf32>
    %333 = arith.mulf %332, %330 : vector<1x256xf32>
    %334 = arith.addf %314, %333 : vector<1x256xf32>
    %c66 = arith.constant 66 : index
    %335 = memref.load %arg1[%c66] : memref<144xf32, #tpu.memory_space<smem>>
    %336 = vector.broadcast %335 : f32 to vector<1x256xf32>
    %337 = arith.mulf %336, %330 : vector<1x256xf32>
    %338 = arith.addf %318, %337 : vector<1x256xf32>
    %c102 = arith.constant 102 : index
    %339 = memref.load %arg1[%c102] : memref<144xf32, #tpu.memory_space<smem>>
    %340 = vector.broadcast %339 : f32 to vector<1x256xf32>
    %341 = arith.mulf %340, %330 : vector<1x256xf32>
    %342 = arith.addf %322, %341 : vector<1x256xf32>
    %c138 = arith.constant 138 : index
    %343 = memref.load %arg1[%c138] : memref<144xf32, #tpu.memory_space<smem>>
    %344 = vector.broadcast %343 : f32 to vector<1x256xf32>
    %345 = arith.mulf %344, %330 : vector<1x256xf32>
    %346 = arith.addf %326, %345 : vector<1x256xf32>
    %c0_78 = arith.constant 0 : index
    %c0_79 = arith.constant 0 : index
    %c17_80 = arith.constant 17 : index
    %347 = vector.load %arg5[%c0_78, %c0_79, %c17_80] : memref<1x4x290xf32, #tpu.memory_space<vmem>>, vector<1x1x256xf32>
    %348 = vector.shape_cast %347 : vector<1x1x256xf32> to vector<1x256xf32>
    %c4 = arith.constant 4 : index
    %349 = memref.load %arg1[%c4] : memref<144xf32, #tpu.memory_space<smem>>
    %350 = vector.broadcast %349 : f32 to vector<1x256xf32>
    %351 = arith.mulf %350, %348 : vector<1x256xf32>
    %352 = arith.addf %334, %351 : vector<1x256xf32>
    %c40 = arith.constant 40 : index
    %353 = memref.load %arg1[%c40] : memref<144xf32, #tpu.memory_space<smem>>
    %354 = vector.broadcast %353 : f32 to vector<1x256xf32>
    %355 = arith.mulf %354, %348 : vector<1x256xf32>
    %356 = arith.addf %338, %355 : vector<1x256xf32>
    %c76 = arith.constant 76 : index
    %357 = memref.load %arg1[%c76] : memref<144xf32, #tpu.memory_space<smem>>
    %358 = vector.broadcast %357 : f32 to vector<1x256xf32>
    %359 = arith.mulf %358, %348 : vector<1x256xf32>
    %360 = arith.addf %342, %359 : vector<1x256xf32>
    %c112 = arith.constant 112 : index
    %361 = memref.load %arg1[%c112] : memref<144xf32, #tpu.memory_space<smem>>
    %362 = vector.broadcast %361 : f32 to vector<1x256xf32>
    %363 = arith.mulf %362, %348 : vector<1x256xf32>
    %364 = arith.addf %346, %363 : vector<1x256xf32>
    %c0_81 = arith.constant 0 : index
    %c1_82 = arith.constant 1 : index
    %c17_83 = arith.constant 17 : index
    %365 = vector.load %arg5[%c0_81, %c1_82, %c17_83] : memref<1x4x290xf32, #tpu.memory_space<vmem>>, vector<1x1x256xf32>
    %366 = vector.shape_cast %365 : vector<1x1x256xf32> to vector<1x256xf32>
    %c13 = arith.constant 13 : index
    %367 = memref.load %arg1[%c13] : memref<144xf32, #tpu.memory_space<smem>>
    %368 = vector.broadcast %367 : f32 to vector<1x256xf32>
    %369 = arith.mulf %368, %366 : vector<1x256xf32>
    %370 = arith.addf %352, %369 : vector<1x256xf32>
    %c49 = arith.constant 49 : index
    %371 = memref.load %arg1[%c49] : memref<144xf32, #tpu.memory_space<smem>>
    %372 = vector.broadcast %371 : f32 to vector<1x256xf32>
    %373 = arith.mulf %372, %366 : vector<1x256xf32>
    %374 = arith.addf %356, %373 : vector<1x256xf32>
    %c85 = arith.constant 85 : index
    %375 = memref.load %arg1[%c85] : memref<144xf32, #tpu.memory_space<smem>>
    %376 = vector.broadcast %375 : f32 to vector<1x256xf32>
    %377 = arith.mulf %376, %366 : vector<1x256xf32>
    %378 = arith.addf %360, %377 : vector<1x256xf32>
    %c121 = arith.constant 121 : index
    %379 = memref.load %arg1[%c121] : memref<144xf32, #tpu.memory_space<smem>>
    %380 = vector.broadcast %379 : f32 to vector<1x256xf32>
    %381 = arith.mulf %380, %366 : vector<1x256xf32>
    %382 = arith.addf %364, %381 : vector<1x256xf32>
    %c0_84 = arith.constant 0 : index
    %c2_85 = arith.constant 2 : index
    %c17_86 = arith.constant 17 : index
    %383 = vector.load %arg5[%c0_84, %c2_85, %c17_86] : memref<1x4x290xf32, #tpu.memory_space<vmem>>, vector<1x1x256xf32>
    %384 = vector.shape_cast %383 : vector<1x1x256xf32> to vector<1x256xf32>
    %c22 = arith.constant 22 : index
    %385 = memref.load %arg1[%c22] : memref<144xf32, #tpu.memory_space<smem>>
    %386 = vector.broadcast %385 : f32 to vector<1x256xf32>
    %387 = arith.mulf %386, %384 : vector<1x256xf32>
    %388 = arith.addf %370, %387 : vector<1x256xf32>
    %c58 = arith.constant 58 : index
    %389 = memref.load %arg1[%c58] : memref<144xf32, #tpu.memory_space<smem>>
    %390 = vector.broadcast %389 : f32 to vector<1x256xf32>
    %391 = arith.mulf %390, %384 : vector<1x256xf32>
    %392 = arith.addf %374, %391 : vector<1x256xf32>
    %c94 = arith.constant 94 : index
    %393 = memref.load %arg1[%c94] : memref<144xf32, #tpu.memory_space<smem>>
    %394 = vector.broadcast %393 : f32 to vector<1x256xf32>
    %395 = arith.mulf %394, %384 : vector<1x256xf32>
    %396 = arith.addf %378, %395 : vector<1x256xf32>
    %c130 = arith.constant 130 : index
    %397 = memref.load %arg1[%c130] : memref<144xf32, #tpu.memory_space<smem>>
    %398 = vector.broadcast %397 : f32 to vector<1x256xf32>
    %399 = arith.mulf %398, %384 : vector<1x256xf32>
    %400 = arith.addf %382, %399 : vector<1x256xf32>
    %c0_87 = arith.constant 0 : index
    %c3_88 = arith.constant 3 : index
    %c17_89 = arith.constant 17 : index
    %401 = vector.load %arg5[%c0_87, %c3_88, %c17_89] : memref<1x4x290xf32, #tpu.memory_space<vmem>>, vector<1x1x256xf32>
    %402 = vector.shape_cast %401 : vector<1x1x256xf32> to vector<1x256xf32>
    %c31 = arith.constant 31 : index
    %403 = memref.load %arg1[%c31] : memref<144xf32, #tpu.memory_space<smem>>
    %404 = vector.broadcast %403 : f32 to vector<1x256xf32>
    %405 = arith.mulf %404, %402 : vector<1x256xf32>
    %406 = arith.addf %388, %405 : vector<1x256xf32>
    %c67 = arith.constant 67 : index
    %407 = memref.load %arg1[%c67] : memref<144xf32, #tpu.memory_space<smem>>
    %408 = vector.broadcast %407 : f32 to vector<1x256xf32>
    %409 = arith.mulf %408, %402 : vector<1x256xf32>
    %410 = arith.addf %392, %409 : vector<1x256xf32>
    %c103 = arith.constant 103 : index
    %411 = memref.load %arg1[%c103] : memref<144xf32, #tpu.memory_space<smem>>
    %412 = vector.broadcast %411 : f32 to vector<1x256xf32>
    %413 = arith.mulf %412, %402 : vector<1x256xf32>
    %414 = arith.addf %396, %413 : vector<1x256xf32>
    %c139 = arith.constant 139 : index
    %415 = memref.load %arg1[%c139] : memref<144xf32, #tpu.memory_space<smem>>
    %416 = vector.broadcast %415 : f32 to vector<1x256xf32>
    %417 = arith.mulf %416, %402 : vector<1x256xf32>
    %418 = arith.addf %400, %417 : vector<1x256xf32>
    %c0_90 = arith.constant 0 : index
    %c0_91 = arith.constant 0 : index
    %c18_92 = arith.constant 18 : index
    %419 = vector.load %arg5[%c0_90, %c0_91, %c18_92] : memref<1x4x290xf32, #tpu.memory_space<vmem>>, vector<1x1x256xf32>
    %420 = vector.shape_cast %419 : vector<1x1x256xf32> to vector<1x256xf32>
    %cst_93 = arith.constant 0.000000e+00 : f32
    %421 = vector.broadcast %cst_93 : f32 to vector<1x256xf32>
    %422 = arith.select %26, %420, %421 : vector<1x256xi1>, vector<1x256xf32>
    %c5 = arith.constant 5 : index
    %423 = memref.load %arg1[%c5] : memref<144xf32, #tpu.memory_space<smem>>
    %424 = vector.broadcast %423 : f32 to vector<1x256xf32>
    %425 = arith.mulf %424, %422 : vector<1x256xf32>
    %426 = arith.addf %406, %425 : vector<1x256xf32>
    %c41 = arith.constant 41 : index
    %427 = memref.load %arg1[%c41] : memref<144xf32, #tpu.memory_space<smem>>
    %428 = vector.broadcast %427 : f32 to vector<1x256xf32>
    %429 = arith.mulf %428, %422 : vector<1x256xf32>
    %430 = arith.addf %410, %429 : vector<1x256xf32>
    %c77 = arith.constant 77 : index
    %431 = memref.load %arg1[%c77] : memref<144xf32, #tpu.memory_space<smem>>
    %432 = vector.broadcast %431 : f32 to vector<1x256xf32>
    %433 = arith.mulf %432, %422 : vector<1x256xf32>
    %434 = arith.addf %414, %433 : vector<1x256xf32>
    %c113 = arith.constant 113 : index
    %435 = memref.load %arg1[%c113] : memref<144xf32, #tpu.memory_space<smem>>
    %436 = vector.broadcast %435 : f32 to vector<1x256xf32>
    %437 = arith.mulf %436, %422 : vector<1x256xf32>
    %438 = arith.addf %418, %437 : vector<1x256xf32>
    %c0_94 = arith.constant 0 : index
    %c1_95 = arith.constant 1 : index
    %c18_96 = arith.constant 18 : index
    %439 = vector.load %arg5[%c0_94, %c1_95, %c18_96] : memref<1x4x290xf32, #tpu.memory_space<vmem>>, vector<1x1x256xf32>
    %440 = vector.shape_cast %439 : vector<1x1x256xf32> to vector<1x256xf32>
    %cst_97 = arith.constant 0.000000e+00 : f32
    %441 = vector.broadcast %cst_97 : f32 to vector<1x256xf32>
    %442 = arith.select %26, %440, %441 : vector<1x256xi1>, vector<1x256xf32>
    %c14 = arith.constant 14 : index
    %443 = memref.load %arg1[%c14] : memref<144xf32, #tpu.memory_space<smem>>
    %444 = vector.broadcast %443 : f32 to vector<1x256xf32>
    %445 = arith.mulf %444, %442 : vector<1x256xf32>
    %446 = arith.addf %426, %445 : vector<1x256xf32>
    %c50 = arith.constant 50 : index
    %447 = memref.load %arg1[%c50] : memref<144xf32, #tpu.memory_space<smem>>
    %448 = vector.broadcast %447 : f32 to vector<1x256xf32>
    %449 = arith.mulf %448, %442 : vector<1x256xf32>
    %450 = arith.addf %430, %449 : vector<1x256xf32>
    %c86 = arith.constant 86 : index
    %451 = memref.load %arg1[%c86] : memref<144xf32, #tpu.memory_space<smem>>
    %452 = vector.broadcast %451 : f32 to vector<1x256xf32>
    %453 = arith.mulf %452, %442 : vector<1x256xf32>
    %454 = arith.addf %434, %453 : vector<1x256xf32>
    %c122 = arith.constant 122 : index
    %455 = memref.load %arg1[%c122] : memref<144xf32, #tpu.memory_space<smem>>
    %456 = vector.broadcast %455 : f32 to vector<1x256xf32>
    %457 = arith.mulf %456, %442 : vector<1x256xf32>
    %458 = arith.addf %438, %457 : vector<1x256xf32>
    %c0_98 = arith.constant 0 : index
    %c2_99 = arith.constant 2 : index
    %c18_100 = arith.constant 18 : index
    %459 = vector.load %arg5[%c0_98, %c2_99, %c18_100] : memref<1x4x290xf32, #tpu.memory_space<vmem>>, vector<1x1x256xf32>
    %460 = vector.shape_cast %459 : vector<1x1x256xf32> to vector<1x256xf32>
    %cst_101 = arith.constant 0.000000e+00 : f32
    %461 = vector.broadcast %cst_101 : f32 to vector<1x256xf32>
    %462 = arith.select %26, %460, %461 : vector<1x256xi1>, vector<1x256xf32>
    %c23 = arith.constant 23 : index
    %463 = memref.load %arg1[%c23] : memref<144xf32, #tpu.memory_space<smem>>
    %464 = vector.broadcast %463 : f32 to vector<1x256xf32>
    %465 = arith.mulf %464, %462 : vector<1x256xf32>
    %466 = arith.addf %446, %465 : vector<1x256xf32>
    %c59 = arith.constant 59 : index
    %467 = memref.load %arg1[%c59] : memref<144xf32, #tpu.memory_space<smem>>
    %468 = vector.broadcast %467 : f32 to vector<1x256xf32>
    %469 = arith.mulf %468, %462 : vector<1x256xf32>
    %470 = arith.addf %450, %469 : vector<1x256xf32>
    %c95 = arith.constant 95 : index
    %471 = memref.load %arg1[%c95] : memref<144xf32, #tpu.memory_space<smem>>
    %472 = vector.broadcast %471 : f32 to vector<1x256xf32>
    %473 = arith.mulf %472, %462 : vector<1x256xf32>
    %474 = arith.addf %454, %473 : vector<1x256xf32>
    %c131 = arith.constant 131 : index
    %475 = memref.load %arg1[%c131] : memref<144xf32, #tpu.memory_space<smem>>
    %476 = vector.broadcast %475 : f32 to vector<1x256xf32>
    %477 = arith.mulf %476, %462 : vector<1x256xf32>
    %478 = arith.addf %458, %477 : vector<1x256xf32>
    %c0_102 = arith.constant 0 : index
    %c3_103 = arith.constant 3 : index
    %c18_104 = arith.constant 18 : index
    %479 = vector.load %arg5[%c0_102, %c3_103, %c18_104] : memref<1x4x290xf32, #tpu.memory_space<vmem>>, vector<1x1x256xf32>
    %480 = vector.shape_cast %479 : vector<1x1x256xf32> to vector<1x256xf32>
    %cst_105 = arith.constant 0.000000e+00 : f32
    %481 = vector.broadcast %cst_105 : f32 to vector<1x256xf32>
    %482 = arith.select %26, %480, %481 : vector<1x256xi1>, vector<1x256xf32>
    %c32 = arith.constant 32 : index
    %483 = memref.load %arg1[%c32] : memref<144xf32, #tpu.memory_space<smem>>
    %484 = vector.broadcast %483 : f32 to vector<1x256xf32>
    %485 = arith.mulf %484, %482 : vector<1x256xf32>
    %486 = arith.addf %466, %485 : vector<1x256xf32>
    %c68 = arith.constant 68 : index
    %487 = memref.load %arg1[%c68] : memref<144xf32, #tpu.memory_space<smem>>
    %488 = vector.broadcast %487 : f32 to vector<1x256xf32>
    %489 = arith.mulf %488, %482 : vector<1x256xf32>
    %490 = arith.addf %470, %489 : vector<1x256xf32>
    %c104 = arith.constant 104 : index
    %491 = memref.load %arg1[%c104] : memref<144xf32, #tpu.memory_space<smem>>
    %492 = vector.broadcast %491 : f32 to vector<1x256xf32>
    %493 = arith.mulf %492, %482 : vector<1x256xf32>
    %494 = arith.addf %474, %493 : vector<1x256xf32>
    %c140 = arith.constant 140 : index
    %495 = memref.load %arg1[%c140] : memref<144xf32, #tpu.memory_space<smem>>
    %496 = vector.broadcast %495 : f32 to vector<1x256xf32>
    %497 = arith.mulf %496, %482 : vector<1x256xf32>
    %498 = arith.addf %478, %497 : vector<1x256xf32>
    %c0_106 = arith.constant 0 : index
    %c0_107 = arith.constant 0 : index
    %c32_108 = arith.constant 32 : index
    %499 = vector.load %arg5[%c0_106, %c0_107, %c32_108] : memref<1x4x290xf32, #tpu.memory_space<vmem>>, vector<1x1x256xf32>
    %500 = vector.shape_cast %499 : vector<1x1x256xf32> to vector<1x256xf32>
    %cst_109 = arith.constant 0.000000e+00 : f32
    %501 = vector.broadcast %cst_109 : f32 to vector<1x256xf32>
    %502 = arith.select %24, %500, %501 : vector<1x256xi1>, vector<1x256xf32>
    %c6 = arith.constant 6 : index
    %503 = memref.load %arg1[%c6] : memref<144xf32, #tpu.memory_space<smem>>
    %504 = vector.broadcast %503 : f32 to vector<1x256xf32>
    %505 = arith.mulf %504, %502 : vector<1x256xf32>
    %506 = arith.addf %486, %505 : vector<1x256xf32>
    %c42 = arith.constant 42 : index
    %507 = memref.load %arg1[%c42] : memref<144xf32, #tpu.memory_space<smem>>
    %508 = vector.broadcast %507 : f32 to vector<1x256xf32>
    %509 = arith.mulf %508, %502 : vector<1x256xf32>
    %510 = arith.addf %490, %509 : vector<1x256xf32>
    %c78 = arith.constant 78 : index
    %511 = memref.load %arg1[%c78] : memref<144xf32, #tpu.memory_space<smem>>
    %512 = vector.broadcast %511 : f32 to vector<1x256xf32>
    %513 = arith.mulf %512, %502 : vector<1x256xf32>
    %514 = arith.addf %494, %513 : vector<1x256xf32>
    %c114 = arith.constant 114 : index
    %515 = memref.load %arg1[%c114] : memref<144xf32, #tpu.memory_space<smem>>
    %516 = vector.broadcast %515 : f32 to vector<1x256xf32>
    %517 = arith.mulf %516, %502 : vector<1x256xf32>
    %518 = arith.addf %498, %517 : vector<1x256xf32>
    %c0_110 = arith.constant 0 : index
    %c1_111 = arith.constant 1 : index
    %c32_112 = arith.constant 32 : index
    %519 = vector.load %arg5[%c0_110, %c1_111, %c32_112] : memref<1x4x290xf32, #tpu.memory_space<vmem>>, vector<1x1x256xf32>
    %520 = vector.shape_cast %519 : vector<1x1x256xf32> to vector<1x256xf32>
    %cst_113 = arith.constant 0.000000e+00 : f32
    %521 = vector.broadcast %cst_113 : f32 to vector<1x256xf32>
    %522 = arith.select %24, %520, %521 : vector<1x256xi1>, vector<1x256xf32>
    %c15 = arith.constant 15 : index
    %523 = memref.load %arg1[%c15] : memref<144xf32, #tpu.memory_space<smem>>
    %524 = vector.broadcast %523 : f32 to vector<1x256xf32>
    %525 = arith.mulf %524, %522 : vector<1x256xf32>
    %526 = arith.addf %506, %525 : vector<1x256xf32>
    %c51 = arith.constant 51 : index
    %527 = memref.load %arg1[%c51] : memref<144xf32, #tpu.memory_space<smem>>
    %528 = vector.broadcast %527 : f32 to vector<1x256xf32>
    %529 = arith.mulf %528, %522 : vector<1x256xf32>
    %530 = arith.addf %510, %529 : vector<1x256xf32>
    %c87 = arith.constant 87 : index
    %531 = memref.load %arg1[%c87] : memref<144xf32, #tpu.memory_space<smem>>
    %532 = vector.broadcast %531 : f32 to vector<1x256xf32>
    %533 = arith.mulf %532, %522 : vector<1x256xf32>
    %534 = arith.addf %514, %533 : vector<1x256xf32>
    %c123 = arith.constant 123 : index
    %535 = memref.load %arg1[%c123] : memref<144xf32, #tpu.memory_space<smem>>
    %536 = vector.broadcast %535 : f32 to vector<1x256xf32>
    %537 = arith.mulf %536, %522 : vector<1x256xf32>
    %538 = arith.addf %518, %537 : vector<1x256xf32>
    %c0_114 = arith.constant 0 : index
    %c2_115 = arith.constant 2 : index
    %c32_116 = arith.constant 32 : index
    %539 = vector.load %arg5[%c0_114, %c2_115, %c32_116] : memref<1x4x290xf32, #tpu.memory_space<vmem>>, vector<1x1x256xf32>
    %540 = vector.shape_cast %539 : vector<1x1x256xf32> to vector<1x256xf32>
    %cst_117 = arith.constant 0.000000e+00 : f32
    %541 = vector.broadcast %cst_117 : f32 to vector<1x256xf32>
    %542 = arith.select %24, %540, %541 : vector<1x256xi1>, vector<1x256xf32>
    %c24 = arith.constant 24 : index
    %543 = memref.load %arg1[%c24] : memref<144xf32, #tpu.memory_space<smem>>
    %544 = vector.broadcast %543 : f32 to vector<1x256xf32>
    %545 = arith.mulf %544, %542 : vector<1x256xf32>
    %546 = arith.addf %526, %545 : vector<1x256xf32>
    %c60 = arith.constant 60 : index
    %547 = memref.load %arg1[%c60] : memref<144xf32, #tpu.memory_space<smem>>
    %548 = vector.broadcast %547 : f32 to vector<1x256xf32>
    %549 = arith.mulf %548, %542 : vector<1x256xf32>
    %550 = arith.addf %530, %549 : vector<1x256xf32>
    %c96 = arith.constant 96 : index
    %551 = memref.load %arg1[%c96] : memref<144xf32, #tpu.memory_space<smem>>
    %552 = vector.broadcast %551 : f32 to vector<1x256xf32>
    %553 = arith.mulf %552, %542 : vector<1x256xf32>
    %554 = arith.addf %534, %553 : vector<1x256xf32>
    %c132 = arith.constant 132 : index
    %555 = memref.load %arg1[%c132] : memref<144xf32, #tpu.memory_space<smem>>
    %556 = vector.broadcast %555 : f32 to vector<1x256xf32>
    %557 = arith.mulf %556, %542 : vector<1x256xf32>
    %558 = arith.addf %538, %557 : vector<1x256xf32>
    %c0_118 = arith.constant 0 : index
    %c3_119 = arith.constant 3 : index
    %c32_120 = arith.constant 32 : index
    %559 = vector.load %arg5[%c0_118, %c3_119, %c32_120] : memref<1x4x290xf32, #tpu.memory_space<vmem>>, vector<1x1x256xf32>
    %560 = vector.shape_cast %559 : vector<1x1x256xf32> to vector<1x256xf32>
    %cst_121 = arith.constant 0.000000e+00 : f32
    %561 = vector.broadcast %cst_121 : f32 to vector<1x256xf32>
    %562 = arith.select %24, %560, %561 : vector<1x256xi1>, vector<1x256xf32>
    %c33 = arith.constant 33 : index
    %563 = memref.load %arg1[%c33] : memref<144xf32, #tpu.memory_space<smem>>
    %564 = vector.broadcast %563 : f32 to vector<1x256xf32>
    %565 = arith.mulf %564, %562 : vector<1x256xf32>
    %566 = arith.addf %546, %565 : vector<1x256xf32>
    %c69 = arith.constant 69 : index
    %567 = memref.load %arg1[%c69] : memref<144xf32, #tpu.memory_space<smem>>
    %568 = vector.broadcast %567 : f32 to vector<1x256xf32>
    %569 = arith.mulf %568, %562 : vector<1x256xf32>
    %570 = arith.addf %550, %569 : vector<1x256xf32>
    %c105 = arith.constant 105 : index
    %571 = memref.load %arg1[%c105] : memref<144xf32, #tpu.memory_space<smem>>
    %572 = vector.broadcast %571 : f32 to vector<1x256xf32>
    %573 = arith.mulf %572, %562 : vector<1x256xf32>
    %574 = arith.addf %554, %573 : vector<1x256xf32>
    %c141 = arith.constant 141 : index
    %575 = memref.load %arg1[%c141] : memref<144xf32, #tpu.memory_space<smem>>
    %576 = vector.broadcast %575 : f32 to vector<1x256xf32>
    %577 = arith.mulf %576, %562 : vector<1x256xf32>
    %578 = arith.addf %558, %577 : vector<1x256xf32>
    %c0_122 = arith.constant 0 : index
    %c0_123 = arith.constant 0 : index
    %c33_124 = arith.constant 33 : index
    %579 = vector.load %arg5[%c0_122, %c0_123, %c33_124] : memref<1x4x290xf32, #tpu.memory_space<vmem>>, vector<1x1x256xf32>
    %580 = vector.shape_cast %579 : vector<1x1x256xf32> to vector<1x256xf32>
    %c7 = arith.constant 7 : index
    %581 = memref.load %arg1[%c7] : memref<144xf32, #tpu.memory_space<smem>>
    %582 = vector.broadcast %581 : f32 to vector<1x256xf32>
    %583 = arith.mulf %582, %580 : vector<1x256xf32>
    %584 = arith.addf %566, %583 : vector<1x256xf32>
    %c43 = arith.constant 43 : index
    %585 = memref.load %arg1[%c43] : memref<144xf32, #tpu.memory_space<smem>>
    %586 = vector.broadcast %585 : f32 to vector<1x256xf32>
    %587 = arith.mulf %586, %580 : vector<1x256xf32>
    %588 = arith.addf %570, %587 : vector<1x256xf32>
    %c79 = arith.constant 79 : index
    %589 = memref.load %arg1[%c79] : memref<144xf32, #tpu.memory_space<smem>>
    %590 = vector.broadcast %589 : f32 to vector<1x256xf32>
    %591 = arith.mulf %590, %580 : vector<1x256xf32>
    %592 = arith.addf %574, %591 : vector<1x256xf32>
    %c115 = arith.constant 115 : index
    %593 = memref.load %arg1[%c115] : memref<144xf32, #tpu.memory_space<smem>>
    %594 = vector.broadcast %593 : f32 to vector<1x256xf32>
    %595 = arith.mulf %594, %580 : vector<1x256xf32>
    %596 = arith.addf %578, %595 : vector<1x256xf32>
    %c0_125 = arith.constant 0 : index
    %c1_126 = arith.constant 1 : index
    %c33_127 = arith.constant 33 : index
    %597 = vector.load %arg5[%c0_125, %c1_126, %c33_127] : memref<1x4x290xf32, #tpu.memory_space<vmem>>, vector<1x1x256xf32>
    %598 = vector.shape_cast %597 : vector<1x1x256xf32> to vector<1x256xf32>
    %c16_128 = arith.constant 16 : index
    %599 = memref.load %arg1[%c16_128] : memref<144xf32, #tpu.memory_space<smem>>
    %600 = vector.broadcast %599 : f32 to vector<1x256xf32>
    %601 = arith.mulf %600, %598 : vector<1x256xf32>
    %602 = arith.addf %584, %601 : vector<1x256xf32>
    %c52 = arith.constant 52 : index
    %603 = memref.load %arg1[%c52] : memref<144xf32, #tpu.memory_space<smem>>
    %604 = vector.broadcast %603 : f32 to vector<1x256xf32>
    %605 = arith.mulf %604, %598 : vector<1x256xf32>
    %606 = arith.addf %588, %605 : vector<1x256xf32>
    %c88 = arith.constant 88 : index
    %607 = memref.load %arg1[%c88] : memref<144xf32, #tpu.memory_space<smem>>
    %608 = vector.broadcast %607 : f32 to vector<1x256xf32>
    %609 = arith.mulf %608, %598 : vector<1x256xf32>
    %610 = arith.addf %592, %609 : vector<1x256xf32>
    %c124 = arith.constant 124 : index
    %611 = memref.load %arg1[%c124] : memref<144xf32, #tpu.memory_space<smem>>
    %612 = vector.broadcast %611 : f32 to vector<1x256xf32>
    %613 = arith.mulf %612, %598 : vector<1x256xf32>
    %614 = arith.addf %596, %613 : vector<1x256xf32>
    %c0_129 = arith.constant 0 : index
    %c2_130 = arith.constant 2 : index
    %c33_131 = arith.constant 33 : index
    %615 = vector.load %arg5[%c0_129, %c2_130, %c33_131] : memref<1x4x290xf32, #tpu.memory_space<vmem>>, vector<1x1x256xf32>
    %616 = vector.shape_cast %615 : vector<1x1x256xf32> to vector<1x256xf32>
    %c25 = arith.constant 25 : index
    %617 = memref.load %arg1[%c25] : memref<144xf32, #tpu.memory_space<smem>>
    %618 = vector.broadcast %617 : f32 to vector<1x256xf32>
    %619 = arith.mulf %618, %616 : vector<1x256xf32>
    %620 = arith.addf %602, %619 : vector<1x256xf32>
    %c61 = arith.constant 61 : index
    %621 = memref.load %arg1[%c61] : memref<144xf32, #tpu.memory_space<smem>>
    %622 = vector.broadcast %621 : f32 to vector<1x256xf32>
    %623 = arith.mulf %622, %616 : vector<1x256xf32>
    %624 = arith.addf %606, %623 : vector<1x256xf32>
    %c97 = arith.constant 97 : index
    %625 = memref.load %arg1[%c97] : memref<144xf32, #tpu.memory_space<smem>>
    %626 = vector.broadcast %625 : f32 to vector<1x256xf32>
    %627 = arith.mulf %626, %616 : vector<1x256xf32>
    %628 = arith.addf %610, %627 : vector<1x256xf32>
    %c133 = arith.constant 133 : index
    %629 = memref.load %arg1[%c133] : memref<144xf32, #tpu.memory_space<smem>>
    %630 = vector.broadcast %629 : f32 to vector<1x256xf32>
    %631 = arith.mulf %630, %616 : vector<1x256xf32>
    %632 = arith.addf %614, %631 : vector<1x256xf32>
    %c0_132 = arith.constant 0 : index
    %c3_133 = arith.constant 3 : index
    %c33_134 = arith.constant 33 : index
    %633 = vector.load %arg5[%c0_132, %c3_133, %c33_134] : memref<1x4x290xf32, #tpu.memory_space<vmem>>, vector<1x1x256xf32>
    %634 = vector.shape_cast %633 : vector<1x1x256xf32> to vector<1x256xf32>
    %c34 = arith.constant 34 : index
    %635 = memref.load %arg1[%c34] : memref<144xf32, #tpu.memory_space<smem>>
    %636 = vector.broadcast %635 : f32 to vector<1x256xf32>
    %637 = arith.mulf %636, %634 : vector<1x256xf32>
    %638 = arith.addf %620, %637 : vector<1x256xf32>
    %c70 = arith.constant 70 : index
    %639 = memref.load %arg1[%c70] : memref<144xf32, #tpu.memory_space<smem>>
    %640 = vector.broadcast %639 : f32 to vector<1x256xf32>
    %641 = arith.mulf %640, %634 : vector<1x256xf32>
    %642 = arith.addf %624, %641 : vector<1x256xf32>
    %c106 = arith.constant 106 : index
    %643 = memref.load %arg1[%c106] : memref<144xf32, #tpu.memory_space<smem>>
    %644 = vector.broadcast %643 : f32 to vector<1x256xf32>
    %645 = arith.mulf %644, %634 : vector<1x256xf32>
    %646 = arith.addf %628, %645 : vector<1x256xf32>
    %c142 = arith.constant 142 : index
    %647 = memref.load %arg1[%c142] : memref<144xf32, #tpu.memory_space<smem>>
    %648 = vector.broadcast %647 : f32 to vector<1x256xf32>
    %649 = arith.mulf %648, %634 : vector<1x256xf32>
    %650 = arith.addf %632, %649 : vector<1x256xf32>
    %c0_135 = arith.constant 0 : index
    %c0_136 = arith.constant 0 : index
    %c34_137 = arith.constant 34 : index
    %651 = vector.load %arg5[%c0_135, %c0_136, %c34_137] : memref<1x4x290xf32, #tpu.memory_space<vmem>>, vector<1x1x256xf32>
    %652 = vector.shape_cast %651 : vector<1x1x256xf32> to vector<1x256xf32>
    %cst_138 = arith.constant 0.000000e+00 : f32
    %653 = vector.broadcast %cst_138 : f32 to vector<1x256xf32>
    %654 = arith.select %26, %652, %653 : vector<1x256xi1>, vector<1x256xf32>
    %c8 = arith.constant 8 : index
    %655 = memref.load %arg1[%c8] : memref<144xf32, #tpu.memory_space<smem>>
    %656 = vector.broadcast %655 : f32 to vector<1x256xf32>
    %657 = arith.mulf %656, %654 : vector<1x256xf32>
    %658 = arith.addf %638, %657 : vector<1x256xf32>
    %c44 = arith.constant 44 : index
    %659 = memref.load %arg1[%c44] : memref<144xf32, #tpu.memory_space<smem>>
    %660 = vector.broadcast %659 : f32 to vector<1x256xf32>
    %661 = arith.mulf %660, %654 : vector<1x256xf32>
    %662 = arith.addf %642, %661 : vector<1x256xf32>
    %c80 = arith.constant 80 : index
    %663 = memref.load %arg1[%c80] : memref<144xf32, #tpu.memory_space<smem>>
    %664 = vector.broadcast %663 : f32 to vector<1x256xf32>
    %665 = arith.mulf %664, %654 : vector<1x256xf32>
    %666 = arith.addf %646, %665 : vector<1x256xf32>
    %c116 = arith.constant 116 : index
    %667 = memref.load %arg1[%c116] : memref<144xf32, #tpu.memory_space<smem>>
    %668 = vector.broadcast %667 : f32 to vector<1x256xf32>
    %669 = arith.mulf %668, %654 : vector<1x256xf32>
    %670 = arith.addf %650, %669 : vector<1x256xf32>
    %c0_139 = arith.constant 0 : index
    %c1_140 = arith.constant 1 : index
    %c34_141 = arith.constant 34 : index
    %671 = vector.load %arg5[%c0_139, %c1_140, %c34_141] : memref<1x4x290xf32, #tpu.memory_space<vmem>>, vector<1x1x256xf32>
    %672 = vector.shape_cast %671 : vector<1x1x256xf32> to vector<1x256xf32>
    %cst_142 = arith.constant 0.000000e+00 : f32
    %673 = vector.broadcast %cst_142 : f32 to vector<1x256xf32>
    %674 = arith.select %26, %672, %673 : vector<1x256xi1>, vector<1x256xf32>
    %c17_143 = arith.constant 17 : index
    %675 = memref.load %arg1[%c17_143] : memref<144xf32, #tpu.memory_space<smem>>
    %676 = vector.broadcast %675 : f32 to vector<1x256xf32>
    %677 = arith.mulf %676, %674 : vector<1x256xf32>
    %678 = arith.addf %658, %677 : vector<1x256xf32>
    %c53 = arith.constant 53 : index
    %679 = memref.load %arg1[%c53] : memref<144xf32, #tpu.memory_space<smem>>
    %680 = vector.broadcast %679 : f32 to vector<1x256xf32>
    %681 = arith.mulf %680, %674 : vector<1x256xf32>
    %682 = arith.addf %662, %681 : vector<1x256xf32>
    %c89 = arith.constant 89 : index
    %683 = memref.load %arg1[%c89] : memref<144xf32, #tpu.memory_space<smem>>
    %684 = vector.broadcast %683 : f32 to vector<1x256xf32>
    %685 = arith.mulf %684, %674 : vector<1x256xf32>
    %686 = arith.addf %666, %685 : vector<1x256xf32>
    %c125 = arith.constant 125 : index
    %687 = memref.load %arg1[%c125] : memref<144xf32, #tpu.memory_space<smem>>
    %688 = vector.broadcast %687 : f32 to vector<1x256xf32>
    %689 = arith.mulf %688, %674 : vector<1x256xf32>
    %690 = arith.addf %670, %689 : vector<1x256xf32>
    %c0_144 = arith.constant 0 : index
    %c2_145 = arith.constant 2 : index
    %c34_146 = arith.constant 34 : index
    %691 = vector.load %arg5[%c0_144, %c2_145, %c34_146] : memref<1x4x290xf32, #tpu.memory_space<vmem>>, vector<1x1x256xf32>
    %692 = vector.shape_cast %691 : vector<1x1x256xf32> to vector<1x256xf32>
    %cst_147 = arith.constant 0.000000e+00 : f32
    %693 = vector.broadcast %cst_147 : f32 to vector<1x256xf32>
    %694 = arith.select %26, %692, %693 : vector<1x256xi1>, vector<1x256xf32>
    %c26 = arith.constant 26 : index
    %695 = memref.load %arg1[%c26] : memref<144xf32, #tpu.memory_space<smem>>
    %696 = vector.broadcast %695 : f32 to vector<1x256xf32>
    %697 = arith.mulf %696, %694 : vector<1x256xf32>
    %698 = arith.addf %678, %697 : vector<1x256xf32>
    %c62 = arith.constant 62 : index
    %699 = memref.load %arg1[%c62] : memref<144xf32, #tpu.memory_space<smem>>
    %700 = vector.broadcast %699 : f32 to vector<1x256xf32>
    %701 = arith.mulf %700, %694 : vector<1x256xf32>
    %702 = arith.addf %682, %701 : vector<1x256xf32>
    %c98 = arith.constant 98 : index
    %703 = memref.load %arg1[%c98] : memref<144xf32, #tpu.memory_space<smem>>
    %704 = vector.broadcast %703 : f32 to vector<1x256xf32>
    %705 = arith.mulf %704, %694 : vector<1x256xf32>
    %706 = arith.addf %686, %705 : vector<1x256xf32>
    %c134 = arith.constant 134 : index
    %707 = memref.load %arg1[%c134] : memref<144xf32, #tpu.memory_space<smem>>
    %708 = vector.broadcast %707 : f32 to vector<1x256xf32>
    %709 = arith.mulf %708, %694 : vector<1x256xf32>
    %710 = arith.addf %690, %709 : vector<1x256xf32>
    %c0_148 = arith.constant 0 : index
    %c3_149 = arith.constant 3 : index
    %c34_150 = arith.constant 34 : index
    %711 = vector.load %arg5[%c0_148, %c3_149, %c34_150] : memref<1x4x290xf32, #tpu.memory_space<vmem>>, vector<1x1x256xf32>
    %712 = vector.shape_cast %711 : vector<1x1x256xf32> to vector<1x256xf32>
    %cst_151 = arith.constant 0.000000e+00 : f32
    %713 = vector.broadcast %cst_151 : f32 to vector<1x256xf32>
    %714 = arith.select %26, %712, %713 : vector<1x256xi1>, vector<1x256xf32>
    %c35 = arith.constant 35 : index
    %715 = memref.load %arg1[%c35] : memref<144xf32, #tpu.memory_space<smem>>
    %716 = vector.broadcast %715 : f32 to vector<1x256xf32>
    %717 = arith.mulf %716, %714 : vector<1x256xf32>
    %718 = arith.addf %698, %717 : vector<1x256xf32>
    %c71 = arith.constant 71 : index
    %719 = memref.load %arg1[%c71] : memref<144xf32, #tpu.memory_space<smem>>
    %720 = vector.broadcast %719 : f32 to vector<1x256xf32>
    %721 = arith.mulf %720, %714 : vector<1x256xf32>
    %722 = arith.addf %702, %721 : vector<1x256xf32>
    %c107 = arith.constant 107 : index
    %723 = memref.load %arg1[%c107] : memref<144xf32, #tpu.memory_space<smem>>
    %724 = vector.broadcast %723 : f32 to vector<1x256xf32>
    %725 = arith.mulf %724, %714 : vector<1x256xf32>
    %726 = arith.addf %706, %725 : vector<1x256xf32>
    %c143 = arith.constant 143 : index
    %727 = memref.load %arg1[%c143] : memref<144xf32, #tpu.memory_space<smem>>
    %728 = vector.broadcast %727 : f32 to vector<1x256xf32>
    %729 = arith.mulf %728, %714 : vector<1x256xf32>
    %730 = arith.addf %710, %729 : vector<1x256xf32>
    %c0_152 = arith.constant 0 : index
    %c0_153 = arith.constant 0 : index
    %c0_154 = arith.constant 0 : index
    %731 = vector.load %arg4[%c0_152, %c0_153, %c0_154] : memref<1x4x256xf32, #tpu.memory_space<vmem>>, vector<1x1x256xf32>
    %732 = vector.shape_cast %731 : vector<1x1x256xf32> to vector<1x256xf32>
    %733 = vector.shape_cast %718 : vector<1x256xf32> to vector<1x1x256xf32>
    tpu.vector_store %arg4[%c0_152, %c0_153, %c0_154], %733 {strides = array<i32>} : memref<1x4x256xf32, #tpu.memory_space<vmem>>, vector<1x1x256xf32>,
    %c0_155 = arith.constant 0 : index
    %c1_156 = arith.constant 1 : index
    %c0_157 = arith.constant 0 : index
    %734 = vector.load %arg4[%c0_155, %c1_156, %c0_157] : memref<1x4x256xf32, #tpu.memory_space<vmem>>, vector<1x1x256xf32>
    %735 = vector.shape_cast %734 : vector<1x1x256xf32> to vector<1x256xf32>
    %736 = vector.shape_cast %722 : vector<1x256xf32> to vector<1x1x256xf32>
    tpu.vector_store %arg4[%c0_155, %c1_156, %c0_157], %736 {strides = array<i32>} : memref<1x4x256xf32, #tpu.memory_space<vmem>>, vector<1x1x256xf32>,
    %c0_158 = arith.constant 0 : index
    %c2_159 = arith.constant 2 : index
    %c0_160 = arith.constant 0 : index
    %737 = vector.load %arg4[%c0_158, %c2_159, %c0_160] : memref<1x4x256xf32, #tpu.memory_space<vmem>>, vector<1x1x256xf32>
    %738 = vector.shape_cast %737 : vector<1x1x256xf32> to vector<1x256xf32>
    %739 = vector.shape_cast %726 : vector<1x256xf32> to vector<1x1x256xf32>
    tpu.vector_store %arg4[%c0_158, %c2_159, %c0_160], %739 {strides = array<i32>} : memref<1x4x256xf32, #tpu.memory_space<vmem>>, vector<1x1x256xf32>,
    %c0_161 = arith.constant 0 : index
    %c3_162 = arith.constant 3 : index
    %c0_163 = arith.constant 0 : index
    %740 = vector.load %arg4[%c0_161, %c3_162, %c0_163] : memref<1x4x256xf32, #tpu.memory_space<vmem>>, vector<1x1x256xf32>
    %741 = vector.shape_cast %740 : vector<1x1x256xf32> to vector<1x256xf32>
    %742 = vector.shape_cast %730 : vector<1x256xf32> to vector<1x1x256xf32>
    tpu.vector_store %arg4[%c0_161, %c3_162, %c0_163], %742 {strides = array<i32>} : memref<1x4x256xf32, #tpu.memory_space<vmem>>, vector<1x1x256xf32>,
    return
  }
  func.func @transform_0(%arg0: i32, %arg1: memref<144xf32, #tpu.memory_space<smem>>, %arg2: memref<4xf32, #tpu.memory_space<smem>>) -> (i32, i32, i32) {
    %c0_i32 = arith.constant 0 : i32
    %c0_i32_0 = arith.constant 0 : i32
    %c0_i32_1 = arith.constant 0 : i32
    return %arg0, %c0_i32, %c0_i32_0 : i32, i32, i32
  }
  func.func @transform_1(%arg0: i32, %arg1: memref<144xf32, #tpu.memory_space<smem>>, %arg2: memref<4xf32, #tpu.memory_space<smem>>) -> (i32, i32, i32) {
    %c0_i32 = arith.constant 0 : i32
    %c0_i32_0 = arith.constant 0 : i32
    %c0_i32_1 = arith.constant 0 : i32
    return %arg0, %c0_i32, %c0_i32_0 : i32, i32, i32
  }
}

</mosaic_0001>

<bundles_post_ra>
// kernel: tpu_custom_call.1
= control target key start
LH: loop header
LB: loop body
LE: loop exit
PB: predicated region body
PF: predicated region fallthrough
CT: control target
= control target key end

     0   :  { %s2469_s18 = smov [#allocation4]   ;;  %s2470_s19 = smov [#allocation5]   ;;  %s4247_s0 = inlined_call_operand.hbm [shape: f32[144], index: 0, kind: input, shape index: {}]   ;;  %s4248_s2 = inlined_call_operand.hbm [shape: f32[2,4,256], index: 2, kind: input, shape index: {}]   ;;  %s4249_s3 = inlined_call_operand.hbm [shape: f32[2,4,256], index: 3, kind: output, shape index: {}]   ;;  %s4250_s1 = inlined_call_operand.hbm [shape: f32[4], index: 1, kind: input, shape index: {}]  }
   0x1   :  { %s9_s14 = sshll.u32 %s4247_s0, 4  ;;  %s14_s17 = sshll.u32 %s4250_s1, 4  ;;  %s10_s14 = int_to_ptr.hbm [resolvable:$true] %s9_s14  ;;  %s15_s17 = int_to_ptr.hbm [resolvable:$true] %s14_s17 }
   0x2   :  { %12 = dma.hbm_to_smem %s10_s14, 32, %s2469_s18, [#allocation3] }
   0x3   :  { %17 = dma.hbm_to_smem %s15_s17, 16, %s2470_s19, [#allocation3] }
   0x4   :  { %2443 = dma.done.wait [#allocation3], 48 }
   0x5   :  { %2444 = vsyncadd [#allocation3], 4294967248 }
   0x6   :  { %20 = sfence }
   0x7   :  { %21 = vsyncpa [#allocation7], 0 }
   0x8   :  { %23 = vsyncpa [#allocation7 + $0x1], 0 }
   0x9   :  { %24 = vsyncpa [#allocation8], 0 }
   0xa   :  { %26 = vsyncpa [#allocation8 + $0x1], 0  ;;  %s2507_s20 = smov 0   ;;  %s2509_s0 = smov 0  }
   0xb   :  { %s2511_s21 = smov 0   ;;  %s2513_s1 = smov 0  }
   0xc LB: > { %s2528_s22 = sadd.s32 4294967295, %s2467_s1   ;;  %s2117_s23 = sadd.s32 4294967294, %s2467_s1   ;;  %s2467_s1 = sphi %s2513_s1, %s4408_s1   ;;  %s2463_s21 = sphi %s2511_s21, %s4407_s21   ;;  %s2459_s0 = sphi %s2509_s0, %s4406_s0   ;;  %s2455_s20 = sphi %s2507_s20, %s4405_s20  }
   0xd   : > { %s2532_s24 = sadd.s32 1, %s2467_s1   ;;  %s39_s25 = sadd.s32 1, %s2463_s21 }
   0xe   : > { %s36_s26 = ssub.s32 %s2467_s1, %s2532_s24  ;;  %p46_p0 = scmp.ne.s32.totalorder %s2463_s21, %s2459_s0 }
   0xf   : > { %p37_p1 = scmp.eq.s32.totalorder %s36_s26, 0  ;;  %p47_p2 = scmp.eq.s32.totalorder %s2467_s1, 0 }
  0x10   : > { %p52_p3 = scmp.ne.s32.totalorder %s2459_s0, %s2455_s20  ;;  %p53_p4 = scmp.eq.s32.totalorder %s2528_s22, 0 }
  0x11   : > { %s2544_s27 = scalar_select %p37_p1, %s2463_s21, %s39_s25  }
  0x12   : > { %p2546_p5 = por %p47_p2, %p46_p0  ;;  %p2550_p6 = por %p53_p4, %p52_p3 }
  0x13   : > { %p76_p7 = scmp.eq.s32.totalorder %s2528_s22, 1  ;;  %p82_p8 = scmp.eq.s32.totalorder %s2117_s23, 1 }
  0x14   : > { %p2294_p10 = scmp.lt.s32.totalorder %s2467_s1, 2  ;;  %s102_s5 = sand.u32 1, %s2463_s21  }
  0x15   : > { %p2557_p11 = por %p76_p7, %p46_p0  ;;  %p2561_p12 = por %p82_p8, %p52_p3 }
  0x16   : > { %s2280_s6 = sshll.u32 %s2467_s1, 3  ;;  %s2120_s7 = sshll.u32 %s102_s5, 3 }
  0x17   : > { %s111_s10 = scalar_lea.hbm %s4248_s2, %s2280_s6  ;;  %s106_s12 = scalar_lea.vmem [#allocation6], %s2120_s7 }
  0x18   : > { %s113_s11 = sshll.u32 %s111_s10, 4  ;;  %s115_s13 = sshll.u32 %s106_s12, 4  ;;  %s114_s11 = int_to_ptr.hbm [resolvable:$true] %s113_s11  ;;  %s116_s13 = int_to_ptr.vmem [resolvable:$true] %s115_s13 }
  0x19   : > { %p2572_p13 = pnand %p2294_p10, %p2546_p5  ;;  %p2123_p0 = scmp.ge.s32.totalorder %s2467_s1, 1 }
  0x1a   : > { %p120_p1 = scmp.lt.s32.totalorder %s2467_s1, 3  ;;  %s103_s15 = scalar_lea.sflag [#allocation7], %s102_s5 }
  0x1b   : > { %s2369_s16 = sshra.s32 %s114_s11, 4  ;;  %p2373_p3 = pneg %p2572_p13  ;;  %s2370_s16 = int_to_ptr.hbm [resolvable:$true] %s2369_s16 }
  0x1c   : > { %s2371_s17 = scalar_lea.hbm %s2370_s16, 8  ;;  %s2376_s23 = scalar_lea.hbm %s4248_s2, 16 }
  0x1d   : > { %p2372_p2 = scmp.ne.s32.totalorder %s2370_s16, %s2371_s17  ;;  %p2377_p5 = scmp.lt.s32.totalorder %s2370_s16, %s4248_s2 }
  0x1e   : > { %p2378_p8 = scmp.lt.s32.totalorder %s2376_s23, %s2371_s17 }
  0x1f   : > { %p2374_p4 = pnand %p2373_p3, %p2372_p2 }
  0x20   : > { %p2379_p10 = por %p2378_p8, %p2377_p5 }
  0x21   : > { %p2375_p7 = pneg %p2374_p4 }
  0x23   : > { %p2380_p9 = pnand %p2379_p10, %p2375_p7 }
  0x25   : > { %2383 = shalt.err (!%p2380_p9)
}
  0x26   : > { %2289 = dma.hbm_to_vmem [thread:$0]  (!%p2572_p13), %s114_s11, 128, %s116_s13, %s103_s15  }
  0x27   : > { %p121_p2 = pnand %p2123_p0, %p120_p1 }
  0x29   : > { %124 = sbr.rel (%p121_p2) target bundleno = 849 (0x351), region = 24 }
  0x2e   : > { %s2593_s28 = sand.u32 1, %s2459_s0  }
  0x2f   : > { %s2124_s5 = sshll.u32 %s2593_s28, 3  ;;  %s127_s6 = scalar_lea.sflag [#allocation7], %s2593_s28 }
  0x30   : > { %s130_s7 = scalar_lea.vmem [#allocation6], %s2124_s5 }
  0x31   : > { %2446 = dma.done.wait (%p2550_p6), %s127_s6, 128  }
  0x32   : > { %2448 = vsyncadd (%p2550_p6), %s127_s6, 4294967168  ;;  %vm150_vm0 = vcmask 134144   ;;  %vm152_vm1 = vcmask 273544   ;;  %v2471_v0 = vmov 0.0   ;;  %v154_v1 = vld [vmem:[%s130_s7] sm:$0xff]  ;;  %s2472_s8 = smov 17  }
  0x33   : > { %151 = vst.msk [vmem:[#allocation2] sm:$0xf] %vm150_vm0, %v2471_v0  ;;  %156 = vrot.lane.b32.xlu0 %v154_v1, %s2472_s8  ;;  %vm163_vm2 = vcmask 1043592   ;;  %vm164_vm3 = vcmask 1047556   ;;  %vm159_vm4 = vcmask 138240   ;;  %s2144_s9 = sld [smem:[#allocation4 + $0x1]] }
  0x34   : > { %153 = vst.msk [vmem:[#allocation2 + $0x8] sm:$0xf] %vm152_vm1, %v2471_v0  ;;  %vm165_vm5 = vmor %vm164_vm3, %vm163_vm2  ;;  %s2145_s29 = sld [smem:[#allocation4 + $0x25]]  ;;  %s2473_s10 = smov 126   ;;  %vm657_vm8 = vcmask 1031168   ;;  %vm352_vm10 = vcmask 1039360  }
  0x35   : > { %s2146_s11 = sld [smem:[#allocation4 + $0x49]]  ;;  %s2474_s12 = smov 127   ;;  %vm814_vm12 = vcmask 916480   ;;  %vm966_vm13 = vcmask 908288   ;;  %vm1264_vm14 = vcmask 900096   ;;  %vm1409_vm15 = vcmask 785408  }
  0x36   : > { %s2147_s13 = sld [smem:[#allocation4 + $0x6d]]  ;;  %vm1859_vm1 = vcmask 769024   ;;  %vm2001_vm2 = vcmask 1040384  }
  0x37   : > { %s2148_s14 = sld [smem:[#allocation4 + $0xa]] }
  0x38   : > { %s2149_s15 = sld [smem:[#allocation4 + $0x2e]] }
  0x39   : > { %v340_v9 = vstv %s2144_s9  ;;  %s2150_s16 = sld [smem:[#allocation4 + $0x52]]  ;;  %s2475_s9 = smov 112  }
  0x3a   : > { %v360_v15 = vstv %s2145_s29  ;;  %s2151_s17 = sld [smem:[#allocation4 + $0x76]] }
  0x3b   : > { %v379_v20 = vstv %s2146_s11  ;;  %s2152_s18 = sld [smem:[#allocation4 + $0x13]] }
  0x3c   : > { %v398_v25 = vstv %s2147_s13  ;;  %s2153_s19 = sld [smem:[#allocation4 + $0x37]] }
  0x3d   : > { %v418_v30 = vstv %s2148_s14  ;;  %s2154_s23 = sld [smem:[#allocation4 + $0x5b]] }
  0x3e   : > { %v437_v35 = vstv %s2149_s15  ;;  %s2155_s25 = sld [smem:[#allocation4 + $0x7f]] }
  0x3f   : > { %v456_v40 = vstv %s2150_s16  ;;  %s2156_s26 = sld [smem:[#allocation4 + $0x1c]] }
  0x40   : > { %v475_v45 = vstv %s2151_s17  ;;  %s2157_s6 = sld [smem:[#allocation4 + $0x40]] }
  0x41   : > { %v495_v51 = vstv %s2152_s18  ;;  %s2158_s7 = sld [smem:[#allocation4 + $0x64]] }
  0x42   : > { %v514_v56 = vstv %s2153_s19  ;;  %s2159_s8 = sld [smem:[#allocation4 + $0x88]] }
  0x43   : > { %v533_v61 = vstv %s2154_s23  ;;  %s2192_s29 = sld [smem:[#allocation4 + $0x4]] }
  0x44   : > { %s2815_s11 = sld [smem:[#allocation4 + $0x2d]] }
  0x45   : > { %s2822_s13 = sld [smem:[#allocation4 + $0x28]] }
  0x46   : > { %s2825_s14 = sld [smem:[#allocation4 + $0x36]] }
  0x47   : > { %s2831_s15 = sld [smem:[#allocation4 + $0x3f]] }
  0x48   : > { %s2838_s16 = sld [smem:[#allocation5]] }
  0x49   : > { %s2845_s17 = sld [smem:[#allocation4]] }
  0x4a   : > { %s2855_s18 = sld [smem:[#allocation4 + $0x9]] }
  0x4b   : > { %s2857_s19 = sld [smem:[#allocation4 + $0x12]] }
  0x4c   : > { %s2868_s23 = sld [smem:[#allocation4 + $0x4c]] }
  0xa5   : > { %v157_v2 = vpop.permute.xlu0 %156 }
  0xa6   : > { %v158_v3 = vrot.slane %v157_v2, 4 }
  0xa8   : > { %v160_v4 = vsel %vm159_vm4, %v158_v3, %v157_v2  ;;  %167 = vst.msk [vmem:[#allocation2 + $0x8] sm:$0xf] %vm150_vm0, %v158_v3  ;;  %v552_v2 = vstv %s2155_s25  ;;  %s2870_s25 = sld [smem:[#allocation4 + $0x1b]]  ;;  %vm1561_vm0 = vcmask 777216  }
  0xa9   : > { %166 = vst.msk [vmem:[#allocation2] sm:$0xff] %vm165_vm5, %v160_v4 }
  0xb0   : > { %v2603_v5 = vld [vmem:[#allocation2] ss:$4 sm:$0x7]  ;;  %v2621_v11 = vld [vmem:[#allocation2 + $0x1] ss:$4 sm:$0x7] }
  0xb1   : > { %v2606_v6 = vperm.slane %v2603_v5, 2  ;;  %v2609_v7 = vperm.slane %v2603_v5, 1  ;;  %v2612_v8 = vperm.slane %v2603_v5, 0  ;;  %v341_v10 = vmul.f32 %v340_v9, %v2603_v5  ;;  %v2659_v49 = vld [vmem:[#allocation2 + $0x2] ss:$4 sm:$0x7] }
  0xb2   : > { %v2624_v12 = vperm.slane %v2621_v11, 1  ;;  %v2627_v14 = vperm.slane %v2621_v11, 0  ;;  %v361_v16 = vmul.f32 %v360_v15, %v2603_v5  ;;  %v380_v21 = vmul.f32 %v379_v20, %v2603_v5 }
  0xb3   : > { %4299 = vst [vmem:[#allocation13_spill] sm:$0xff] %v2606_v6  ;;  %655 = vrot.lane.b32.xlu0 %v2606_v6, %s2473_s10  ;;  %653 = vrot.lane.b32.xlu2 %v2609_v7, %s2473_s10  ;;  %v343_v13 = vperm.slane %v341_v10, 0  ;;  %v344_v19 = vperm.slane %v341_v10, 1  ;;  %v345_v24 = vperm.slane %v341_v10, 2  ;;  %v399_v26 = vmul.f32 %v398_v25, %v2603_v5 }
  0xb4   : > { %4300 = vst [vmem:[#allocation14_spill] sm:$0xff] %v2609_v7  ;;  %651 = vrot.lane.b32.xlu1 %v2612_v8, %s2473_s10  ;;  %v363_v17 = vperm.slane %v361_v16, 0  ;;  %v365_v18 = vperm.slane %v361_v16, 2  ;;  %v364_v22 = vperm.slane %v361_v16, 1  ;;  %v384_v23 = vperm.slane %v380_v21, 2 }
  0xb5   : > { %4301 = vst [vmem:[#allocation15_spill] sm:$0xff] %v2612_v8  ;;  %v383_v27 = vperm.slane %v380_v21, 1  ;;  %v403_v28 = vperm.slane %v399_v26, 2  ;;  %v382_v29 = vperm.slane %v380_v21, 0  ;;  %v419_v31 = vmul.f32 %v418_v30, %v2621_v11 }
  0xb6   : > { %4302 = vst [vmem:[#allocation16_spill] sm:$0xff] %v2624_v12  ;;  %v402_v32 = vperm.slane %v399_v26, 1  ;;  %v401_v34 = vperm.slane %v399_v26, 0  ;;  %v438_v36 = vmul.f32 %v437_v35, %v2621_v11  ;;  %v457_v41 = vmul.f32 %v456_v40, %v2621_v11 }
  0xb7   : > { %4303 = vst [vmem:[#allocation17_spill] sm:$0xff] %v2627_v14  ;;  %v423_v33 = vperm.slane %v419_v31, 2  ;;  %v422_v37 = vperm.slane %v419_v31, 1  ;;  %v421_v39 = vperm.slane %v419_v31, 0  ;;  %v476_v46 = vmul.f32 %v475_v45, %v2621_v11 }
  0xb8   : > { %v442_v38 = vperm.slane %v438_v36, 2  ;;  %v441_v42 = vperm.slane %v438_v36, 1  ;;  %v461_v43 = vperm.slane %v457_v41, 2  ;;  %v440_v44 = vperm.slane %v438_v36, 0 }
  0xb9   : > { %v460_v47 = vperm.slane %v457_v41, 1  ;;  %v480_v48 = vperm.slane %v476_v46, 2  ;;  %v459_v50 = vperm.slane %v457_v41, 0  ;;  %v496_v52 = vmul.f32 %v495_v51, %v2659_v49 }
  0xba   : > { %v479_v53 = vperm.slane %v476_v46, 1  ;;  %v478_v55 = vperm.slane %v476_v46, 0  ;;  %v515_v57 = vmul.f32 %v514_v56, %v2659_v49  ;;  %v534_v62 = vmul.f32 %v533_v61, %v2659_v49 }
  0xbb   : > { %694 = vrot.lane.b32.xlu2 %v2624_v12, %s2473_s10  ;;  %346 = vrot.lane.b32.xlu0 %v343_v13, %s2474_s12  ;;  %v500_v54 = vperm.slane %v496_v52, 2  ;;  %v499_v58 = vperm.slane %v496_v52, 1  ;;  %v498_v60 = vperm.slane %v496_v52, 0  ;;  %v553_v4 = vmul.f32 %v552_v2, %v2659_v49  ;;  %v2679_v13 = vld [vmem:[#allocation2 + $0x3] ss:$4 sm:$0x7] }
  0xbc   : > { %692 = vrot.lane.b32.xlu1 %v2627_v14, %s2473_s10  ;;  %v519_v59 = vperm.slane %v515_v57, 2  ;;  %v518_v63 = vperm.slane %v515_v57, 1  ;;  %v538_v0 = vperm.slane %v534_v62, 2  ;;  %v517_v1 = vperm.slane %v515_v57, 0 }
  0xbd   : > { %v537_v9 = vperm.slane %v534_v62, 1  ;;  %v557_v10 = vperm.slane %v553_v4, 2  ;;  %v536_v15 = vperm.slane %v534_v62, 0  ;;  %v572_v16 = vstv %s2156_s26  ;;  %s2476_s26 = smov 111  }
  0xbe   : > { %v555_v21 = vperm.slane %v553_v4, 0  ;;  %v629_v36 = vstv %s2159_s8  ;;  %v2742_v56 = vperm.slane %v2659_v49, 0  ;;  %v2760_v61 = vperm.slane %v2679_v13, 2  ;;  %s2895_s8 = sld [smem:[#allocation4 + $0x51]] }
  0xbf   : > { %v2763_v62 = vperm.slane %v2679_v13, 0 }
  0xc0   : > { %4307 = vst [vmem:[#allocation21_spill] sm:$0xff] %v2742_v56 }
  0xc1   : > { %4309 = vst [vmem:[#allocation23_spill] sm:$0xff] %v2760_v61 }
  0xc2   : > { %4310 = vst [vmem:[#allocation24_spill] sm:$0xff] %v2763_v62 }
  0xc3   : > { %366 = vrot.lane.b32.xlu2 %v363_v17, %s2474_s12  ;;  %370 = vrot.lane.b32.xlu0 %v365_v18, %s2474_s12  ;;  %v573_v18 = vmul.f32 %v572_v16, %v2679_v13  ;;  %v4251_v16 = vlaneseq }
  0xc4   : > { %348 = vrot.lane.b32.xlu1 %v344_v19, %s2474_s12  ;;  %v556_v19 = vperm.slane %v553_v4, 1 }
  0xc5   : > { %v577_v20 = vperm.slane %v573_v18, 2  ;;  %v576_v25 = vperm.slane %v573_v18, 1 }
  0xcb   : > { %368 = vrot.lane.b32.xlu2 %v364_v22, %s2474_s12  ;;  %389 = vrot.lane.b32.xlu0 %v384_v23, %s2474_s12  ;;  %v591_v22 = vstv %s2157_s6  ;;  %s2877_s6 = sld [smem:[#allocation4 + $0x48]] }
  0xcc   : > { %350 = vrot.lane.b32.xlu1 %v345_v24, %s2474_s12  ;;  %v592_v24 = vmul.f32 %v591_v22, %v2679_v13  ;;  %v954_v22 = vstv %s2192_s29  ;;  %s2908_s29 = sld [smem:[#allocation4 + $0x6c]] }
  0xce   : > { %v596_v26 = vperm.slane %v592_v24, 2  ;;  %v594_v35 = vperm.slane %v592_v24, 0 }
  0xd3   : > { %387 = vrot.lane.b32.xlu2 %v383_v27, %s2474_s12  ;;  %408 = vrot.lane.b32.xlu0 %v403_v28, %s2474_s12  ;;  %v575_v27 = vperm.slane %v573_v18, 0  ;;  %v610_v28 = vstv %s2158_s7  ;;  %s2881_s7 = sld [smem:[#allocation5 + $0x2]] }
  0xd4   : > { %385 = vrot.lane.b32.xlu1 %v382_v29, %s2474_s12  ;;  %v611_v31 = vmul.f32 %v610_v28, %v2679_v13 }
  0xd6   : > { %v614_v41 = vperm.slane %v611_v31, 1 }
  0xdb   : > { %406 = vrot.lane.b32.xlu2 %v402_v32, %s2474_s12  ;;  %428 = vrot.lane.b32.xlu0 %v423_v33, %s2474_s12  ;;  %v595_v33 = vperm.slane %v592_v24, 1  ;;  %v207_v24 = vld [vmem:[#allocation2] ss:$4 sm:$0x3] }
  0xdc   : > { %404 = vrot.lane.b32.xlu1 %v401_v34, %s2474_s12  ;;  %v615_v34 = vperm.slane %v611_v31, 2 }
  0xe3   : > { %426 = vrot.lane.b32.xlu2 %v422_v37, %s2474_s12  ;;  %447 = vrot.lane.b32.xlu0 %v442_v38, %s2474_s12 }
  0xe4   : > { %424 = vrot.lane.b32.xlu1 %v421_v39, %s2474_s12  ;;  %v630_v39 = vmul.f32 %v629_v36, %v2679_v13  ;;  %v2859_v36 = vld [vmem:[#allocation2 + $0x1] ss:$4 sm:$0x3] }
  0xeb   : > { %445 = vrot.lane.b32.xlu2 %v441_v42, %s2474_s12  ;;  %466 = vrot.lane.b32.xlu0 %v461_v43, %s2474_s12  ;;  %v634_v42 = vperm.slane %v630_v39, 2  ;;  %v613_v43 = vperm.slane %v611_v31, 0  ;;  %v955_v31 = vmul.f32 %v954_v22, %v2603_v5  ;;  %v974_v22 = vstv %s2822_s13  ;;  %s2966_s13 = sld [smem:[#allocation4 + $0xd]] }
  0xec   : > { %443 = vrot.lane.b32.xlu1 %v440_v44, %s2474_s12 }
  0xf3   : > { %464 = vrot.lane.b32.xlu2 %v460_v47, %s2474_s12  ;;  %485 = vrot.lane.b32.xlu0 %v480_v48, %s2474_s12  ;;  %v633_v47 = vperm.slane %v630_v39, 1  ;;  %v2723_v48 = vperm.slane %v2621_v11, 2 }
  0xf4   : > { %462 = vrot.lane.b32.xlu1 %v459_v50, %s2474_s12  ;;  %v632_v50 = vperm.slane %v630_v39, 0 }
  0xf5   : > { %4304 = vst [vmem:[#allocation18_spill] sm:$0xff] %v2723_v48 }
  0xfb   : > { %483 = vrot.lane.b32.xlu2 %v479_v53, %s2474_s12  ;;  %505 = vrot.lane.b32.xlu0 %v500_v54, %s2474_s12  ;;  %v2736_v54 = vperm.slane %v2659_v49, 1 }
  0xfc   : > { %481 = vrot.lane.b32.xlu1 %v478_v55, %s2474_s12  ;;  %v2739_v55 = vperm.slane %v2659_v49, 2 }
  0xfd   : > { %4305 = vst [vmem:[#allocation19_spill] sm:$0xff] %v2736_v54 }
  0xfe   : > { %4306 = vst [vmem:[#allocation20_spill] sm:$0xff] %v2739_v55 }
 0x103   : > { %503 = vrot.lane.b32.xlu2 %v499_v58, %s2474_s12  ;;  %524 = vrot.lane.b32.xlu0 %v519_v59, %s2474_s12 }
 0x104   : > { %501 = vrot.lane.b32.xlu1 %v498_v60, %s2474_s12  ;;  %v2757_v60 = vperm.slane %v2679_v13, 1 }
 0x106   : > { %4308 = vst [vmem:[#allocation22_spill] sm:$0xff] %v2757_v60 }
 0x10b   : > { %522 = vrot.lane.b32.xlu2 %v518_v63, %s2474_s12  ;;  %543 = vrot.lane.b32.xlu0 %v538_v0, %s2474_s12 }
 0x10c   : > { %520 = vrot.lane.b32.xlu1 %v517_v1, %s2474_s12 }
 0x10d   : > { %v2676_v3 = vpop.permute.xlu2 %653 }
 0x113   : > { %541 = vrot.lane.b32.xlu2 %v537_v9, %s2474_s12  ;;  %562 = vrot.lane.b32.xlu0 %v557_v10, %s2474_s12 }
 0x114   : > { %539 = vrot.lane.b32.xlu1 %v536_v15, %s2474_s12 }
 0x115   : > { %v2684_v17 = vpop.permute.xlu2 %694 }
 0x11b   : > { %560 = vrot.lane.b32.xlu2 %v556_v19, %s2474_s12  ;;  %582 = vrot.lane.b32.xlu0 %v577_v20, %s2474_s12 }
 0x11c   : > { %558 = vrot.lane.b32.xlu1 %v555_v21, %s2474_s12  ;;  %v2818_v21 = vand.u32 127, %v4251_v16  ;;  %v242_v16 = vperm.slane %v2859_v36, 0 }
 0x11d   : > { %v2690_v23 = vpop.permute.xlu2 %366 }
 0x123   : > { %580 = vrot.lane.b32.xlu2 %v576_v25, %s2474_s12  ;;  %601 = vrot.lane.b32.xlu0 %v596_v26, %s2474_s12  ;;  %v4252_v25 = vand.u32 15, %v2818_v21  ;;  %v2836_v26 = vadd.s32 128, %v2818_v21 }
 0x124   : > { %578 = vrot.lane.b32.xlu1 %v575_v27, %s2474_s12 }
 0x125   : > { %v2696_v29 = vpop.permute.xlu0 %655  ;;  %v2698_v30 = vpop.permute.xlu2 %368  ;;  %vm2851_vm6 = vcmp.ge.s32.totalorder %v4252_v25, 1  ;;  %v2875_v25 = vld [vmem:[#allocation2 + $0x2] ss:$4 sm:$0x3] }
 0x126   : > { %v2701_v32 = vpop.permute.xlu1 %651 }
 0x12b   : > { %599 = vrot.lane.b32.xlu2 %v595_v33, %s2474_s12  ;;  %620 = vrot.lane.b32.xlu0 %v615_v34, %s2474_s12  ;;  %v209_v33 = vperm.slane %v207_v24, 0 }
 0x12c   : > { %597 = vrot.lane.b32.xlu1 %v594_v35, %s2474_s12  ;;  %v4322_v35 = vmov 0 }
 0x12d   : > { %v2706_v37 = vpop.permute.xlu2 %387  ;;  %v2708_v38 = vpop.permute.xlu0 %346  ;;  %v4323_v35 = vsel %vm2851_vm6, 4294967295, %v4322_v35 }
 0x12e   : > { %v2711_v40 = vpop.permute.xlu1 %692  ;;  %4324 = vst [vmem:[#allocation36_spill] sm:$0xff] %v4323_v35 }
 0x133   : > { %618 = vrot.lane.b32.xlu2 %v614_v41, %s2474_s12  ;;  %639 = vrot.lane.b32.xlu0 %v634_v42, %s2474_s12  ;;  %v958_v41 = vperm.slane %v955_v31, 1  ;;  %v959_v42 = vperm.slane %v955_v31, 2 }
 0x134   : > { %616 = vrot.lane.b32.xlu1 %v613_v43, %s2474_s12 }
 0x135   : > { %v2716_v44 = vpop.permute.xlu2 %406  ;;  %v2718_v45 = vpop.permute.xlu0 %370 }
 0x136   : > { %v2720_v46 = vpop.permute.xlu1 %348 }
 0x13b   : > { %637 = vrot.lane.b32.xlu2 %v633_v47, %s2474_s12  ;;  %696 = vrot.lane.b32.xlu0 %v2723_v48, %s2473_s10  ;;  %v2865_v47 = vsel %vm2851_vm6, %v209_v33, 0.0 }
 0x13c   : > { %635 = vrot.lane.b32.xlu1 %v632_v50, %s2474_s12  ;;  %s2820_s12 = sld [smem:[#allocation5 + $0x1]]  ;;  %v957_v50 = vperm.slane %v955_v31, 0  ;;  %v210_v31 = vperm.slane %v207_v24, 1 }
 0x13d   : > { %v2729_v51 = vpop.permute.xlu2 %426  ;;  %v2731_v52 = vpop.permute.xlu0 %389 }
 0x13e   : > { %v2733_v53 = vpop.permute.xlu1 %350 }
 0x143   : > { %734 = vrot.lane.b32.xlu2 %v2736_v54, %s2473_s10  ;;  %736 = vrot.lane.b32.xlu0 %v2739_v55, %s2473_s10 }
 0x144   : > { %732 = vrot.lane.b32.xlu1 %v2742_v56, %s2473_s10 }
 0x145   : > { %v2750_v57 = vpop.permute.xlu2 %445  ;;  %v2752_v58 = vpop.permute.xlu0 %408 }
 0x146   : > { %v2754_v59 = vpop.permute.xlu1 %385 }
 0x14b   : > { %774 = vrot.lane.b32.xlu2 %v2757_v60, %s2473_s10  ;;  %776 = vrot.lane.b32.xlu0 %v2760_v61, %s2473_s10 }
 0x14c   : > { %772 = vrot.lane.b32.xlu1 %v2763_v62, %s2473_s10  ;;  %s2813_s10 = sld [smem:[#allocation4 + $0x24]] }
 0x14d   : > { %v2771_v63 = vpop.permute.xlu2 %464  ;;  %v2773_v0 = vpop.permute.xlu0 %428 }
 0x14e   : > { %4311 = vst [vmem:[#allocation25_spill] sm:$0xff] %v2771_v63  ;;  %v2775_v1 = vpop.permute.xlu1 %404 }
 0x152   : > { %v222_v43 = vstv %s2813_s10  ;;  %s2917_s10 = sld [smem:[#allocation4 + $0x70]] }
 0x153   : > { %810 = vrot.lane.b32.xlu2 %v2609_v7, %s2475_s9  ;;  %812 = vrot.lane.b32.xlu0 %v2606_v6, %s2475_s9  ;;  %v223_v33 = vmul.f32 %v222_v43, %v2865_v47  ;;  %v243_v6 = vperm.slane %v2859_v36, 1  ;;  %v321_v36 = vstv %s2831_s15  ;;  %s2977_s15 = sld [smem:[#allocation4 + $0x63]] }
 0x154   : > { %808 = vrot.lane.b32.xlu1 %v2612_v8, %s2475_s9  ;;  %v249_v8 = vstv %s2855_s18  ;;  %s3010_s18 = sld [smem:[#allocation4 + $0x31]] }
 0x155   : > { %v2783_v2 = vpop.permute.xlu2 %483  ;;  %v2785_v4 = vpop.permute.xlu0 %447 }
 0x156   : > { %4312 = vst [vmem:[#allocation26_spill] sm:$0xff] %v2783_v2  ;;  %v2787_v9 = vpop.permute.xlu1 %424  ;;  %v261_v2 = vstv %s2895_s8  ;;  %s3064_s8 = sld [smem:[#allocation4 + $0x1f]] }
 0x15b   : > { %847 = vrot.lane.b32.xlu2 %v2624_v12, %s2475_s9  ;;  %849 = vrot.lane.b32.xlu0 %v2723_v48, %s2475_s9 }
 0x15c   : > { %845 = vrot.lane.b32.xlu1 %v2627_v14, %s2475_s9 }
 0x15d   : > { %v2795_v10 = vpop.permute.xlu2 %503  ;;  %v2797_v13 = vpop.permute.xlu0 %466 }
 0x15e   : > { %4313 = vst [vmem:[#allocation27_spill] sm:$0xff] %v2795_v10  ;;  %v2799_v15 = vpop.permute.xlu1 %443 }
 0x15f   : > { %4314 = vst [vmem:[#allocation28_spill] sm:$0xff] %v2797_v13  ;;  %v1012_v13 = vstv %s2917_s10  ;;  %s3091_s10 = sld [smem:[#allocation4 + $0x2]] }
 0x160   : > { %4315 = vst [vmem:[#allocation29_spill] sm:$0xff] %v2799_v15 }
 0x163   : > { %883 = vrot.lane.b32.xlu2 %v2736_v54, %s2475_s9  ;;  %885 = vrot.lane.b32.xlu0 %v2739_v55, %s2475_s9  ;;  %v306_v55 = vld [vmem:[#allocation2 + $0x3] ss:$4 sm:$0x3]  ;;  %v216_v54 = vstv %s2845_s17  ;;  %s3003_s17 = sld [smem:[#allocation4 + $0x87]] }
 0x164   : > { %881 = vrot.lane.b32.xlu1 %v2742_v56, %s2475_s9  ;;  %v255_v56 = vstv %s2815_s11  ;;  %s2945_s11 = sld [smem:[#allocation5 + $0x3]] }
 0x165   : > { %v2807_v18 = vpop.permute.xlu2 %522  ;;  %v2809_v19 = vpop.permute.xlu0 %485 }
 0x166   : > { %4316 = vst [vmem:[#allocation30_spill] sm:$0xff] %v2807_v18  ;;  %v2811_v20 = vpop.permute.xlu1 %462 }
 0x167   : > { %4317 = vst [vmem:[#allocation31_spill] sm:$0xff] %v2809_v19 }
 0x168   : > { %4318 = vst [vmem:[#allocation32_spill] sm:$0xff] %v2811_v20 }
 0x16b   : > { %919 = vrot.lane.b32.xlu2 %v2757_v60, %s2475_s9  ;;  %921 = vrot.lane.b32.xlu0 %v2760_v61, %s2475_s9  ;;  %v202_v61 = vstv %s2820_s12  ;;  %v4328_v60 = vmov 0  ;;  %s2960_s12 = sld [smem:[#allocation4 + $0x75]] }
 0x16c   : > { %917 = vrot.lane.b32.xlu1 %v2763_v62, %s2475_s9  ;;  %v4327_v62 = vand.u32 15, %v2836_v26  ;;  %s2900_s9 = sld [smem:[#allocation4 + $0x5a]] }
 0x16d   : > { %v2840_v27 = vpop.permute.xlu2 %541  ;;  %v2842_v28 = vpop.permute.xlu0 %505 }
 0x16e   : > { %4319 = vst [vmem:[#allocation33_spill] sm:$0xff] %v2840_v27  ;;  %v2847_v34 = vpop.permute.xlu1 %481  ;;  %vm2891_vm7 = vcmp.ge.s32.totalorder %v4327_v62, 1  ;;  %v225_v62 = vadd.f32 %v223_v33, %v202_v61  ;;  %v217_v27 = vmul.f32 %v216_v54, %v2865_v47 }
 0x16f   : > { %4320 = vst [vmem:[#allocation34_spill] sm:$0xff] %v2842_v28  ;;  %v4329_v60 = vsel %vm2891_vm7, 4294967295, %v4328_v60  ;;  %v2912_v48 = vsel %vm2891_vm7, %v210_v31, 0.0  ;;  %v308_v31 = vperm.slane %v306_v55, 0  ;;  %v4334_v28 = vstv %s2825_s14  ;;  %s3013_s14 = sld [smem:[#allocation4 + $0x55]] }
 0x170   : > { %4321 = vst [vmem:[#allocation35_spill] sm:$0xff] %v2847_v34  ;;  %v224_v34 = vmul.f32 %v222_v43, %v2912_v48  ;;  %v228_v43 = vstv %s2877_s6  ;;  %s3032_s6 = sld [smem:[#allocation4 + $0x3a]] }
 0x171   : > { %4330 = vst [vmem:[#allocation39_spill] sm:$0xff] %v4329_v60 }
 0x173   : > { %962 = vrot.lane.b32.xlu2 %v958_v41, %s2476_s26  ;;  %964 = vrot.lane.b32.xlu0 %v959_v42, %s2476_s26  ;;  %v975_v42 = vmul.f32 %v974_v22, %v2603_v5  ;;  %v2905_v22 = vsel %vm2851_vm6, %v242_v16, 0.0  ;;  %v993_v16 = vstv %s2868_s23  ;;  %s3020_s23 = sld [smem:[#allocation4 + $0x16]] }
 0x174   : > { %960 = vrot.lane.b32.xlu1 %v957_v50, %s2476_s26  ;;  %v275_v50 = vperm.slane %v2875_v25, 0 }
 0x175   : > { %v2883_v39 = vpop.permute.xlu2 %560  ;;  %v2885_v41 = vpop.permute.xlu0 %524  ;;  %v978_v14 = vperm.slane %v975_v42, 1  ;;  %v979_v12 = vperm.slane %v975_v42, 2  ;;  %v977_v7 = vperm.slane %v975_v42, 0  ;;  %v200_v42 = vstv %s2838_s16  ;;  %s2984_s16 = sld [smem:[#allocation4 + $0x7e]] }
 0x176   : > { %4325 = vst [vmem:[#allocation37_spill] sm:$0xff] %v2883_v39  ;;  %v2897_v24 = vpop.permute.xlu1 %501  ;;  %v256_v39 = vmul.f32 %v255_v56, %v2905_v22  ;;  %v2922_v33 = vsel %vm2851_vm6, %v275_v50, 0.0  ;;  %v282_v50 = vstv %s2857_s19  ;;  %s3016_s19 = sld [smem:[#allocation4 + $0x79]] }
 0x177   : > { %4326 = vst [vmem:[#allocation38_spill] sm:$0xff] %v2885_v41  ;;  %v289_v20 = vmul.f32 %v4334_v28, %v2922_v33  ;;  %v226_v41 = vadd.f32 %v224_v34, %v202_v61  ;;  %v230_v34 = vmul.f32 %v228_v43, %v2912_v48 }
 0x178   : > { %4331 = vst [vmem:[#allocation40_spill] sm:$0xff] %v2897_v24  ;;  %v258_v18 = vadd.f32 %v256_v39, %v225_v62  ;;  %v2951_v39 = vsel %vm2851_vm6, %v308_v31, 0.0  ;;  %v219_v62 = vadd.f32 %v217_v27, %v200_v42 }
 0x179   : > { %v322_v31 = vmul.f32 %v321_v36, %v2951_v39 }
 0x17a   : > { %v291_v19 = vadd.f32 %v289_v20, %v258_v18  ;;  %v218_v18 = vmul.f32 %v216_v54, %v2912_v48 }
 0x17b   : > { %982 = vrot.lane.b32.xlu2 %v978_v14, %s2476_s26  ;;  %984 = vrot.lane.b32.xlu0 %v979_v12, %s2476_s26  ;;  %v994_v14 = vmul.f32 %v993_v16, %v2603_v5  ;;  %v276_v12 = vperm.slane %v2875_v25, 1  ;;  %v2955_v16 = vsel %vm2891_vm7, %v243_v6, 0.0  ;;  %v309_v25 = vperm.slane %v306_v55, 1 }
 0x17c   : > { %980 = vrot.lane.b32.xlu1 %v977_v7, %s2476_s26  ;;  %v257_v27 = vmul.f32 %v255_v56, %v2955_v16  ;;  %v283_v56 = vmul.f32 %v282_v50, %v2922_v33  ;;  %v2987_v54 = vadd.f32 %v322_v31, %v291_v19 }
 0x17d   : > { %v2934_v24 = vpop.permute.xlu2 %580  ;;  %v2936_v10 = vpop.permute.xlu0 %543  ;;  %v997_v15 = vperm.slane %v994_v14, 1  ;;  %v998_v35 = vperm.slane %v994_v14, 2  ;;  %v996_v63 = vperm.slane %v994_v14, 0  ;;  %v2970_v55 = vsel %vm2891_vm7, %v276_v12, 0.0 }
 0x17e   : > { %4332 = vst [vmem:[#allocation41_spill] sm:$0xff] %v2934_v24  ;;  %v2947_v7 = vpop.permute.xlu1 %520  ;;  %v234_v24 = vstv %s2908_s29  ;;  %v2974_v61 = vsel %vm2891_vm7, %v309_v25, 0.0  ;;  %v259_v20 = vadd.f32 %v257_v27, %v226_v41  ;;  %v229_v14 = vmul.f32 %v228_v43, %v2865_v47  ;;  %s3075_s29 = sld [smem:[#allocation4 + $0x2f]] }
 0x17f   : > { %4333 = vst [vmem:[#allocation42_spill] sm:$0xff] %v2936_v10  ;;  %v204_v10 = vstv %s2881_s7  ;;  %v4336_v12 = vstv %s2870_s25  ;;  %v1013_v41 = vmul.f32 %v1012_v13, %v2603_v5  ;;  %v4338_v43 = vmov %v4334_v28  ;;  %s3060_s7 = sld [smem:[#allocation4 + $0x82]] }
 0x180   : > { %4335 = vst [vmem:[#allocation43_spill] sm:$0xff] %v2947_v7  ;;  %v250_v7 = vmul.f32 %v249_v8, %v2905_v22  ;;  %v290_v25 = vmul.f32 %v4338_v43, %v2970_v55  ;;  %v323_v27 = vmul.f32 %v321_v36, %v2974_v61  ;;  %v235_v19 = vmul.f32 %v234_v24, %v2865_v47 }
 0x181   : > { %v251_v28 = vmul.f32 %v249_v8, %v2955_v16  ;;  %v284_v60 = vmul.f32 %v282_v50, %v2970_v55  ;;  %v232_v13 = vadd.f32 %v230_v34, %v204_v10  ;;  %v231_v36 = vadd.f32 %v229_v14, %v204_v10 }
 0x182   : > { %v252_v6 = vadd.f32 %v250_v7, %v219_v62  ;;  %v316_v7 = vmul.f32 %v4336_v12, %v2951_v39  ;;  %v220_v12 = vadd.f32 %v218_v18, %v200_v42  ;;  %v292_v5 = vadd.f32 %v290_v25, %v259_v20 }
 0x183   : > { %1001 = vrot.lane.b32.xlu2 %v997_v15, %s2476_s26  ;;  %1003 = vrot.lane.b32.xlu0 %v998_v35, %s2476_s26  ;;  %v236_v15 = vmul.f32 %v234_v24, %v2912_v48  ;;  %v267_v43 = vstv %s2960_s12  ;;  %v263_v47 = vmul.f32 %v261_v2, %v2955_v16  ;;  %v1017_v42 = vperm.slane %v1013_v41, 2  ;;  %s3106_s12 = sld [smem:[#allocation4 + $0x77]] }
 0x184   : > { %999 = vrot.lane.b32.xlu1 %v996_v63, %s2476_s26  ;;  %v206_v63 = vstv %s2945_s11  ;;  %v285_v48 = vadd.f32 %v283_v56, %v252_v6  ;;  %v1016_v6 = vperm.slane %v1013_v41, 1  ;;  %v262_v8 = vmul.f32 %v261_v2, %v2905_v22  ;;  %s3100_s11 = sld [smem:[#allocation4 + $0x53]] }
 0x185   : > { %v2993_v62 = vpop.permute.xlu2 %599  ;;  %v2995_v35 = vpop.permute.xlu0 %562  ;;  %v238_v24 = vadd.f32 %v236_v15, %v206_v63  ;;  %v237_v50 = vadd.f32 %v235_v19, %v206_v63  ;;  %v1015_v18 = vperm.slane %v1013_v41, 0  ;;  %v1031_v56 = vstv %s2966_s13  ;;  %s3113_s13 = sld [smem:[#allocation4 + $0x26]] }
 0x186   : > { %4337 = vst [vmem:[#allocation44_spill] sm:$0xff] %v2993_v62  ;;  %v3006_v31 = vpop.permute.xlu1 %539  ;;  %v253_v10 = vadd.f32 %v251_v28, %v220_v12  ;;  %v4339_v20 = vstv %s2870_s25  ;;  %v327_v14 = vstv %s2977_s15  ;;  %v269_v15 = vmul.f32 %v267_v43, %v2955_v16  ;;  %s3057_s25 = sld [smem:[#allocation4 + $0x5e]] }
 0x187   : > { %v317_v34 = vmul.f32 %v4339_v20, %v2974_v61  ;;  %v265_v25 = vadd.f32 %v263_v47, %v232_v13  ;;  %v264_v2 = vadd.f32 %v262_v8, %v231_v36  ;;  %v300_v63 = vstv %s2984_s16  ;;  %s3119_s15 = sld [smem:[#allocation4 + $0x4a]] }
 0x188   : > { %v268_v41 = vmul.f32 %v267_v43, %v2905_v22  ;;  %v3034_v28 = vadd.f32 %v316_v7, %v285_v48  ;;  %v4340_v16 = vstv %s2900_s9  ;;  %v271_v12 = vadd.f32 %v269_v15, %v238_v24  ;;  %s3066_s9 = sld [smem:[#allocation4 + $0xb]] }
 0x189   : > { %v296_v19 = vmul.f32 %v4340_v16, %v2970_v55  ;;  %v1032_v36 = vmul.f32 %v1031_v56, %v2621_v11  ;;  %v3044_v47 = vadd.f32 %v323_v27, %v292_v5  ;;  %v329_v22 = vmul.f32 %v327_v14, %v2974_v61  ;;  %s3134_s16 = sld [smem:[#allocation4 + $0x6e]] }
 0x18a   : > { %v4342_v43 = vmov %v4340_v16  ;;  %v270_v48 = vadd.f32 %v268_v41, %v237_v50  ;;  %v286_v8 = vadd.f32 %v284_v60, %v253_v10  ;;  %v333_v24 = vstv %s3003_s17  ;;  %s3291_s17 = sld [smem:[#allocation4 + $0x14]] }
 0x18b   : > { %1020 = vrot.lane.b32.xlu2 %v1016_v6, %s2476_s26  ;;  %1022 = vrot.lane.b32.xlu0 %v1017_v42, %s2476_s26  ;;  %v295_v7 = vmul.f32 %v4342_v43, %v2922_v33  ;;  %v1050_v20 = vstv %s3010_s18  ;;  %v298_v15 = vadd.f32 %v296_v19, %v265_v25  ;;  %v301_v27 = vmul.f32 %v300_v63, %v2922_v33  ;;  %s3302_s18 = sld [smem:[#allocation4 + $0x38]] }
 0x18c   : > { %1018 = vrot.lane.b32.xlu1 %v1015_v18, %s2476_s26  ;;  %v302_v18 = vmul.f32 %v300_v63, %v2970_v55  ;;  %v1069_v5 = vstv %s3013_s14  ;;  %v1036_v62 = vperm.slane %v1032_v36, 2  ;;  %v1088_v43 = vstv %s3016_s19  ;;  %s3314_s14 = sld [smem:[#allocation4 + $0x5c]] }
 0x18d   : > { %v3039_v6 = vpop.permute.xlu2 %618  ;;  %v3041_v13 = vpop.permute.xlu0 %582  ;;  %v297_v16 = vadd.f32 %v295_v7, %v264_v2  ;;  %v303_v50 = vadd.f32 %v301_v27, %v270_v48  ;;  %v1034_v60 = vperm.slane %v1032_v36, 0  ;;  %v1051_v10 = vmul.f32 %v1050_v20, %v2621_v11  ;;  %s3327_s19 = sld [smem:[#allocation4 + $0x80]] }
 0x18e   : > { %4341 = vst [vmem:[#allocation45_spill] sm:$0xff] %v3039_v6  ;;  %v3050_v42 = vpop.permute.xlu1 %558  ;;  %v304_v56 = vadd.f32 %v302_v18, %v271_v12  ;;  %v1035_v6 = vperm.slane %v1032_v36, 1  ;;  %v1107_v55 = vstv %s3020_s23  ;;  %v328_v33 = vmul.f32 %v327_v14, %v2951_v39  ;;  %s3338_s23 = sld [smem:[#allocation4 + $0x1d]] }
 0x18f   : > { %v335_v25 = vmul.f32 %v333_v24, %v2974_v61  ;;  %v3073_v2 = vmul.f32 %v1069_v5, %v2621_v11  ;;  %v3077_v63 = vadd.f32 %v317_v34, %v286_v8  ;;  %v334_v41 = vmul.f32 %v333_v24, %v2951_v39 }
 0x190   : > { %v3082_v19 = vmul.f32 %v1088_v43, %v2621_v11  ;;  %v1126_v14 = vstv %s3032_s6  ;;  %v3085_v61 = vadd.f32 %v329_v22, %v298_v15  ;;  %v3087_v12 = vadd.f32 %v328_v33, %v297_v16  ;;  %s3346_s6 = sld [smem:[#allocation4 + $0x41]] }
 0x191   : > { %v3098_v39 = vmul.f32 %v1107_v55, %v2659_v49  ;;  %v3102_v11 = vadd.f32 %v334_v41, %v303_v50  ;;  %v1054_v22 = vperm.slane %v1051_v10, 1  ;;  %v1053_v7 = vperm.slane %v1051_v10, 0 }
 0x192   : > { %v1055_v48 = vperm.slane %v1051_v10, 2  ;;  %v1073_v8 = vperm.slane %v3073_v2, 1  ;;  %v3111_v18 = vmul.f32 %v1126_v14, %v2659_v49  ;;  %v1074_v20 = vperm.slane %v3073_v2, 2 }
 0x193   : > { %1039 = vrot.lane.b32.xlu2 %v1035_v6, %s2476_s26  ;;  %1041 = vrot.lane.b32.xlu0 %v1036_v62, %s2476_s26  ;;  %v3089_v62 = vadd.f32 %v335_v25, %v304_v56  ;;  %v1145_v27 = vstv %s3057_s25  ;;  %v659_v55 = vsel %vm657_vm8, %v2676_v3, %v2696_v29  ;;  %v1164_v33 = vstv %s3060_s7  ;;  %s3351_s25 = sld [smem:[#allocation4 + $0x65]] }
 0x194   : > { %1037 = vrot.lane.b32.xlu1 %v1034_v60, %s2476_s26  ;;  %v4343_v60 = vand.u32 15, %v2836_v26  ;;  %v698_v25 = vsel %vm657_vm8, %v2711_v40, %v2684_v17  ;;  %v3144_v29 = vmul.f32 %v1145_v27, %v2659_v49  ;;  %v4346_v14 = vand.u32 15, %v2818_v21  ;;  %s3355_s7 = sld [smem:[#allocation4 + $0x89]] }
 0x195   : > { %v3093_v6 = vpop.permute.xlu2 %637  ;;  %v3095_v34 = vpop.permute.xlu0 %601  ;;  %v658_v40 = vsel %vm657_vm8, %v2701_v32, %v2676_v3  ;;  %v372_v21 = vsel %vm352_vm10, %v2690_v23, %v2698_v30  ;;  %v3170_v32 = vmul.f32 %v1164_v33, %v2659_v49  ;;  %v4292_v43 = vstv %s3106_s12 }
 0x196   : > { %v3104_v36 = vpop.permute.xlu1 %578  ;;  %vm3127_vm9 = vcmp.lt.s32.totalorder %v4343_v60, 15  ;;  %vm3149_vm11 = vcmp.lt.s32.totalorder %v4346_v14, 15  ;;  %v665_v14 = vstv %s3091_s10  ;;  %v376_v50 = vadd.f32 %v372_v21, %v2987_v54  ;;  %s3360_s10 = sld [smem:[#allocation4 + $0x3]] }
 0x197   : > { %v663_v27 = vsel %vm3127_vm9, %v659_v55, 0.0  ;;  %v4290_v55 = vstv %s3100_s11  ;;  %v702_v23 = vsel %vm3149_vm11, %v698_v25, 0.0  ;;  %v3181_v26 = vsel %vm3149_vm11, %v658_v40, 0.0 }
 0x198   : > { %v3187_v56 = vmul.f32 %v665_v14, %v663_v27  ;;  %v671_v16 = vstv %s3113_s13  ;;  %v3201_v40 = vmul.f32 %v4290_v55, %v702_v23  ;;  %v677_v24 = vstv %s3119_s15  ;;  %s3374_s13 = sld [smem:[#allocation4 + $0x27]] }
 0x199   : > { %v3206_v49 = vmul.f32 %v4292_v43, %v702_v23  ;;  %v373_v54 = vsel %vm352_vm10, %v2698_v30, %v2718_v45  ;;  %v3212_v21 = vmul.f32 %v665_v14, %v3181_v26  ;;  %v683_v5 = vstv %s3134_s16  ;;  %s3385_s15 = sld [smem:[#allocation4 + $0x4b]] }
 0x19a   : > { %v353_v33 = vsel %vm352_vm10, %v2708_v38, %v2720_v46  ;;  %v392_v55 = vsel %vm352_vm10, %v2706_v37, %v2731_v52  ;;  %v354_v45 = vsel %vm352_vm10, %v2720_v46, %v2733_v53  ;;  %v3230_v14 = vmul.f32 %v671_v16, %v3181_v26  ;;  %s3470_s16 = sld [smem:[#allocation4 + $0x54]] }
 0x19b   : > { %1058 = vrot.lane.b32.xlu2 %v1054_v22, %s2476_s26  ;;  %1060 = vrot.lane.b32.xlu0 %v1055_v48, %s2476_s26  ;;  %v4291_v48 = vstv %s3075_s29  ;;  %v3232_v38 = vmul.f32 %v677_v24, %v663_v27  ;;  %v4349_v52 = vperm.slane %v3073_v2, 0  ;;  %v411_v46 = vsel %vm352_vm10, %v2716_v44, %v2752_v58 }
 0x19c   : > { %1056 = vrot.lane.b32.xlu1 %v1053_v7, %s2476_s26  ;;  %v4293_v7 = vstv %s3066_s9  ;;  %v3197_v15 = vmul.f32 %v4291_v48, %v702_v23  ;;  %v3221_v48 = vmul.f32 %v671_v16, %v663_v27  ;;  %v3251_v16 = vmul.f32 %v683_v5, %v663_v27 }
 0x19d   : > { %v3165_v41 = vpop.permute.xlu2 %734  ;;  %v3167_v3 = vpop.permute.xlu0 %620  ;;  %v3193_v25 = vmul.f32 %v4293_v7, %v702_v23  ;;  %v3238_v23 = vmul.f32 %v677_v24, %v3181_v26  ;;  %v357_v24 = vadd.f32 %v353_v33, %v3034_v28  ;;  %v430_v27 = vsel %vm352_vm10, %v2787_v9, %v2729_v51  ;;  %v4357_v7 = vld [vmem:[#allocation27_spill] sm:$0xff] }
 0x19e   : > { %v3177_v22 = vpop.permute.xlu1 %597  ;;  %v450_v28 = vsel %vm352_vm10, %v2750_v57, %v2785_v4  ;;  %v4355_v4 = vld [vmem:[#allocation32_spill] sm:$0xff] }
 0x1a3   : > { %1077 = vrot.lane.b32.xlu2 %v1073_v8, %s2476_s26  ;;  %1079 = vrot.lane.b32.xlu0 %v1074_v20, %s2476_s26  ;;  %v377_v8 = vadd.f32 %v373_v54, %v3044_v47  ;;  %v391_v20 = vsel %vm352_vm10, %v2754_v59, %v2706_v37  ;;  %v410_v47 = vsel %vm352_vm10, %v2775_v1, %v2716_v44  ;;  %v4353_v54 = vld [vmem:[#allocation31_spill] sm:$0xff] }
 0x1a4   : > { %1075 = vrot.lane.b32.xlu1 %v4349_v52, %s2476_s26  ;;  %v396_v52 = vadd.f32 %v392_v55, %v3085_v61  ;;  %v431_v37 = vsel %vm352_vm10, %v2729_v51, %v2773_v0  ;;  %v358_v59 = vadd.f32 %v354_v45, %v3077_v63  ;;  %v4350_v61 = vld [vmem:[#allocation28_spill] sm:$0xff]  ;;  %v4351_v55 = vld [vmem:[#allocation25_spill] sm:$0xff]  ;;  %v395_v44 = vadd.f32 %v391_v20, %v3087_v12  ;;  %v4354_v45 = vld [vmem:[#allocation26_spill] sm:$0xff] }
 0x1a5   : > { %v3247_v53 = vpop.permute.xlu2 %774  ;;  %v3253_v2 = vpop.permute.xlu0 %639  ;;  %v469_v33 = vsel %vm352_vm10, %v4351_v55, %v4350_v61  ;;  %v415_v1 = vadd.f32 %v411_v46, %v3089_v62  ;;  %v4352_v0 = vld [vmem:[#allocation29_spill] sm:$0xff]  ;;  %v488_v51 = vsel %vm352_vm10, %v4354_v45, %v4353_v54  ;;  %v414_v9 = vadd.f32 %v410_v47, %v3102_v11  ;;  %v4356_v61 = vld [vmem:[#allocation34_spill] sm:$0xff] }
 0x1a6   : > { %v617_v58 = vpop.permute.xlu1 %616  ;;  %v449_v63 = vsel %vm352_vm10, %v4352_v0, %v2750_v57  ;;  %v435_v30 = vadd.f32 %v431_v37, %v358_v59  ;;  %v468_v43 = vsel %vm352_vm10, %v4355_v4, %v4351_v55  ;;  %v508_v12 = vsel %vm352_vm10, %v4357_v7, %v4356_v61  ;;  %v4358_v57 = vld [vmem:[#allocation40_spill] sm:$0xff]  ;;  %v4359_v47 = vld [vmem:[#allocation41_spill] sm:$0xff] }
 0x1a7   : > { %v434_v62 = vadd.f32 %v430_v27, %v357_v24  ;;  %v454_v20 = vadd.f32 %v450_v28, %v377_v8  ;;  %v473_v46 = vadd.f32 %v469_v33, %v396_v52  ;;  %v507_v0 = vsel %vm352_vm10, %v4358_v57, %v4357_v7  ;;  %v4363_v27 = vld [vmem:[#allocation30_spill] sm:$0xff]  ;;  %v4365_v33 = vld [vmem:[#allocation35_spill] sm:$0xff]  ;;  %v4370_v57 = vld [vmem:[#allocation44_spill] sm:$0xff] }
 0x1a8   : > { %v453_v54 = vadd.f32 %v449_v63, %v376_v50  ;;  %v492_v11 = vadd.f32 %v488_v51, %v415_v1  ;;  %v585_v37 = vsel %vm352_vm10, %v4359_v47, %v3041_v13  ;;  %v4360_v59 = vperm.slane %v3082_v19, 1  ;;  %v4362_v50 = vld [vmem:[#allocation38_spill] sm:$0xff]  ;;  %v4368_v51 = vld [vmem:[#allocation33_spill] sm:$0xff] }
 0x1a9   : > { %v4361_v8 = vperm.slane %v3082_v19, 2  ;;  %v1167_v7 = vperm.slane %v3170_v32, 0  ;;  %v472_v24 = vadd.f32 %v468_v43, %v395_v44  ;;  %v512_v52 = vadd.f32 %v508_v12, %v435_v30  ;;  %v4366_v30 = vld [vmem:[#allocation43_spill] sm:$0xff]  ;;  %v4367_v63 = vld [vmem:[#allocation42_spill] sm:$0xff] }
 0x1aa   : > { %v527_v28 = vsel %vm352_vm10, %v4363_v27, %v4362_v50  ;;  %v584_v13 = vsel %vm352_vm10, %v3104_v36, %v4359_v47  ;;  %v4364_v55 = vperm.slane %v3082_v19, 0  ;;  %v487_v1 = vsel %vm352_vm10, %v4365_v33, %v4354_v45  ;;  %v4369_v45 = vld [vmem:[#allocation37_spill] sm:$0xff] }
 0x1ab   : > { %1096 = vrot.lane.b32.xlu2 %v4360_v59, %s2476_s26  ;;  %1098 = vrot.lane.b32.xlu0 %v4361_v8, %s2476_s26  ;;  %v511_v43 = vadd.f32 %v507_v0, %v434_v62  ;;  %v526_v44 = vsel %vm352_vm10, %v4366_v30, %v4363_v27  ;;  %v546_v4 = vsel %vm352_vm10, %v4368_v51, %v4367_v63  ;;  %v751_v33 = vstv %s3302_s18  ;;  %s3495_s18 = sld [smem:[#allocation4 + $0x15]] }
 0x1ac   : > { %1094 = vrot.lane.b32.xlu1 %v4364_v55, %s2476_s26  ;;  %v545_v19 = vsel %vm352_vm10, %v3006_v31, %v4368_v51  ;;  %v565_v12 = vsel %vm352_vm10, %v4369_v45, %v2995_v35  ;;  %v589_v62 = vadd.f32 %v585_v37, %v512_v52  ;;  %v604_v0 = vsel %vm352_vm10, %v4370_v57, %v3095_v34  ;;  %v4371_v55 = vld [vmem:[#allocation45_spill] sm:$0xff] }
 0x1ad   : > { %v3325_v36 = vpop.permute.xlu2 %810  ;;  %v697_v61 = vpop.permute.xlu0 %696  ;;  %v531_v59 = vadd.f32 %v527_v28, %v454_v20  ;;  %v564_v8 = vsel %vm352_vm10, %v3050_v42, %v4369_v45  ;;  %v588_v50 = vadd.f32 %v584_v13, %v511_v43  ;;  %v603_v31 = vsel %vm352_vm10, %v3177_v22, %v4370_v57 }
 0x1ae   : > { %v636_v47 = vpop.permute.xlu1 %635  ;;  %v491_v35 = vadd.f32 %v487_v1, %v414_v9  ;;  %v530_v37 = vadd.f32 %v526_v44, %v453_v54  ;;  %v550_v52 = vadd.f32 %v546_v4, %v473_v46  ;;  %v684_v34 = vmul.f32 %v683_v5, %v3181_v26 }
 0x1af   : > { %v549_v20 = vadd.f32 %v545_v19, %v472_v24  ;;  %v569_v27 = vadd.f32 %v565_v12, %v492_v11  ;;  %v608_v28 = vadd.f32 %v604_v0, %v531_v59  ;;  %v622_v42 = vsel %vm352_vm10, %v617_v58, %v4371_v55 }
 0x1b0   : > { %v568_v22 = vadd.f32 %v564_v8, %v491_v35  ;;  %v669_v9 = vadd.f32 %v3187_v56, %v589_v62  ;;  %v607_v54 = vadd.f32 %v603_v31, %v530_v37  ;;  %v699_v46 = vsel %vm657_vm8, %v2684_v17, %v697_v61 }
 0x1b1   : > { %v668_v5 = vadd.f32 %v3212_v21, %v588_v50  ;;  %v623_v26 = vsel %vm352_vm10, %v4371_v55, %v3167_v3  ;;  %v641_v58 = vsel %vm352_vm10, %v636_v47, %v3093_v6  ;;  %v4372_v56 = vperm.slane %v3098_v39, 1 }
 0x1b2   : > { %v4373_v17 = vperm.slane %v3098_v39, 2  ;;  %v1169_v21 = vperm.slane %v3170_v32, 2  ;;  %v626_v11 = vadd.f32 %v622_v42, %v549_v20  ;;  %v642_v3 = vsel %vm352_vm10, %v3093_v6, %v3253_v2 }
 0x1b3   : > { %1115 = vrot.lane.b32.xlu2 %v4372_v56, %s2476_s26  ;;  %v4374_v24 = vperm.slane %v3098_v39, 0  ;;  %v745_v13 = vstv %s3291_s17  ;;  %v675_v1 = vadd.f32 %v3221_v48, %v608_v28  ;;  %v703_v43 = vsel %vm3127_vm9, %v699_v46, 0.0  ;;  %s3480_s17 = sld [smem:[#allocation4 + $0x67]] }
 0x1b4   : > { %1117 = vrot.lane.b32.xlu0 %v4373_v17, %s2476_s26  ;;  %v757_v6 = vstv %s3314_s14  ;;  %v763_v39 = vstv %s3327_s19  ;;  %v674_v44 = vadd.f32 %v3230_v14, %v607_v54  ;;  %v627_v63 = vadd.f32 %v623_v26, %v550_v52  ;;  %s3505_s14 = sld [smem:[#allocation4 + $0x39]] }
 0x1b5   : > { %1113 = vrot.lane.b32.xlu1 %v4374_v24, %s2476_s26  ;;  %v3390_v30 = vpop.permute.xlu2 %847  ;;  %v737_v2 = vpop.permute.xlu0 %736  ;;  %v645_v51 = vadd.f32 %v641_v58, %v568_v22  ;;  %v708_v61 = vadd.f32 %v3193_v25, %v668_v5  ;;  %v646_v19 = vadd.f32 %v642_v3, %v569_v27  ;;  %v785_v45 = vstv %s3338_s23  ;;  %s3517_s19 = sld [smem:[#allocation4 + $0x5d]] }
 0x1b6   : > { %v733_v4 = vpop.permute.xlu1 %732  ;;  %v739_v48 = vsel %vm657_vm8, %v3165_v41, %v737_v2  ;;  %v791_v12 = vstv %s3346_s6  ;;  %v680_v62 = vadd.f32 %v3238_v23, %v626_v11  ;;  %v4375_v57 = vstv %s3066_s9  ;;  %s3433_s9 = sld [smem:[#allocation4 + $0x6f]] }
 0x1b7   : > { %v707_v0 = vmul.f32 %v4375_v57, %v703_v43  ;;  %v4376_v47 = vstv %s3075_s29  ;;  %v797_v59 = vstv %s3351_s25  ;;  %v4377_v8 = vstv %s3100_s11  ;;  %s3449_s29 = sld [smem:[#allocation4 + $0x43]] }
 0x1b8   : > { %v713_v14 = vmul.f32 %v4376_v47, %v703_v43  ;;  %v719_v50 = vmul.f32 %v4377_v8, %v703_v43  ;;  %v4378_v31 = vstv %s3106_s12  ;;  %v738_v37 = vsel %vm657_vm8, %v733_v4, %v3165_v41  ;;  %s3458_s11 = sld [smem:[#allocation4 + $0xc]] }
 0x1b9   : > { %v725_v35 = vmul.f32 %v4378_v31, %v703_v43  ;;  %v743_v25 = vsel %vm3127_vm9, %v739_v48, 0.0  ;;  %v714_v52 = vadd.f32 %v3197_v15, %v674_v44  ;;  %v681_v23 = vadd.f32 %v3232_v38, %v627_v63  ;;  %s3462_s12 = sld [smem:[#allocation4 + $0x30]] }
 0x1ba   : > { %v686_v20 = vadd.f32 %v684_v34, %v645_v51  ;;  %v803_v27 = vstv %s3355_s7  ;;  %v687_v28 = vadd.f32 %v3251_v16, %v646_v19  ;;  %v4379_v55 = vperm.slane %v3111_v18, 1  ;;  %s3522_s23 = sld [smem:[#allocation4 + $0x78]] }
 0x1bb   : > { %v822_v42 = vstv %s3360_s10  ;;  %v828_v22 = vstv %s3374_s13  ;;  %v720_v41 = vadd.f32 %v3201_v40, %v680_v62  ;;  %v742_v54 = vsel %vm3149_vm11, %v738_v37, 0.0  ;;  %s3538_s6 = sld [smem:[#allocation4 + $0x81]] }
 0x1bc   : > { %1134 = vrot.lane.b32.xlu2 %v4379_v55, %s2476_s26  ;;  %v747_v46 = vmul.f32 %v745_v13, %v743_v25  ;;  %v4380_v15 = vperm.slane %v3111_v18, 0  ;;  %v4381_v38 = vperm.slane %v3111_v18, 2  ;;  %v834_v16 = vstv %s3385_s15  ;;  %s3541_s25 = sld [smem:[#allocation4 + $0x1e]]  ;;  %s2477_s15 = smov 110  }
 0x1bd   : > { %v709_v34 = vadd.f32 %v707_v0, %v669_v9  ;;  %v715_v5 = vadd.f32 %v713_v14, %v675_v1  ;;  %v721_v26 = vadd.f32 %v719_v50, %v681_v23  ;;  %v727_v58 = vadd.f32 %v725_v35, %v687_v28  ;;  %v3435_v40 = vpop.permute.xlu2 %883  ;;  %v777_v56 = vpop.permute.xlu0 %776  ;;  %s3545_s7 = sld [smem:[#allocation4 + $0x42]] }
 0x1be   : > { %1132 = vrot.lane.b32.xlu1 %v4380_v15, %s2476_s26  ;;  %1136 = vrot.lane.b32.xlu0 %v4381_v38, %s2476_s26  ;;  %v726_v17 = vadd.f32 %v3206_v49, %v686_v20  ;;  %v753_v11 = vmul.f32 %v751_v33, %v743_v25  ;;  %v759_v3 = vmul.f32 %v757_v6, %v743_v25  ;;  %v773_v24 = vpop.permute.xlu1 %772  ;;  %v4383_v35 = vperm.slane %v3144_v29, 0  ;;  %s3555_s10 = sld [smem:[#allocation4 + $0x66]] }
 0x1bf   : > { %v779_v43 = vsel %vm657_vm8, %v3247_v53, %v777_v56  ;;  %v746_v18 = vmul.f32 %v745_v13, %v742_v54  ;;  %v752_v2 = vmul.f32 %v751_v33, %v742_v54  ;;  %v778_v44 = vsel %vm657_vm8, %v773_v24, %v3247_v53  ;;  %s3560_s13 = sld [smem:[#allocation4 + $0x8a]] }
 0x1c0   : > { %v783_v9 = vsel %vm3127_vm9, %v779_v43, 0.0  ;;  %v758_v1 = vmul.f32 %v757_v6, %v742_v54  ;;  %v764_v63 = vmul.f32 %v763_v39, %v742_v54  ;;  %v749_v51 = vadd.f32 %v747_v46, %v709_v34 }
 0x1c1   : > { %v782_v49 = vsel %vm3149_vm11, %v778_v44, 0.0  ;;  %v765_v4 = vmul.f32 %v763_v39, %v743_v25  ;;  %v787_v48 = vmul.f32 %v785_v45, %v783_v9  ;;  %v793_v19 = vmul.f32 %v791_v12, %v783_v9 }
 0x1c2   : > { %v799_v62 = vmul.f32 %v797_v59, %v783_v9  ;;  %v755_v57 = vadd.f32 %v753_v11, %v715_v5  ;;  %v786_v13 = vmul.f32 %v785_v45, %v782_v49  ;;  %v792_v33 = vmul.f32 %v791_v12, %v782_v49 }
 0x1c3   : > { %v798_v0 = vmul.f32 %v797_v59, %v782_v49  ;;  %v748_v47 = vadd.f32 %v746_v18, %v708_v61  ;;  %v761_v53 = vadd.f32 %v759_v3, %v721_v26  ;;  %v804_v14 = vmul.f32 %v803_v27, %v782_v49 }
 0x1c4   : > { %v805_v8 = vmul.f32 %v803_v27, %v783_v9  ;;  %v4382_v6 = vperm.slane %v3144_v29, 1  ;;  %v754_v50 = vadd.f32 %v752_v2, %v714_v52  ;;  %v760_v39 = vadd.f32 %v758_v1, %v720_v41 }
 0x1c5   : > { %v766_v31 = vadd.f32 %v764_v63, %v726_v17  ;;  %v4384_v45 = vperm.slane %v3144_v29, 2  ;;  %v840_v61 = vstv %s3433_s9  ;;  %v767_v12 = vadd.f32 %v765_v4, %v727_v58  ;;  %v3460_v52 = vpop.permute.xlu2 %919  ;;  %v813_v23 = vpop.permute.xlu0 %812  ;;  %s2240_s9 = sld [smem:[#allocation4 + $0x7]] }
 0x1c6   : > { %1153 = vrot.lane.b32.xlu2 %v4382_v6, %s2476_s26  ;;  %1151 = vrot.lane.b32.xlu1 %v4383_v35, %s2476_s26  ;;  %v789_v59 = vadd.f32 %v787_v48, %v749_v51  ;;  %v795_v37 = vadd.f32 %v793_v19, %v755_v57  ;;  %v801_v25 = vadd.f32 %v799_v62, %v761_v53  ;;  %v809_v28 = vpop.permute.xlu1 %808  ;;  %v858_v49 = vstv %s3458_s11  ;;  %v3512_v19 = vld [vmem:[#allocation2 + $0x3] ss:$4 sm:$0x7]  ;;  %s2242_s11 = sld [smem:[#allocation4 + $0x4f]] }
 0x1c7   : > { %1155 = vrot.lane.b32.xlu0 %v4384_v45, %s2476_s26  ;;  %v788_v20 = vadd.f32 %v786_v13, %v748_v47  ;;  %v794_v29 = vadd.f32 %v792_v33, %v754_v50  ;;  %v800_v27 = vadd.f32 %v798_v0, %v760_v39  ;;  %v816_v55 = vsel %vm814_vm12, %v3325_v36, %v813_v23 }
 0x1c8   : > { %v806_v41 = vadd.f32 %v804_v14, %v766_v31  ;;  %v807_v54 = vadd.f32 %v805_v8, %v767_v12  ;;  %v815_v46 = vsel %vm814_vm12, %v809_v28, %v3325_v36  ;;  %v820_v38 = vsel %vm2891_vm7, %v816_v55, 0.0 }
 0x1c9   : > { %v819_v5 = vsel %vm2851_vm6, %v815_v46, 0.0  ;;  %v824_v26 = vmul.f32 %v822_v42, %v820_v38  ;;  %v830_v58 = vmul.f32 %v828_v22, %v820_v38  ;;  %v836_v56 = vmul.f32 %v834_v16, %v820_v38 }
 0x1ca   : > { %v823_v17 = vmul.f32 %v822_v42, %v819_v5  ;;  %v829_v36 = vmul.f32 %v828_v22, %v819_v5  ;;  %v835_v11 = vmul.f32 %v834_v16, %v819_v5  ;;  %v841_v3 = vmul.f32 %v840_v61, %v819_v5 }
 0x1cb   : > { %v826_v24 = vadd.f32 %v824_v26, %v789_v59  ;;  %v832_v43 = vadd.f32 %v830_v58, %v795_v37  ;;  %v3488_v18 = vadd.f32 %v836_v56, %v801_v25  ;;  %v842_v2 = vmul.f32 %v840_v61, %v820_v38 }
 0x1cc   : > { %v825_v44 = vadd.f32 %v823_v17, %v788_v20  ;;  %v831_v9 = vadd.f32 %v829_v36, %v794_v29  ;;  %v837_v1 = vadd.f32 %v835_v11, %v800_v27  ;;  %v3490_v63 = vadd.f32 %v841_v3, %v806_v41 }
 0x1cd   : > { %v4387_v42 = vperm.slane %v3170_v32, 1  ;;  %v3497_v22 = vadd.f32 %v842_v2, %v807_v54  ;;  %v1202_v16 = vstv %s3449_s29  ;;  %v3508_v51 = vpop.permute.xlu2 %962  ;;  %v864_v4 = vstv %s3462_s12  ;;  %v850_v48 = vpop.permute.xlu0 %849  ;;  %s2241_s29 = sld [smem:[#allocation4 + $0x2b]]  ;;  %s2479_s12 = smov 95  }
 0x1ce   : > { %1170 = vrot.lane.b32.xlu1 %v1167_v7, %s2476_s26  ;;  %v4388_v62 = vstv %s3064_s8  ;;  %v846_v7 = vpop.permute.xlu1 %845  ;;  %v852_v32 = vsel %vm814_vm12, %v3390_v30, %v850_v48  ;;  %v1203_v0 = vmul.f32 %v3512_v19, %v1202_v16  ;;  %v1221_v8 = vstv %s3480_s17  ;;  %s3536_s8 = sld [smem:[#allocation4 + $0x8b]] }
 0x1cf   : > { %1172 = vrot.lane.b32.xlu2 %v4387_v42, %s2476_s26  ;;  %1174 = vrot.lane.b32.xlu0 %v1169_v21, %s2476_s26  ;;  %v1184_v57 = vmul.f32 %v3512_v19, %v4388_v62  ;;  %v870_v21 = vstv %s3470_s16  ;;  %v851_v13 = vsel %vm814_vm12, %v846_v7, %v3390_v30  ;;  %v3528_v33 = vsel %vm2891_vm7, %v852_v32, 0.0  ;;  %s2243_s16 = sld [smem:[#allocation4 + $0x73]] }
 0x1d0   : > { %v855_v47 = vsel %vm2851_vm6, %v851_v13, 0.0  ;;  %v860_v53 = vmul.f32 %v858_v49, %v3528_v33  ;;  %v866_v14 = vmul.f32 %v864_v4, %v3528_v33  ;;  %v894_v25 = vstv %s3495_s18  ;;  %s2244_s17 = sld [smem:[#allocation4 + $0x10]] }
 0x1d1   : > { %v859_v6 = vmul.f32 %v858_v49, %v855_v47  ;;  %v865_v50 = vmul.f32 %v864_v4, %v855_v47  ;;  %v1187_v39 = vperm.slane %v1184_v57, 1  ;;  %v1186_v31 = vperm.slane %v1184_v57, 0  ;;  %s2245_s18 = sld [smem:[#allocation4 + $0x34]] }
 0x1d2   : > { %v871_v30 = vmul.f32 %v870_v21, %v855_v47  ;;  %v1188_v35 = vperm.slane %v1184_v57, 2  ;;  %v862_v45 = vadd.f32 %v860_v53, %v826_v24  ;;  %v868_v61 = vadd.f32 %v866_v14, %v832_v43 }
 0x1d3   : > { %v861_v12 = vadd.f32 %v859_v6, %v825_v44  ;;  %v867_v59 = vadd.f32 %v865_v50, %v831_v9  ;;  %v900_v23 = vstv %s3505_s14  ;;  %v906_v20 = vstv %s3517_s19  ;;  %s2246_s14 = sld [smem:[#allocation4 + $0x58]] }
 0x1d4   : > { %v3553_v27 = vmul.f32 %v3512_v19, %v1221_v8  ;;  %v872_v28 = vmul.f32 %v870_v21, %v3528_v33  ;;  %v1206_v54 = vperm.slane %v1203_v0, 1  ;;  %v873_v46 = vadd.f32 %v871_v30, %v837_v1  ;;  %s2247_s19 = sld [smem:[#allocation4 + $0x7c]] }
 0x1d5   : > { %v3547_v37 = vpop.permute.xlu2 %982  ;;  %v886_v29 = vpop.permute.xlu0 %885  ;;  %v876_v38 = vstv %s3522_s23  ;;  %v1205_v58 = vperm.slane %v1203_v0, 0  ;;  %v1207_v2 = vperm.slane %v1203_v0, 2  ;;  %v912_v42 = vstv %s3538_s6  ;;  %s3739_s23 = sld [smem:[#allocation4 + $0x19]] }
 0x1d6   : > { %1189 = vrot.lane.b32.xlu1 %v1186_v31, %s2476_s26  ;;  %v882_v55 = vpop.permute.xlu1 %881  ;;  %v888_v41 = vsel %vm814_vm12, %v3435_v40, %v886_v29  ;;  %v877_v44 = vmul.f32 %v876_v38, %v855_v47  ;;  %v1225_v48 = vperm.slane %v3553_v27, 1  ;;  %v1224_v62 = vperm.slane %v3553_v27, 0  ;;  %s3746_s6 = sld [smem:[#allocation4 + $0x29]] }
 0x1d7   : > { %1191 = vrot.lane.b32.xlu2 %v1187_v39, %s2476_s26  ;;  %1193 = vrot.lane.b32.xlu0 %v1188_v35, %s2476_s26  ;;  %v887_v5 = vsel %vm814_vm12, %v882_v55, %v3435_v40  ;;  %v892_v26 = vsel %vm2891_vm7, %v888_v41, 0.0  ;;  %v874_v40 = vadd.f32 %v872_v28, %v3488_v18  ;;  %v1226_v57 = vperm.slane %v3553_v27, 2 }
 0x1d8   : > { %v891_v56 = vsel %vm2851_vm6, %v887_v5, 0.0  ;;  %v896_v17 = vmul.f32 %v894_v25, %v892_v26  ;;  %v902_v36 = vmul.f32 %v900_v23, %v892_v26  ;;  %v908_v11 = vmul.f32 %v906_v20, %v892_v26 }
 0x1d9   : > { %v895_v3 = vmul.f32 %v894_v25, %v891_v56  ;;  %v901_v24 = vmul.f32 %v900_v23, %v891_v56  ;;  %v907_v43 = vmul.f32 %v906_v20, %v891_v56  ;;  %v930_v21 = vstv %s3541_s25  ;;  %s3750_s25 = sld [smem:[#allocation4 + $0x4d]] }
 0x1da   : > { %v898_v9 = vadd.f32 %v896_v17, %v862_v45  ;;  %v904_v1 = vadd.f32 %v902_v36, %v868_v61  ;;  %v910_v18 = vadd.f32 %v908_v11, %v874_v40  ;;  %v1240_v13 = vstv %s3536_s8  ;;  %s3742_s8 = sld [smem:[#allocation4 + $0x5]] }
 0x1db   : > { %v897_v16 = vadd.f32 %v895_v3, %v861_v12  ;;  %v903_v49 = vadd.f32 %v901_v24, %v867_v59  ;;  %v909_v4 = vadd.f32 %v907_v43, %v873_v46  ;;  %v936_v0 = vstv %s3545_s7  ;;  %s3752_s7 = sld [smem:[#allocation4 + $0x71]] }
 0x1dc   : > { %v942_v47 = vstv %s3555_s10  ;;  %v913_v53 = vmul.f32 %v912_v42, %v891_v56  ;;  %v948_v6 = vstv %s3560_s13  ;;  %v879_v50 = vadd.f32 %v877_v44, %v3490_v63  ;;  %s3756_s10 = sld [smem:[#allocation4 + $0x3d]] }
 0x1dd   : > { %v3577_v7 = vpop.permute.xlu2 %1001  ;;  %v922_v32 = vpop.permute.xlu0 %921  ;;  %v878_v39 = vmul.f32 %v876_v38, %v3528_v33  ;;  %v914_v31 = vmul.f32 %v912_v42, %v892_v26  ;;  %s3761_s13 = sld [smem:[#allocation4 + $0x61]] }
 0x1de   : > { %1208 = vrot.lane.b32.xlu1 %v1205_v58, %s2476_s26  ;;  %v918_v14 = vpop.permute.xlu1 %917  ;;  %v924_v8 = vsel %vm814_vm12, %v3460_v52, %v922_v32  ;;  %v915_v28 = vadd.f32 %v913_v53, %v879_v50  ;;  %v1241_v58 = vmul.f32 %v3512_v19, %v1240_v13  ;;  %v4394_v53 = vld [vmem:[#allocation18_spill] sm:$0xff] }
 0x1df   : > { %1210 = vrot.lane.b32.xlu2 %v1206_v54, %s2476_s26  ;;  %1212 = vrot.lane.b32.xlu0 %v1207_v2, %s2476_s26  ;;  %v923_v30 = vsel %vm814_vm12, %v918_v14, %v3460_v52  ;;  %v928_v35 = vsel %vm2891_vm7, %v924_v8, 0.0  ;;  %v880_v38 = vadd.f32 %v878_v39, %v3497_v22 }
 0x1e0   : > { %v927_v45 = vsel %vm2851_vm6, %v923_v30, 0.0  ;;  %v932_v61 = vmul.f32 %v930_v21, %v928_v35  ;;  %v938_v12 = vmul.f32 %v936_v0, %v928_v35  ;;  %v944_v59 = vmul.f32 %v942_v47, %v928_v35  ;;  %v4395_v30 = vld [vmem:[#allocation19_spill] sm:$0xff] }
 0x1e1   : > { %v931_v25 = vmul.f32 %v930_v21, %v927_v45  ;;  %v937_v23 = vmul.f32 %v936_v0, %v927_v45  ;;  %v943_v20 = vmul.f32 %v942_v47, %v927_v45  ;;  %v949_v29 = vmul.f32 %v948_v6, %v927_v45  ;;  %v4392_v0 = vld [vmem:[#allocation16_spill] sm:$0xff]  ;;  %v4393_v47 = vld [vmem:[#allocation17_spill] sm:$0xff] }
 0x1e2   : > { %v934_v63 = vadd.f32 %v932_v61, %v898_v9  ;;  %v940_v27 = vadd.f32 %v938_v12, %v904_v1  ;;  %v946_v33 = vadd.f32 %v944_v59, %v910_v18  ;;  %v950_v46 = vmul.f32 %v948_v6, %v928_v35  ;;  %v4396_v35 = vld [vmem:[#allocation21_spill] sm:$0xff]  ;;  %v4397_v45 = vld [vmem:[#allocation20_spill] sm:$0xff] }
 0x1e3   : > { %v933_v52 = vadd.f32 %v931_v25, %v897_v16  ;;  %v939_v55 = vadd.f32 %v937_v23, %v903_v49  ;;  %v945_v41 = vadd.f32 %v943_v20, %v909_v4  ;;  %v951_v54 = vadd.f32 %v949_v29, %v915_v28  ;;  %v4389_v49 = vld [vmem:[#allocation14_spill] sm:$0xff]  ;;  %v4390_v4 = vld [vmem:[#allocation15_spill] sm:$0xff] }
 0x1e4   : > { %v916_v36 = vadd.f32 %v914_v31, %v880_v38  ;;  %v1244_v2 = vperm.slane %v1241_v58, 1  ;;  %v1243_v44 = vperm.slane %v1241_v58, 0  ;;  %v1245_v9 = vperm.slane %v1241_v58, 2 }
 0x1e5   : > { %v1021_v5 = vpop.permute.xlu2 %1020  ;;  %v965_v26 = vpop.permute.xlu0 %964 }
 0x1e6   : > { %1227 = vrot.lane.b32.xlu1 %v1224_v62, %s2476_s26  ;;  %v961_v56 = vpop.permute.xlu1 %960  ;;  %v968_v17 = vsel %vm966_vm13, %v3508_v51, %v965_v26  ;;  %v952_v43 = vadd.f32 %v950_v46, %v916_v36 }
 0x1e7   : > { %1229 = vrot.lane.b32.xlu2 %v1225_v48, %s2476_s26  ;;  %1231 = vrot.lane.b32.xlu0 %v1226_v57, %s2476_s26  ;;  %v967_v11 = vsel %vm966_vm13, %v961_v56, %v3508_v51  ;;  %v972_v3 = vadd.f32 %v968_v17, %v934_v63  ;;  %v4391_v48 = vld [vmem:[#allocation13_spill] sm:$0xff]  ;;  %v4398_v63 = vld [vmem:[#allocation22_spill] sm:$0xff] }
 0x1e8   : > { %v971_v24 = vadd.f32 %v967_v11, %v933_v52 }
 0x1ed   : > { %v1040_v22 = vpop.permute.xlu2 %1039  ;;  %v985_v19 = vpop.permute.xlu0 %984 }
 0x1ee   : > { %1246 = vrot.lane.b32.xlu1 %v1243_v44, %s2476_s26  ;;  %v981_v1 = vpop.permute.xlu1 %980  ;;  %v987_v40 = vsel %vm966_vm13, %v3547_v37, %v985_v19 }
 0x1ef   : > { %1248 = vrot.lane.b32.xlu2 %v1244_v2, %s2476_s26  ;;  %1250 = vrot.lane.b32.xlu0 %v1245_v9, %s2476_s26  ;;  %v986_v51 = vsel %vm966_vm13, %v981_v1, %v3547_v37  ;;  %v991_v42 = vadd.f32 %v987_v40, %v940_v27  ;;  %v4399_v27 = vld [vmem:[#allocation24_spill] sm:$0xff]  ;;  %s2478_s26 = smov 96  }
 0x1f0   : > { %v990_v16 = vadd.f32 %v986_v51, %v939_v55 }
 0x1f5   : > { %v1059_v62 = vpop.permute.xlu2 %1058  ;;  %v1004_v57 = vpop.permute.xlu0 %1003 }
 0x1f6   : > { %1258 = vrot.lane.b32.xlu1 %v4390_v4, %s2477_s15  ;;  %v1000_v18 = vpop.permute.xlu1 %999  ;;  %v1006_v32 = vsel %vm966_vm13, %v3577_v7, %v1004_v57  ;;  %v1549_v57 = vstv %s2240_s9  ;;  %s3772_s9 = sld [smem:[#allocation4 + $0x56]] }
 0x1f7   : > { %1260 = vrot.lane.b32.xlu2 %v4389_v49, %s2477_s15  ;;  %1262 = vrot.lane.b32.xlu0 %v4391_v48, %s2477_s15  ;;  %v1005_v37 = vsel %vm966_vm13, %v1000_v18, %v3577_v7  ;;  %v1010_v21 = vadd.f32 %v1006_v32, %v946_v33  ;;  %v4400_v33 = vld [vmem:[#allocation23_spill] sm:$0xff] }
 0x1f8   : > { %v1009_v13 = vadd.f32 %v1005_v37, %v945_v41  ;;  %v2341_v32 = vld [vmem:[#allocation2] ss:$4 sm:$0x7] }
 0x1f9   : > { %v1550_v37 = vmul.f32 %v2341_v32, %v1549_v57 }
 0x1fd   : > { %v1078_v14 = vpop.permute.xlu2 %1077  ;;  %v1023_v8 = vpop.permute.xlu0 %1022 }
 0x1fe   : > { %1295 = vrot.lane.b32.xlu1 %v4393_v47, %s2477_s15  ;;  %v1019_v6 = vpop.permute.xlu1 %1018  ;;  %v1025_v50 = vsel %vm966_vm13, %v1021_v5, %v1023_v8 }
 0x1ff   : > { %1297 = vrot.lane.b32.xlu2 %v4392_v0, %s2477_s15  ;;  %1299 = vrot.lane.b32.xlu0 %v4394_v53, %s2477_s15  ;;  %v1024_v39 = vsel %vm966_vm13, %v1019_v6, %v1021_v5  ;;  %v1029_v31 = vadd.f32 %v1025_v50, %v952_v43 }
 0x200   : > { %v1028_v7 = vadd.f32 %v1024_v39, %v951_v54  ;;  %v1553_v39 = vperm.slane %v1550_v37, 1 }
 0x205   : > { %v1097_v61 = vpop.permute.xlu2 %1096  ;;  %v1042_v12 = vpop.permute.xlu0 %1041 }
 0x206   : > { %1331 = vrot.lane.b32.xlu1 %v4396_v35, %s2477_s15  ;;  %v1038_v59 = vpop.permute.xlu1 %1037  ;;  %v1044_v25 = vsel %vm966_vm13, %v1040_v22, %v1042_v12 }
 0x207   : > { %1333 = vrot.lane.b32.xlu2 %v4395_v30, %s2477_s15  ;;  %1335 = vrot.lane.b32.xlu0 %v4397_v45, %s2477_s15  ;;  %v1043_v23 = vsel %vm966_vm13, %v1038_v59, %v1040_v22  ;;  %v1048_v20 = vadd.f32 %v1044_v25, %v972_v3 }
 0x208   : > { %v1047_v29 = vadd.f32 %v1043_v23, %v971_v24 }
 0x20d   : > { %v1116_v28 = vpop.permute.xlu2 %1115  ;;  %v1061_v52 = vpop.permute.xlu0 %1060 }
 0x20e   : > { %1367 = vrot.lane.b32.xlu1 %v4399_v27, %s2477_s15  ;;  %v1057_v55 = vpop.permute.xlu1 %1056  ;;  %v1063_v41 = vsel %vm966_vm13, %v1059_v62, %v1061_v52 }
 0x20f   : > { %1369 = vrot.lane.b32.xlu2 %v4398_v63, %s2477_s15  ;;  %1371 = vrot.lane.b32.xlu0 %v4400_v33, %s2477_s15  ;;  %v1062_v54 = vsel %vm966_vm13, %v1057_v55, %v1059_v62  ;;  %v1067_v46 = vadd.f32 %v1063_v41, %v991_v42  ;;  %s3764_s15 = sld [smem:[#allocation4 + $0xe]] }
 0x210   : > { %v1066_v38 = vadd.f32 %v1062_v54, %v990_v16 }
 0x215   : > { %v1080_v26 = vpop.permute.xlu0 %1079 }
 0x216   : > { %1403 = vrot.lane.b32.xlu1 %v4390_v4, %s2478_s26  ;;  %v1135_v5 = vpop.permute.xlu2 %1134  ;;  %v1076_v58 = vpop.permute.xlu1 %1075  ;;  %v1082_v56 = vsel %vm966_vm13, %v1078_v14, %v1080_v26 }
 0x217   : > { %1405 = vrot.lane.b32.xlu2 %v4389_v49, %s2478_s26  ;;  %1407 = vrot.lane.b32.xlu0 %v4391_v48, %s2478_s26  ;;  %v1081_v17 = vsel %vm966_vm13, %v1076_v58, %v1078_v14  ;;  %v1086_v36 = vadd.f32 %v1082_v56, %v1010_v21 }
 0x218   : > { %v1085_v11 = vadd.f32 %v1081_v17, %v1009_v13 }
 0x21d   : > { %v1099_v24 = vpop.permute.xlu0 %1098 }
 0x21e   : > { %1440 = vrot.lane.b32.xlu1 %v4393_v47, %s2478_s26  ;;  %v1095_v43 = vpop.permute.xlu1 %1094  ;;  %v1101_v2 = vsel %vm966_vm13, %v1097_v61, %v1099_v24 }
 0x21f   : > { %1442 = vrot.lane.b32.xlu2 %v4392_v0, %s2478_s26  ;;  %1444 = vrot.lane.b32.xlu0 %v4394_v53, %s2478_s26  ;;  %v1100_v44 = vsel %vm966_vm13, %v1095_v43, %v1097_v61  ;;  %v1105_v9 = vadd.f32 %v1101_v2, %v1029_v31  ;;  %v1552_v31 = vperm.slane %v1550_v37, 0  ;;  %v1569_v61 = vstv %s2241_s29  ;;  %s3783_s29 = sld [smem:[#allocation4 + $0x7a]] }
 0x220   : > { %v1154_v3 = vpop.permute.xlu2 %1153  ;;  %v1104_v22 = vadd.f32 %v1100_v44, %v1028_v7  ;;  %v1554_v7 = vperm.slane %v1550_v37, 2  ;;  %v1570_v59 = vmul.f32 %v2341_v32, %v1569_v61  ;;  %v1607_v2 = vstv %s2243_s16  ;;  %s3804_s16 = sld [smem:[#allocation4 + $0x3b]] }
 0x222   : > { %v1573_v55 = vperm.slane %v1570_v59, 1  ;;  %v1572_v41 = vperm.slane %v1570_v59, 0  ;;  %v1574_v54 = vperm.slane %v1570_v59, 2 }
 0x226   : > { %1476 = vrot.lane.b32.xlu1 %v4396_v35, %s2478_s26  ;;  %v1118_v1 = vpop.permute.xlu0 %1117 }
 0x227   : > { %1478 = vrot.lane.b32.xlu2 %v4395_v30, %s2478_s26  ;;  %1480 = vrot.lane.b32.xlu0 %v4397_v45, %s2478_s26  ;;  %v1114_v40 = vpop.permute.xlu1 %1113  ;;  %v1120_v51 = vsel %vm966_vm13, %v1116_v28, %v1118_v1  ;;  %v1608_v1 = vmul.f32 %v2341_v32, %v1607_v2  ;;  %v1683_v2 = vstv %s2247_s19  ;;  %s3835_s19 = sld [smem:[#allocation4 + $0x20]] }
 0x228   : > { %v1119_v42 = vsel %vm966_vm13, %v1114_v40, %v1116_v28  ;;  %v3668_v16 = vadd.f32 %v1120_v51, %v1048_v20 }
 0x229   : > { %v1173_v19 = vpop.permute.xlu2 %1172  ;;  %v3670_v62 = vadd.f32 %v1119_v42, %v1047_v29  ;;  %v1611_v57 = vperm.slane %v1608_v1, 1  ;;  %v1610_v37 = vperm.slane %v1608_v1, 0 }
 0x22e   : > { %1512 = vrot.lane.b32.xlu1 %v4399_v27, %s2478_s26 }
 0x22f   : > { %1514 = vrot.lane.b32.xlu2 %v4398_v63, %s2478_s26  ;;  %1516 = vrot.lane.b32.xlu0 %v4400_v33, %s2478_s26  ;;  %s3768_s26 = sld [smem:[#allocation4 + $0x32]] }
 0x230   : > { %v1133_v21 = vpop.permute.xlu1 %1132  ;;  %v1137_v13 = vpop.permute.xlu0 %1136 }
 0x231   : > { %v1192_v18 = vpop.permute.xlu2 %1191  ;;  %v1138_v14 = vsel %vm966_vm13, %v1133_v21, %v1135_v5  ;;  %v1139_v8 = vsel %vm966_vm13, %v1135_v5, %v1137_v13  ;;  %v1612_v21 = vperm.slane %v1608_v1, 2  ;;  %v1626_v13 = vstv %s2244_s17  ;;  %s3809_s17 = sld [smem:[#allocation4 + $0x5f]] }
 0x232   : > { %v3680_v6 = vadd.f32 %v1138_v14, %v1066_v38  ;;  %v3682_v50 = vadd.f32 %v1139_v8, %v1067_v46  ;;  %v1588_v46 = vstv %s2242_s11  ;;  %s3798_s11 = sld [smem:[#allocation4 + $0x17]] }
 0x233   : > { %v1589_v5 = vmul.f32 %v2341_v32, %v1588_v46 }
 0x235   : > { %v1591_v24 = vperm.slane %v1589_v5, 0  ;;  %v1593_v43 = vperm.slane %v1589_v5, 2 }
 0x236   : > { %1555 = vrot.lane.b32.xlu1 %v1552_v31, %s2479_s12 }
 0x237   : > { %1557 = vrot.lane.b32.xlu2 %v1553_v39, %s2479_s12  ;;  %1559 = vrot.lane.b32.xlu0 %v1554_v7, %s2479_s12 }
 0x238   : > { %v1152_v25 = vpop.permute.xlu1 %1151 }
 0x239   : > { %v1211_v12 = vpop.permute.xlu2 %1210  ;;  %v1156_v23 = vpop.permute.xlu0 %1155  ;;  %v1157_v20 = vsel %vm966_vm13, %v1152_v25, %v1154_v3 }
 0x23a   : > { %v1158_v29 = vsel %vm966_vm13, %v1154_v3, %v1156_v23  ;;  %v3689_v28 = vadd.f32 %v1157_v20, %v1085_v11  ;;  %v1592_v3 = vperm.slane %v1589_v5, 1  ;;  %v1645_v23 = vstv %s2245_s18  ;;  %s3816_s18 = sld [smem:[#allocation4 + $0x83]] }
 0x23b   : > { %v3691_v52 = vadd.f32 %v1158_v29, %v1086_v36 }
 0x23e   : > { %1575 = vrot.lane.b32.xlu1 %v1572_v41, %s2479_s12 }
 0x23f   : > { %1577 = vrot.lane.b32.xlu2 %v1573_v55, %s2479_s12  ;;  %1579 = vrot.lane.b32.xlu0 %v1574_v54, %s2479_s12 }
 0x240   : > { %v1171_v26 = vpop.permute.xlu1 %1170 }
 0x241   : > { %v1230_v38 = vpop.permute.xlu2 %1229  ;;  %v1175_v58 = vpop.permute.xlu0 %1174  ;;  %v1176_v56 = vsel %vm966_vm13, %v1171_v26, %v1173_v19 }
 0x242   : > { %v1177_v17 = vsel %vm966_vm13, %v1173_v19, %v1175_v58  ;;  %v3698_v36 = vadd.f32 %v1176_v56, %v1104_v22  ;;  %v1664_v58 = vstv %s2246_s14  ;;  %s3832_s14 = sld [smem:[#allocation4 + $0x85]] }
 0x243   : > { %v3700_v11 = vadd.f32 %v1177_v17, %v1105_v9 }
 0x246   : > { %1594 = vrot.lane.b32.xlu1 %v1591_v24, %s2479_s12 }
 0x247   : > { %1596 = vrot.lane.b32.xlu2 %v1592_v3, %s2479_s12  ;;  %1598 = vrot.lane.b32.xlu0 %v1593_v43, %s2479_s12 }
 0x248   : > { %v1190_v40 = vpop.permute.xlu1 %1189 }
 0x249   : > { %v1249_v44 = vpop.permute.xlu2 %1248  ;;  %v1194_v51 = vpop.permute.xlu0 %1193  ;;  %v1195_v22 = vsel %vm966_vm13, %v1190_v40, %v1192_v18 }
 0x24a   : > { %v1196_v9 = vsel %vm966_vm13, %v1192_v18, %v1194_v51  ;;  %v3708_v19 = vadd.f32 %v1195_v22, %v3670_v62  ;;  %v2342_v18 = vld [vmem:[#allocation2 + $0x1] ss:$4 sm:$0x7]  ;;  %v1702_v22 = vstv %s3739_s23  ;;  %s3838_s23 = sld [smem:[#allocation4 + $0x44]] }
 0x24b   : > { %v3711_v42 = vadd.f32 %v1196_v9, %v3668_v16  ;;  %v1627_v14 = vmul.f32 %v2342_v18, %v1626_v13  ;;  %v1290_v13 = vstv %s3752_s7  ;;  %s3869_s7 = sld [smem:[#allocation4 + $0x2a]] }
 0x24d   : > { %v1630_v61 = vperm.slane %v1627_v14, 1  ;;  %v1629_v59 = vperm.slane %v1627_v14, 0  ;;  %v1631_v25 = vperm.slane %v1627_v14, 2 }
 0x24e   : > { %1613 = vrot.lane.b32.xlu1 %v1610_v37, %s2479_s12  ;;  %v1278_v37 = vstv %s3746_s6  ;;  %s3849_s6 = sld [smem:[#allocation4 + $0x8c]] }
 0x24f   : > { %1615 = vrot.lane.b32.xlu2 %v1611_v57, %s2479_s12  ;;  %1617 = vrot.lane.b32.xlu0 %v1612_v21, %s2479_s12  ;;  %v1272_v57 = vstv %s3742_s8  ;;  %v1284_v21 = vstv %s3750_s25  ;;  %s3843_s8 = sld [smem:[#allocation4 + $0x68]] }
 0x250   : > { %v1209_v62 = vpop.permute.xlu1 %1208  ;;  %s3866_s25 = sld [smem:[#allocation4 + $0x6]] }
 0x251   : > { %v3716_v32 = vpop.permute.xlu2 %1260  ;;  %v1213_v8 = vpop.permute.xlu0 %1212  ;;  %v1214_v16 = vsel %vm966_vm13, %v1209_v62, %v1211_v12 }
 0x252   : > { %v1215_v39 = vsel %vm966_vm13, %v1211_v12, %v1213_v8  ;;  %v3721_v31 = vadd.f32 %v1214_v16, %v3680_v6  ;;  %v1646_v12 = vmul.f32 %v2342_v18, %v1645_v23 }
 0x253   : > { %v3724_v7 = vadd.f32 %v1215_v39, %v3682_v50  ;;  %v1721_v39 = vstv %s3756_s10  ;;  %s3875_s10 = sld [smem:[#allocation4 + $0x4e]] }
 0x254   : > { %v1649_v46 = vperm.slane %v1646_v12, 1  ;;  %v1648_v5 = vperm.slane %v1646_v12, 0  ;;  %v1650_v26 = vperm.slane %v1646_v12, 2 }
 0x256   : > { %1632 = vrot.lane.b32.xlu1 %v1629_v59, %s2479_s12 }
 0x257   : > { %1634 = vrot.lane.b32.xlu2 %v1630_v61, %s2479_s12  ;;  %1636 = vrot.lane.b32.xlu0 %v1631_v25, %s2479_s12 }
 0x258   : > { %v1228_v29 = vpop.permute.xlu1 %1227 }
 0x259   : > { %v3729_v20 = vpop.permute.xlu2 %1297  ;;  %v1232_v6 = vpop.permute.xlu0 %1231  ;;  %v1233_v55 = vsel %vm966_vm13, %v1228_v29, %v1230_v38 }
 0x25a   : > { %v1234_v50 = vsel %vm966_vm13, %v1230_v38, %v1232_v6  ;;  %v3734_v41 = vadd.f32 %v1233_v55, %v3689_v28 }
 0x25b   : > { %v3737_v54 = vadd.f32 %v1234_v50, %v3691_v52  ;;  %v1665_v52 = vmul.f32 %v2342_v18, %v1664_v58 }
 0x25d   : > { %v1668_v1 = vperm.slane %v1665_v52, 1  ;;  %v1667_v40 = vperm.slane %v1665_v52, 0  ;;  %v1669_v51 = vperm.slane %v1665_v52, 2 }
 0x25e   : > { %1651 = vrot.lane.b32.xlu1 %v1648_v5, %s2479_s12 }
 0x25f   : > { %1653 = vrot.lane.b32.xlu2 %v1649_v46, %s2479_s12  ;;  %1655 = vrot.lane.b32.xlu0 %v1650_v26, %s2479_s12 }
 0x260   : > { %v1247_v38 = vpop.permute.xlu1 %1246 }
 0x261   : > { %v3748_v28 = vpop.permute.xlu2 %1333  ;;  %v1251_v56 = vpop.permute.xlu0 %1250  ;;  %v1252_v17 = vsel %vm966_vm13, %v1247_v38, %v1249_v44 }
 0x262   : > { %v1253_v3 = vsel %vm966_vm13, %v1249_v44, %v1251_v56  ;;  %v1256_v24 = vadd.f32 %v1252_v17, %v3698_v36  ;;  %v1684_v44 = vmul.f32 %v2342_v18, %v1683_v2  ;;  %v1314_v2 = vstv %s3768_s26  ;;  %s3899_s26 = sld [smem:[#allocation4 + $0x46]] }
 0x263   : > { %v1257_v43 = vadd.f32 %v1253_v3, %v3700_v11  ;;  %v3774_v11 = vld [vmem:[#allocation2 + $0x2] ss:$4 sm:$0x7] }
 0x264   : > { %v3777_v9 = vmul.f32 %v3774_v11, %v1702_v22  ;;  %v1687_v16 = vperm.slane %v1684_v44, 1  ;;  %v1686_v25 = vperm.slane %v1684_v44, 0  ;;  %v1688_v23 = vperm.slane %v1684_v44, 2 }
 0x265   : > { %v3824_v22 = vmul.f32 %v3774_v11, %v1721_v39 }
 0x266   : > { %1670 = vrot.lane.b32.xlu1 %v1667_v40, %s2479_s12 }
 0x267   : > { %1672 = vrot.lane.b32.xlu2 %v1668_v1, %s2479_s12  ;;  %1674 = vrot.lane.b32.xlu0 %v1669_v51, %s2479_s12  ;;  %v1320_v1 = vstv %s3772_s9  ;;  %v1706_v51 = vperm.slane %v3777_v9, 1  ;;  %s3904_s9 = sld [smem:[#allocation4 + $0xf]] }
 0x268   : > { %v1259_v18 = vpop.permute.xlu1 %1258 }
 0x269   : > { %v3770_v36 = vpop.permute.xlu2 %1369  ;;  %v1263_v14 = vpop.permute.xlu0 %1262  ;;  %v1265_v62 = vsel %vm1264_vm14, %v1259_v18, %v3716_v32 }
 0x26a   : > { %v1266_v8 = vsel %vm1264_vm14, %v3716_v32, %v1263_v14  ;;  %v1269_v61 = vsel %vm3149_vm11, %v1265_v62, 0.0 }
 0x26b   : > { %v1270_v59 = vsel %vm3127_vm9, %v1266_v8, 0.0  ;;  %v1273_v12 = vmul.f32 %v1272_v57, %v1269_v61  ;;  %v1279_v29 = vmul.f32 %v1278_v37, %v1269_v61  ;;  %v1285_v6 = vmul.f32 %v1284_v21, %v1269_v61 }
 0x26c   : > { %v1291_v55 = vmul.f32 %v1290_v13, %v1269_v61  ;;  %v1274_v50 = vmul.f32 %v1272_v57, %v1270_v59  ;;  %v1280_v46 = vmul.f32 %v1278_v37, %v1270_v59  ;;  %v1286_v5 = vmul.f32 %v1284_v21, %v1270_v59 }
 0x26d   : > { %v1292_v26 = vmul.f32 %v1290_v13, %v1270_v59  ;;  %v1275_v32 = vadd.f32 %v1273_v12, %v3708_v19  ;;  %v1281_v58 = vadd.f32 %v1279_v29, %v3721_v31  ;;  %v1287_v52 = vadd.f32 %v1285_v6, %v3734_v41 }
 0x26e   : > { %v1293_v38 = vadd.f32 %v1291_v55, %v1256_v24  ;;  %v1276_v56 = vadd.f32 %v1274_v50, %v3711_v42  ;;  %v1282_v17 = vadd.f32 %v1280_v46, %v3724_v7  ;;  %v1288_v3 = vadd.f32 %v1286_v5, %v3737_v54  ;;  %1689 = vrot.lane.b32.xlu1 %v1686_v25, %s2479_s12 }
 0x26f   : > { %1691 = vrot.lane.b32.xlu2 %v1687_v16, %s2479_s12  ;;  %v1294_v19 = vadd.f32 %v1292_v26, %v1257_v43  ;;  %1693 = vrot.lane.b32.xlu0 %v1688_v23, %s2479_s12  ;;  %v1740_v41 = vstv %s3761_s13  ;;  %v1308_v24 = vstv %s3764_s15  ;;  %v1705_v37 = vperm.slane %v3777_v9, 0  ;;  %s3882_s13 = sld [smem:[#allocation4 + $0x72]] }
 0x270   : > { %v1326_v42 = vstv %s3783_s29  ;;  %v1296_v40 = vpop.permute.xlu1 %1295  ;;  %v1707_v21 = vperm.slane %v3777_v9, 2  ;;  %v1344_v50 = vstv %s3798_s11  ;;  %v1350_v46 = vstv %s3804_s16  ;;  %s3890_s15 = sld [smem:[#allocation4 + $0x22]] }
 0x271   : > { %v3807_v31 = vpop.permute.xlu2 %1405  ;;  %v1300_v7 = vpop.permute.xlu0 %1299  ;;  %v1301_v54 = vsel %vm1264_vm14, %v1296_v40, %v3729_v20  ;;  %v1356_v5 = vstv %s3809_s17  ;;  %v1362_v26 = vstv %s3816_s18  ;;  %s3910_s29 = sld [smem:[#allocation4 + $0x33]] }
 0x272   : > { %v1302_v43 = vsel %vm1264_vm14, %v3729_v20, %v1300_v7  ;;  %v1305_v44 = vsel %vm3149_vm11, %v1301_v54, 0.0  ;;  %s3916_s11 = sld [smem:[#allocation4 + $0x57]] }
 0x273   : > { %v1306_v57 = vsel %vm3127_vm9, %v1302_v43, 0.0  ;;  %v1309_v13 = vmul.f32 %v1308_v24, %v1305_v44  ;;  %v1315_v18 = vmul.f32 %v1314_v2, %v1305_v44  ;;  %v1321_v14 = vmul.f32 %v1320_v1, %v1305_v44  ;;  %s3923_s16 = sld [smem:[#allocation4 + $0x6a]] }
 0x274   : > { %v1327_v62 = vmul.f32 %v1326_v42, %v1305_v44  ;;  %v1310_v20 = vmul.f32 %v1308_v24, %v1306_v57  ;;  %v1316_v8 = vmul.f32 %v1314_v2, %v1306_v57  ;;  %v1322_v16 = vmul.f32 %v1320_v1, %v1306_v57  ;;  %s3931_s17 = sld [smem:[#allocation4 + $0x18]] }
 0x275   : > { %v1328_v61 = vmul.f32 %v1326_v42, %v1306_v57  ;;  %v1311_v39 = vadd.f32 %v1309_v13, %v1275_v32  ;;  %v1317_v59 = vadd.f32 %v1315_v18, %v1281_v58  ;;  %v1323_v25 = vadd.f32 %v1321_v14, %v1287_v52  ;;  %s3939_s18 = sld [smem:[#allocation4 + $0x3c]] }
 0x276   : > { %v1329_v23 = vadd.f32 %v1327_v62, %v1293_v38  ;;  %v1312_v9 = vadd.f32 %v1310_v20, %v1276_v56  ;;  %v1318_v12 = vadd.f32 %v1316_v8, %v1282_v17  ;;  %v1324_v29 = vadd.f32 %v1322_v16, %v1288_v3  ;;  %1708 = vrot.lane.b32.xlu1 %v1705_v37, %s2479_s12 }
 0x277   : > { %1710 = vrot.lane.b32.xlu2 %v1706_v51, %s2479_s12  ;;  %v1330_v6 = vadd.f32 %v1328_v61, %v1294_v19  ;;  %1712 = vrot.lane.b32.xlu0 %v1707_v21, %s2479_s12  ;;  %v1725_v56 = vperm.slane %v3824_v22, 1  ;;  %v3857_v17 = vmul.f32 %v3774_v11, %v1740_v41  ;;  %v1724_v24 = vperm.slane %v3824_v22, 0 }
 0x278   : > { %v1332_v32 = vpop.permute.xlu1 %1331  ;;  %v1726_v2 = vperm.slane %v3824_v22, 2  ;;  %v1759_v20 = vstv %s3832_s14  ;;  %v1380_v8 = vstv %s3835_s19  ;;  %v1386_v16 = vstv %s3838_s23  ;;  %s3943_s14 = sld [smem:[#allocation4 + $0x60]] }
 0x279   : > { %v3841_v55 = vpop.permute.xlu2 %1442  ;;  %v1336_v58 = vpop.permute.xlu0 %1335  ;;  %v1337_v52 = vsel %vm1264_vm14, %v1332_v32, %v3748_v28  ;;  %v1744_v62 = vperm.slane %v3857_v17, 1  ;;  %v1392_v61 = vstv %s3843_s8  ;;  %s3947_s19 = sld [smem:[#allocation4 + $0x7b]] }
 0x27a   : > { %v1338_v38 = vsel %vm1264_vm14, %v3748_v28, %v1336_v58  ;;  %v1341_v3 = vsel %vm3149_vm11, %v1337_v52, 0.0  ;;  %s3958_s23 = sld [smem:[#allocation4 + $0x84]] }
 0x27b   : > { %v1342_v19 = vsel %vm3127_vm9, %v1338_v38, 0.0  ;;  %v1345_v1 = vmul.f32 %v1344_v50, %v1341_v3  ;;  %v1351_v42 = vmul.f32 %v1350_v46, %v1341_v3  ;;  %v1357_v40 = vmul.f32 %v1356_v5, %v1341_v3  ;;  %s3962_s8 = sld [smem:[#allocation4 + $0x8e]] }
 0x27c   : > { %v1363_v7 = vmul.f32 %v1362_v26, %v1341_v3  ;;  %v1346_v28 = vmul.f32 %v1344_v50, %v1342_v19  ;;  %v1352_v54 = vmul.f32 %v1350_v46, %v1342_v19  ;;  %v1358_v43 = vmul.f32 %v1356_v5, %v1342_v19 }
 0x27d   : > { %v1364_v51 = vmul.f32 %v1362_v26, %v1342_v19  ;;  %v1347_v41 = vadd.f32 %v1345_v1, %v1311_v39  ;;  %v1353_v44 = vadd.f32 %v1351_v42, %v1317_v59  ;;  %v1359_v57 = vadd.f32 %v1357_v40, %v1323_v25 }
 0x27e   : > { %v1365_v37 = vadd.f32 %v1363_v7, %v1329_v23  ;;  %v1348_v22 = vadd.f32 %v1346_v28, %v1312_v9  ;;  %v1354_v21 = vadd.f32 %v1352_v54, %v1318_v12  ;;  %v1360_v13 = vadd.f32 %v1358_v43, %v1324_v29  ;;  %1727 = vrot.lane.b32.xlu1 %v1724_v24, %s2479_s12 }
 0x27f   : > { %1729 = vrot.lane.b32.xlu2 %v1725_v56, %s2479_s12  ;;  %v1366_v18 = vadd.f32 %v1364_v51, %v1330_v6  ;;  %1731 = vrot.lane.b32.xlu0 %v1726_v2, %s2479_s12  ;;  %v1398_v39 = vstv %s3849_s6  ;;  %v1743_v12 = vperm.slane %v3857_v17, 0  ;;  %v1745_v29 = vperm.slane %v3857_v17, 2  ;;  %s3965_s6 = sld [smem:[#allocation4 + $0x21]] }
 0x280   : > { %v1368_v59 = vpop.permute.xlu1 %1367  ;;  %v1760_v46 = vmul.f32 %v3774_v11, %v1759_v20  ;;  %v1417_v7 = vstv %s3866_s25  ;;  %v1423_v28 = vstv %s3869_s7  ;;  %v1429_v54 = vstv %s3875_s10  ;;  %s3973_s25 = sld [smem:[#allocation4 + $0x45]] }
 0x281   : > { %v3872_v14 = vpop.permute.xlu2 %1478  ;;  %v1372_v25 = vpop.permute.xlu0 %1371  ;;  %v1373_v23 = vsel %vm1264_vm14, %v1368_v59, %v3770_v36  ;;  %v1435_v43 = vstv %s3882_s13  ;;  %s3978_s7 = sld [smem:[#allocation4 + $0x69]]  ;;  %s2480_s13 = smov 94  }
 0x282   : > { %v1374_v9 = vsel %vm1264_vm14, %v3770_v36, %v1372_v25  ;;  %v1377_v6 = vsel %vm3149_vm11, %v1373_v23, 0.0  ;;  %s3985_s10 = sld [smem:[#allocation4 + $0x8d]] }
 0x283   : > { %v1378_v50 = vsel %vm3127_vm9, %v1374_v9, 0.0  ;;  %v1381_v5 = vmul.f32 %v1380_v8, %v1377_v6  ;;  %v1387_v26 = vmul.f32 %v1386_v16, %v1377_v6  ;;  %v1393_v32 = vmul.f32 %v1392_v61, %v1377_v6 }
 0x284   : > { %v1399_v58 = vmul.f32 %v1398_v39, %v1377_v6  ;;  %v1382_v36 = vmul.f32 %v1380_v8, %v1378_v50  ;;  %v1388_v52 = vmul.f32 %v1386_v16, %v1378_v50  ;;  %v1394_v38 = vmul.f32 %v1392_v61, %v1378_v50 }
 0x285   : > { %v1400_v56 = vmul.f32 %v1398_v39, %v1378_v50  ;;  %v1383_v17 = vadd.f32 %v1381_v5, %v1347_v41  ;;  %v1389_v3 = vadd.f32 %v1387_v26, %v1353_v44  ;;  %v1395_v19 = vadd.f32 %v1393_v32, %v1359_v57  ;;  %v3936_v32 = vld [vmem:[#allocation2 + $0x3] ss:$4 sm:$0x7] }
 0x286   : > { %v1401_v24 = vadd.f32 %v1399_v58, %v1365_v37  ;;  %v1384_v2 = vadd.f32 %v1382_v36, %v1348_v22  ;;  %v1390_v11 = vadd.f32 %v1388_v52, %v1354_v21  ;;  %v1396_v1 = vadd.f32 %v1394_v38, %v1360_v13  ;;  %1746 = vrot.lane.b32.xlu1 %v1743_v12, %s2479_s12 }
 0x287   : > { %1748 = vrot.lane.b32.xlu2 %v1744_v62, %s2479_s12  ;;  %v1402_v42 = vadd.f32 %v1400_v56, %v1366_v18  ;;  %1750 = vrot.lane.b32.xlu0 %v1745_v29, %s2479_s12  ;;  %v1763_v37 = vperm.slane %v1760_v46, 1  ;;  %v1778_v22 = vstv %s3890_s15  ;;  %v1762_v18 = vperm.slane %v1760_v46, 0  ;;  %s4088_s15 = sld [smem:[#allocation4 + $0x2c]] }
 0x288   : > { %v1404_v51 = vpop.permute.xlu1 %1403  ;;  %v1764_v62 = vperm.slane %v1760_v46, 2  ;;  %v1779_v58 = vmul.f32 %v3936_v32, %v1778_v22  ;;  %v1453_v36 = vstv %s3904_s9  ;;  %v1459_v52 = vstv %s3910_s29  ;;  %s4094_s9 = sld [smem:[#allocation4 + $0x74]] }
 0x289   : > { %v3902_v40 = vpop.permute.xlu2 %1514  ;;  %v1408_v41 = vpop.permute.xlu0 %1407  ;;  %v1410_v44 = vsel %vm1409_vm15, %v1404_v51, %v3807_v31  ;;  %s4096_s29 = sld [smem:[#allocation4 + $0x11]] }
 0x28a   : > { %v1411_v57 = vsel %vm1409_vm15, %v3807_v31, %v1408_v41  ;;  %v1414_v21 = vsel %vm2851_vm6, %v1410_v44, 0.0  ;;  %v1781_v44 = vperm.slane %v1779_v58, 0 }
 0x28b   : > { %v1415_v13 = vsel %vm2891_vm7, %v1411_v57, 0.0  ;;  %v1418_v20 = vmul.f32 %v1417_v7, %v1414_v21  ;;  %v1424_v8 = vmul.f32 %v1423_v28, %v1414_v21  ;;  %v1430_v16 = vmul.f32 %v1429_v54, %v1414_v21 }
 0x28c   : > { %v1436_v61 = vmul.f32 %v1435_v43, %v1414_v21  ;;  %v1419_v39 = vmul.f32 %v1417_v7, %v1415_v13  ;;  %v1425_v31 = vmul.f32 %v1423_v28, %v1415_v13  ;;  %v1431_v59 = vmul.f32 %v1429_v54, %v1415_v13 }
 0x28d   : > { %v1437_v25 = vmul.f32 %v1435_v43, %v1415_v13  ;;  %v1420_v23 = vadd.f32 %v1418_v20, %v1383_v17  ;;  %v1426_v9 = vadd.f32 %v1424_v8, %v1389_v3  ;;  %v1432_v12 = vadd.f32 %v1430_v16, %v1395_v19 }
 0x28e   : > { %v3925_v29 = vadd.f32 %v1436_v61, %v1401_v24  ;;  %v1421_v6 = vadd.f32 %v1419_v39, %v1384_v2  ;;  %v1427_v50 = vadd.f32 %v1425_v31, %v1390_v11  ;;  %v1433_v46 = vadd.f32 %v1431_v59, %v1396_v1  ;;  %1765 = vrot.lane.b32.xlu1 %v1762_v18, %s2479_s12 }
 0x28f   : > { %1767 = vrot.lane.b32.xlu2 %v1763_v37, %s2479_s12  ;;  %v3928_v5 = vadd.f32 %v1437_v25, %v1402_v42  ;;  %1769 = vrot.lane.b32.xlu0 %v1764_v62, %s2479_s12  ;;  %v1797_v17 = vstv %s3899_s26  ;;  %v1465_v3 = vstv %s3916_s11  ;;  %v1782_v28 = vperm.slane %v1779_v58, 1  ;;  %s4092_s26 = sld [smem:[#allocation4 + $0x50]] }
 0x290   : > { %v1441_v38 = vpop.permute.xlu1 %1440  ;;  %v1816_v1 = vstv %s3923_s16  ;;  %v1798_v54 = vmul.f32 %v3936_v32, %v1797_v17  ;;  %v1489_v8 = vstv %s3931_s17  ;;  %v1495_v16 = vstv %s3939_s18  ;;  %s4098_s11 = sld [smem:[#allocation4 + $0x35]] }
 0x291   : > { %v3934_v26 = vpop.permute.xlu2 %1557  ;;  %v1445_v56 = vpop.permute.xlu0 %1444  ;;  %v1446_v19 = vsel %vm1409_vm15, %v1441_v38, %v3841_v55  ;;  %v3971_v20 = vmul.f32 %v3936_v32, %v1816_v1  ;;  %v1501_v61 = vstv %s3943_s14  ;;  %v1471_v25 = vstv %s3947_s19  ;;  %s4100_s16 = sld [smem:[#allocation4 + $0x59]] }
 0x292   : > { %v1447_v24 = vsel %vm1409_vm15, %v3841_v55, %v1445_v56  ;;  %v1450_v2 = vsel %vm2851_vm6, %v1446_v19, 0.0  ;;  %v1783_v55 = vperm.slane %v1779_v58, 2  ;;  %v1801_v62 = vperm.slane %v1798_v54, 1  ;;  %s4102_s17 = sld [smem:[#allocation4 + $0x7d]] }
 0x293   : > { %v1451_v11 = vsel %vm2891_vm7, %v1447_v24, 0.0  ;;  %v1454_v42 = vmul.f32 %v1453_v36, %v1450_v2  ;;  %v1460_v7 = vmul.f32 %v1459_v52, %v1450_v2  ;;  %v1466_v43 = vmul.f32 %v1465_v3, %v1450_v2  ;;  %s4104_s18 = sld [smem:[#allocation4 + $0x1a]] }
 0x294   : > { %v1455_v51 = vmul.f32 %v1453_v36, %v1451_v11  ;;  %v1461_v41 = vmul.f32 %v1459_v52, %v1451_v11  ;;  %v1467_v22 = vmul.f32 %v1465_v3, %v1451_v11  ;;  %v1802_v36 = vperm.slane %v1798_v54, 2  ;;  %s4106_s14 = sld [smem:[#allocation4 + $0x3e]] }
 0x295   : > { %v1456_v57 = vadd.f32 %v1454_v42, %v1420_v23  ;;  %v1462_v37 = vadd.f32 %v1460_v7, %v1426_v9  ;;  %v1468_v59 = vadd.f32 %v1466_v43, %v1432_v12  ;;  %v1507_v38 = vstv %s3958_s23  ;;  %s4110_s19 = sld [smem:[#allocation4 + $0x62]] }
 0x296   : > { %1784 = vrot.lane.b32.xlu1 %v1781_v44, %s2479_s12  ;;  %v1457_v21 = vadd.f32 %v1455_v51, %v1421_v6  ;;  %v1463_v13 = vadd.f32 %v1461_v41, %v1427_v50  ;;  %v1800_v6 = vperm.slane %v1798_v54, 0  ;;  %v1469_v52 = vadd.f32 %v1467_v22, %v1433_v46  ;;  %s4115_s23 = sld [smem:[#allocation4 + $0x86]] }
 0x297   : > { %1786 = vrot.lane.b32.xlu2 %v1782_v28, %s2479_s12  ;;  %1788 = vrot.lane.b32.xlu0 %v1783_v55, %s2479_s12  ;;  %v1472_v3 = vmul.f32 %v1471_v25, %v1450_v2  ;;  %v1473_v1 = vmul.f32 %v1471_v25, %v1451_v11  ;;  %v1820_v11 = vperm.slane %v3971_v20, 1  ;;  %v1525_v41 = vstv %s3965_s6  ;;  %s4125_s6 = sld [smem:[#allocation4 + $0x47]] }
 0x298   : > { %v1477_v39 = vpop.permute.xlu1 %1476  ;;  %v1835_v44 = vstv %s3962_s8  ;;  %v1537_v22 = vstv %s3978_s7  ;;  %s4120_s8 = sld [smem:[#allocation4 + $0x23]] }
 0x299   : > { %v3968_v18 = vpop.permute.xlu2 %1577  ;;  %v1481_v31 = vpop.permute.xlu0 %1480  ;;  %v1482_v23 = vsel %vm1409_vm15, %v1477_v39, %v3872_v14  ;;  %s4136_s7 = sld [smem:[#allocation4 + $0x8f]] }
 0x29a   : > { %v1483_v9 = vsel %vm1409_vm15, %v3872_v14, %v1481_v31  ;;  %v1486_v50 = vsel %vm2851_vm6, %v1482_v23, 0.0 }
 0x29b   : > { %v1487_v58 = vsel %vm2891_vm7, %v1483_v9, 0.0  ;;  %v1490_v12 = vmul.f32 %v1489_v8, %v1486_v50  ;;  %v1496_v56 = vmul.f32 %v1495_v16, %v1486_v50  ;;  %v1502_v17 = vmul.f32 %v1501_v61, %v1486_v50 }
 0x29c   : > { %v1491_v19 = vmul.f32 %v1489_v8, %v1487_v58  ;;  %v1497_v24 = vmul.f32 %v1495_v16, %v1487_v58  ;;  %v1503_v14 = vmul.f32 %v1501_v61, %v1487_v58  ;;  %v1508_v54 = vmul.f32 %v1507_v38, %v1486_v50 }
 0x29d   : > { %v1492_v42 = vadd.f32 %v1490_v12, %v1456_v57  ;;  %v1498_v7 = vadd.f32 %v1496_v56, %v1462_v37  ;;  %v1504_v28 = vadd.f32 %v1502_v17, %v1468_v59  ;;  %v1531_v37 = vstv %s3973_s25  ;;  %s4130_s25 = sld [smem:[#allocation4 + $0x6b]] }
 0x29e   : > { %1803 = vrot.lane.b32.xlu1 %v1800_v6, %s2479_s12  ;;  %v1493_v46 = vadd.f32 %v1491_v19, %v1457_v21  ;;  %v1499_v43 = vadd.f32 %v1497_v24, %v1463_v13  ;;  %v1505_v2 = vadd.f32 %v1503_v14, %v1469_v52  ;;  %v1509_v8 = vmul.f32 %v1507_v38, %v1487_v58 }
 0x29f   : > { %1805 = vrot.lane.b32.xlu2 %v1801_v62, %s2479_s12  ;;  %1807 = vrot.lane.b32.xlu0 %v1802_v36, %s2479_s12  ;;  %v1474_v62 = vadd.f32 %v1472_v3, %v3925_v29  ;;  %v1543_v16 = vstv %s3985_s10  ;;  %v1475_v59 = vadd.f32 %v1473_v1, %v3928_v5  ;;  %v1836_v3 = vmul.f32 %v3936_v32, %v1835_v44  ;;  %s2281_s10 = sshll.u32 %s2528_s22, 3 }
 0x2a0   : > { %v1513_v55 = vpop.permute.xlu1 %1512 }
 0x2a1   : > { %v3995_v51 = vpop.permute.xlu2 %1596  ;;  %v1517_v57 = vpop.permute.xlu0 %1516  ;;  %v1518_v21 = vsel %vm1409_vm15, %v1513_v55, %v3902_v40  ;;  %v1510_v31 = vadd.f32 %v1508_v54, %v1474_v62  ;;  %v1511_v56 = vadd.f32 %v1509_v8, %v1475_v59  ;;  %v1840_v54 = vperm.slane %v1836_v3, 2 }
 0x2a2   : > { %v1519_v13 = vsel %vm1409_vm15, %v3902_v40, %v1517_v57  ;;  %v1522_v61 = vsel %vm2851_vm6, %v1518_v21, 0.0  ;;  %v1838_v8 = vperm.slane %v1836_v3, 0 }
 0x2a3   : > { %v1523_v39 = vsel %vm2891_vm7, %v1519_v13, 0.0  ;;  %v1526_v25 = vmul.f32 %v1525_v41, %v1522_v61  ;;  %v1532_v29 = vmul.f32 %v1531_v37, %v1522_v61  ;;  %v1538_v6 = vmul.f32 %v1537_v22, %v1522_v61 }
 0x2a4   : > { %v1527_v23 = vmul.f32 %v1525_v41, %v1523_v39  ;;  %v1533_v9 = vmul.f32 %v1531_v37, %v1523_v39  ;;  %v1539_v50 = vmul.f32 %v1537_v22, %v1523_v39  ;;  %v1544_v58 = vmul.f32 %v1543_v16, %v1522_v61 }
 0x2a5   : > { %v1545_v36 = vmul.f32 %v1543_v16, %v1523_v39  ;;  %v1528_v34 = vadd.f32 %v1526_v25, %v1492_v42  ;;  %v1534_v52 = vadd.f32 %v1532_v29, %v1498_v7  ;;  %v1540_v5 = vadd.f32 %v1538_v6, %v1504_v28 }
 0x2a6   : > { %v1529_v40 = vadd.f32 %v1527_v23, %v1493_v46  ;;  %v1535_v15 = vadd.f32 %v1533_v9, %v1499_v43  ;;  %1855 = vrot.lane.b32.xlu1 %v4389_v49, %s2480_s13  ;;  %v1541_v38 = vadd.f32 %v1539_v50, %v1505_v2  ;;  %v1546_v12 = vadd.f32 %v1544_v58, %v1510_v31 }
 0x2a7   : > { %1857 = vrot.lane.b32.xlu2 %v4391_v48, %s2480_s13  ;;  %1824 = vrot.lane.b32.xlu0 %v1820_v11, %s2479_s12  ;;  %v1547_v14 = vadd.f32 %v1545_v36, %v1511_v56  ;;  %v1839_v7 = vperm.slane %v1836_v3, 1  ;;  %v1821_v28 = vperm.slane %v3971_v20, 2 }
 0x2a8   : > { %v1556_v19 = vpop.permute.xlu1 %1555 }
 0x2a9   : > { %v1616_v17 = vpop.permute.xlu2 %1615  ;;  %v1560_v24 = vpop.permute.xlu0 %1559  ;;  %v1562_v48 = vsel %vm1561_vm0, %v1556_v19, %v3934_v26 }
 0x2aa   : > { %v1563_v1 = vsel %vm1561_vm0, %v3934_v26, %v1560_v24  ;;  %v1566_v42 = vadd.f32 %v1562_v48, %v1528_v34 }
 0x2ab   : > { %v1567_v49 = vadd.f32 %v1563_v1, %v1529_v40 }
 0x2ae   : > { %1826 = vrot.lane.b32.xlu1 %v1821_v28, %s2479_s12 }
 0x2af   : > { %1843 = vrot.lane.b32.xlu2 %v1839_v7, %s2479_s12  ;;  %1845 = vrot.lane.b32.xlu0 %v1840_v54, %s2479_s12 }
 0x2b0   : > { %v1576_v46 = vpop.permute.xlu1 %1575 }
 0x2b1   : > { %v1635_v32 = vpop.permute.xlu2 %1634  ;;  %v1580_v43 = vpop.permute.xlu0 %1579  ;;  %v1581_v2 = vsel %vm1561_vm0, %v1576_v46, %v3968_v18 }
 0x2b2   : > { %v1582_v26 = vsel %vm1561_vm0, %v3968_v18, %v1580_v43  ;;  %v1585_v11 = vadd.f32 %v1581_v2, %v1534_v52 }
 0x2b3   : > { %v1586_v41 = vadd.f32 %v1582_v26, %v1535_v15 }
 0x2b6   : > { %1853 = vrot.lane.b32.xlu1 %v4390_v4, %s2480_s13 }
 0x2b7   : > { %1892 = vrot.lane.b32.xlu2 %v4392_v0, %s2480_s13  ;;  %1894 = vrot.lane.b32.xlu0 %v4394_v53, %s2480_s13  ;;  %v1819_v0 = vperm.slane %v3971_v20, 0 }
 0x2b8   : > { %v1595_v55 = vpop.permute.xlu1 %1594 }
 0x2b9   : > { %v1654_v44 = vpop.permute.xlu2 %1653  ;;  %v1599_v57 = vpop.permute.xlu0 %1598  ;;  %v1600_v37 = vsel %vm1561_vm0, %v1595_v55, %v3995_v51 }
 0x2ba   : > { %v1601_v18 = vsel %vm1561_vm0, %v3995_v51, %v1599_v57  ;;  %v1604_v22 = vadd.f32 %v1600_v37, %v1540_v5 }
 0x2bb   : > { %v1605_v62 = vadd.f32 %v1601_v18, %v1541_v38 }
 0x2be   : > { %1822 = vrot.lane.b32.xlu1 %v1819_v0, %s2479_s12 }
 0x2bf   : > { %1841 = vrot.lane.b32.xlu2 %v1838_v8, %s2479_s12  ;;  %1890 = vrot.lane.b32.xlu0 %v4393_v47, %s2480_s13  ;;  %s4086_s12 = sld [smem:[#allocation4 + $0x8]] }
 0x2c0   : > { %v1614_v53 = vpop.permute.xlu1 %1613 }
 0x2c1   : > { %v1673_v4 = vpop.permute.xlu2 %1672  ;;  %v1618_v21 = vpop.permute.xlu0 %1617  ;;  %v1619_v13 = vsel %vm1561_vm0, %v1614_v53, %v1616_v17 }
 0x2c2   : > { %v1620_v16 = vsel %vm1561_vm0, %v1616_v17, %v1618_v21  ;;  %v1623_v51 = vadd.f32 %v1619_v13, %v1546_v12 }
 0x2c3   : > { %v1624_v61 = vadd.f32 %v1620_v16, %v1547_v14 }
 0x2c6   : > { %1928 = vrot.lane.b32.xlu1 %v4395_v30, %s2480_s13 }
 0x2c7   : > { %1930 = vrot.lane.b32.xlu2 %v4397_v45, %s2480_s13  ;;  %1926 = vrot.lane.b32.xlu0 %v4396_v35, %s2480_s13 }
 0x2c8   : > { %v1633_v47 = vpop.permute.xlu1 %1632 }
 0x2c9   : > { %v1692_v20 = vpop.permute.xlu2 %1691  ;;  %v1637_v39 = vpop.permute.xlu0 %1636  ;;  %v1638_v31 = vsel %vm1561_vm0, %v1633_v47, %v1635_v32 }
 0x2ca   : > { %v1639_v59 = vsel %vm1561_vm0, %v1635_v32, %v1637_v39  ;;  %v1642_v25 = vadd.f32 %v1638_v31, %v1566_v42 }
 0x2cb   : > { %v1643_v23 = vadd.f32 %v1639_v59, %v1567_v49 }
 0x2ce   : > { %1964 = vrot.lane.b32.xlu1 %v4398_v63, %s2480_s13 }
 0x2cf   : > { %1966 = vrot.lane.b32.xlu2 %v4400_v33, %s2480_s13  ;;  %1962 = vrot.lane.b32.xlu0 %v4399_v27, %s2480_s13 }
 0x2d0   : > { %v1652_v30 = vpop.permute.xlu1 %1651 }
 0x2d1   : > { %v1656_v35 = vpop.permute.xlu0 %1655  ;;  %v1657_v45 = vsel %vm1561_vm0, %v1652_v30, %v1654_v44  ;;  %v1711_v9 = vpop.permute.xlu2 %1710 }
 0x2d2   : > { %v1658_v29 = vsel %vm1561_vm0, %v1654_v44, %v1656_v35  ;;  %v1661_v6 = vadd.f32 %v1657_v45, %v1585_v11  ;;  %v1867_v35 = vstv %s4086_s12  ;;  %v1873_v45 = vstv %s4088_s15  ;;  %s2042_s12 = scalar_lea.hbm %s4249_s3, %s2281_s10  ;;  %s149_s15 = scalar_lea.vmem [#allocation9], %s2124_s5 }
 0x2d3   : > { %v1662_v50 = vadd.f32 %v1658_v29, %v1586_v41  ;;  %v1879_v29 = vstv %s4092_s26  ;;  %s2044_s26 = sshll.u32 %s149_s15, 4  ;;  %s2031_s5 = scalar_lea.sflag [#allocation8], %s2593_s28  ;;  %s2045_s26 = int_to_ptr.vmem [resolvable:$true] %s2044_s26 }
 0x2d8   : > { %v1671_v58 = vpop.permute.xlu1 %1670 }
 0x2d9   : > { %v1675_v36 = vpop.permute.xlu0 %1674  ;;  %v1676_v34 = vsel %vm1561_vm0, %v1671_v58, %v1673_v4  ;;  %v1730_v52 = vpop.permute.xlu2 %1729  ;;  %v1885_v58 = vstv %s4094_s9  ;;  %s2046_s9 = sshll.u32 %s2042_s12, 4  ;;  %s2047_s9 = int_to_ptr.hbm [resolvable:$true] %s2046_s9 }
 0x2da   : > { %v1677_v33 = vsel %vm1561_vm0, %v1673_v4, %v1675_v36  ;;  %v1680_v40 = vadd.f32 %v1676_v34, %v1604_v22 }
 0x2db   : > { %v1681_v63 = vadd.f32 %v1677_v33, %v1605_v62 }
 0x2e0   : > { %v1690_v15 = vpop.permute.xlu1 %1689 }
 0x2e1   : > { %v1695_v27 = vsel %vm1561_vm0, %v1690_v15, %v1692_v20  ;;  %v1694_v5 = vpop.permute.xlu0 %1693  ;;  %v1749_v17 = vpop.permute.xlu2 %1748  ;;  %v1915_v15 = vstv %s4100_s16 }
 0x2e2   : > { %v4067_v38 = vadd.f32 %v1695_v27, %v1623_v51  ;;  %v1696_v12 = vsel %vm1561_vm0, %v1692_v20, %v1694_v5  ;;  %v1921_v27 = vstv %s4102_s17 }
 0x2e3   : > { %v1700_v56 = vadd.f32 %v1696_v12, %v1624_v61 }
 0x2e8   : > { %v1709_v3 = vpop.permute.xlu1 %1708 }
 0x2e9   : > { %v1714_v19 = vsel %vm1561_vm0, %v1709_v3, %v1711_v9  ;;  %v1713_v24 = vpop.permute.xlu0 %1712  ;;  %v1768_v42 = vpop.permute.xlu2 %1767 }
 0x2ea   : > { %v1718_v14 = vadd.f32 %v1714_v19, %v1642_v25  ;;  %v1715_v48 = vsel %vm1561_vm0, %v1711_v9, %v1713_v24 }
 0x2eb   : > { %v1719_v1 = vadd.f32 %v1715_v48, %v1643_v23 }
 0x2f0   : > { %v1728_v49 = vpop.permute.xlu1 %1727 }
 0x2f1   : > { %v1733_v7 = vsel %vm1561_vm0, %v1728_v49, %v1730_v52  ;;  %v1732_v28 = vpop.permute.xlu0 %1731  ;;  %v1787_v11 = vpop.permute.xlu2 %1786  ;;  %v1945_v49 = vstv %s4106_s14 }
 0x2f2   : > { %v4073_v54 = vadd.f32 %v1733_v7, %v1661_v6  ;;  %v1734_v32 = vsel %vm1561_vm0, %v1730_v52, %v1732_v28  ;;  %v1909_v52 = vstv %s4098_s11  ;;  %v1951_v7 = vstv %s4110_s19 }
 0x2f3   : > { %v4076_v46 = vadd.f32 %v1734_v32, %v1662_v50 }
 0x2f8   : > { %v1747_v43 = vpop.permute.xlu1 %1746 }
 0x2f9   : > { %v1752_v2 = vsel %vm1561_vm0, %v1747_v43, %v1749_v17  ;;  %v1751_v26 = vpop.permute.xlu0 %1750  ;;  %v1806_v18 = vpop.permute.xlu2 %1805 }
 0x2fa   : > { %v4079_v41 = vadd.f32 %v1752_v2, %v1680_v40  ;;  %v1753_v44 = vsel %vm1561_vm0, %v1749_v17, %v1751_v26 }
 0x2fb   : > { %v4082_v55 = vadd.f32 %v1753_v44, %v1681_v63  ;;  %v1903_v63 = vstv %s4096_s29  ;;  %s2413_s29 = sshra.s32 %s2047_s9, 4  ;;  %s2414_s29 = int_to_ptr.hbm [resolvable:$true] %s2413_s29 }
 0x2fc   : > { %s2415_s11 = scalar_lea.hbm %s2414_s29, 8  ;;  %p2420_p0 = scmp.lt.s32.totalorder %s2414_s29, %s4249_s3 }
 0x2fd   : > { %p2416_p6 = scmp.ne.s32.totalorder %s2414_s29, %s2415_s11 }
 0x2ff   : > { %p2417_p9 = pnand %p2416_p6, %p2557_p11 }
 0x300   : > { %v1766_v57 = vpop.permute.xlu1 %1765 }
 0x301   : > { %v1770_v37 = vpop.permute.xlu0 %1769  ;;  %v1858_v8 = vpop.permute.xlu2 %1857  ;;  %v1771_v39 = vsel %vm1561_vm0, %v1766_v57, %v1768_v42  ;;  %p2418_p13 = pneg %p2417_p9 }
 0x302   : > { %v1772_v31 = vsel %vm1561_vm0, %v1768_v42, %v1770_v37  ;;  %v1775_v9 = vadd.f32 %v1771_v39, %v4067_v38  ;;  %v1939_v42 = vstv %s4104_s18  ;;  %s2419_s18 = scalar_lea.hbm %s4249_s3, 16 }
 0x303   : > { %v1776_v6 = vadd.f32 %v1772_v31, %v1700_v56  ;;  %p2421_p1 = scmp.lt.s32.totalorder %s2419_s18, %s2415_s11 }
 0x305   : > { %p2422_p3 = por %p2421_p1, %p2420_p0 }
 0x307   : > { %p2423_p4 = pnand %p2422_p3, %p2418_p13 }
 0x308   : > { %v1785_v22 = vpop.permute.xlu1 %1784 }
 0x309   : > { %v1789_v62 = vpop.permute.xlu0 %1788  ;;  %v1844_v53 = vpop.permute.xlu2 %1843  ;;  %v1790_v59 = vsel %vm1561_vm0, %v1785_v22, %v1787_v11 }
 0x30a   : > { %v1791_v25 = vsel %vm1561_vm0, %v1787_v11, %v1789_v62  ;;  %v1794_v36 = vadd.f32 %v1790_v59, %v1718_v14  ;;  %v1975_v62 = vstv %s4120_s8 }
 0x30b   : > { %v1795_v34 = vadd.f32 %v1791_v25, %v1719_v1 }
 0x310   : > { %v1804_v0 = vpop.permute.xlu1 %1803 }
 0x311   : > { %v1808_v4 = vpop.permute.xlu0 %1807  ;;  %v4090_v61 = vpop.permute.xlu2 %1892  ;;  %v1809_v50 = vsel %vm1561_vm0, %v1804_v0, %v1806_v18  ;;  %v1987_v0 = vstv %s4130_s25 }
 0x312   : > { %v1810_v33 = vsel %vm1561_vm0, %v1806_v18, %v1808_v4  ;;  %v1813_v5 = vadd.f32 %v1809_v50, %v4073_v54 }
 0x313   : > { %v1814_v3 = vadd.f32 %v1810_v33, %v4076_v46  ;;  %v1957_v46 = vstv %s4115_s23 }
 0x318   : > { %v1856_v21 = vpop.permute.xlu1 %1855 }
 0x319   : > { %v4084_v13 = vpop.permute.xlu0 %1824  ;;  %v1861_v23 = vsel %vm1859_vm1, %v1856_v21, %v1858_v8  ;;  %v1842_v30 = vpop.permute.xlu2 %1841  ;;  %v1981_v8 = vstv %s4125_s6 }
 0x31a   : > { %v1865_v40 = vsel %vm3127_vm9, %v1861_v23, 0.0  ;;  %v1847_v19 = vsel %vm1561_vm0, %v1842_v30, %v1844_v53 }
 0x31b   : > { %v1869_v24 = vmul.f32 %v1867_v35, %v1865_v40  ;;  %v1875_v14 = vmul.f32 %v1873_v45, %v1865_v40  ;;  %v1851_v43 = vadd.f32 %v1847_v19, %v1775_v9  ;;  %v1881_v2 = vmul.f32 %v1879_v29, %v1865_v40 }
 0x31c   : > { %v1887_v26 = vmul.f32 %v1885_v58, %v1865_v40 }
 0x31d   : > { %v1871_v44 = vadd.f32 %v1869_v24, %v1795_v34  ;;  %v1877_v57 = vadd.f32 %v1875_v14, %v1814_v3 }
 0x320   : > { %v1827_v16 = vpop.permute.xlu1 %1826 }
 0x321   : > { %v1846_v51 = vpop.permute.xlu0 %1845  ;;  %v1829_v38 = vsel %vm1561_vm0, %v4084_v13, %v1827_v16  ;;  %v1931_v18 = vpop.permute.xlu2 %1930  ;;  %v1993_v16 = vstv %s4136_s7 }
 0x322   : > { %v1848_v12 = vsel %vm1561_vm0, %v1844_v53, %v1846_v51  ;;  %v1833_v28 = vadd.f32 %v1829_v38, %v4082_v55 }
 0x323   : > { %v1852_v54 = vadd.f32 %v1848_v12, %v1776_v6 }
 0x324   : > { %v1883_v4 = vadd.f32 %v1881_v2, %v1833_v28 }
 0x325   : > { %v1889_v53 = vadd.f32 %v1887_v26, %v1852_v54 }
 0x328   : > { %v1854_v20 = vpop.permute.xlu1 %1853 }
 0x329   : > { %v1895_v47 = vpop.permute.xlu0 %1894  ;;  %v1860_v56 = vsel %vm1859_vm1, %v1854_v20, %v1856_v21 }
 0x32a   : > { %v1897_v1 = vsel %vm1859_vm1, %v4090_v61, %v1895_v47  ;;  %v1864_v32 = vsel %vm3149_vm11, %v1860_v56, 0.0 }
 0x32b   : > { %v1901_v37 = vsel %vm3127_vm9, %v1897_v1, 0.0  ;;  %v1868_v22 = vmul.f32 %v1867_v35, %v1864_v32  ;;  %v1874_v51 = vmul.f32 %v1873_v45, %v1864_v32 }
 0x32c   : > { %v1905_v20 = vmul.f32 %v1903_v63, %v1901_v37  ;;  %v1911_v31 = vmul.f32 %v1909_v52, %v1901_v37  ;;  %v1917_v59 = vmul.f32 %v1915_v15, %v1901_v37  ;;  %v1923_v35 = vmul.f32 %v1921_v27, %v1901_v37 }
 0x32d   : > { %v1870_v30 = vadd.f32 %v1868_v22, %v1794_v36  ;;  %v1876_v34 = vadd.f32 %v1874_v51, %v1813_v5 }
 0x32e   : > { %v1907_v38 = vadd.f32 %v1905_v20, %v1871_v44  ;;  %v1919_v3 = vadd.f32 %v1917_v59, %v1883_v4  ;;  %v1925_v14 = vadd.f32 %v1923_v35, %v1889_v53 }
 0x330   : > { %v1823_v17 = vpop.permute.xlu1 %1822 }
 0x331   : > { %v1891_v48 = vpop.permute.xlu0 %1890  ;;  %v1828_v11 = vsel %vm1561_vm0, %v1823_v17, %v4084_v13  ;;  %v1886_v13 = vmul.f32 %v1885_v58, %v1864_v32  ;;  %v1913_v17 = vadd.f32 %v1911_v31, %v1877_v57 }
 0x332   : > { %v1896_v55 = vsel %vm1859_vm1, %v1891_v48, %v4090_v61  ;;  %v1832_v21 = vadd.f32 %v1828_v11, %v4079_v41  ;;  %v1880_v61 = vmul.f32 %v1879_v29, %v1864_v32  ;;  %v4401_v32 = vlaneseq }
 0x333   : > { %v1900_v47 = vsel %vm3149_vm11, %v1896_v55, 0.0  ;;  %v1888_v33 = vadd.f32 %v1886_v13, %v1851_v43 }
 0x334   : > { %v1882_v45 = vadd.f32 %v1880_v61, %v1832_v21  ;;  %v1904_v6 = vmul.f32 %v1903_v63, %v1900_v47  ;;  %v1910_v50 = vmul.f32 %v1909_v52, %v1900_v47  ;;  %v1916_v58 = vmul.f32 %v1915_v15, %v1900_v47  ;;  %v1967_v52 = vpop.permute.xlu2 %1966 }
 0x335   : > { %v1922_v40 = vmul.f32 %v1921_v27, %v1900_v47  ;;  %vm4174_vm3 = vcmp.lt.s32.totalorder %v4401_v32, 256 }
 0x336   : > { %v1906_v48 = vadd.f32 %v1904_v6, %v1870_v30  ;;  %v1912_v1 = vadd.f32 %v1910_v50, %v1876_v34  ;;  %v1918_v63 = vadd.f32 %v1916_v58, %v1882_v45 }
 0x337   : > { %v1924_v15 = vadd.f32 %v1922_v40, %v1888_v33 }
 0x338   : > { %v1929_v39 = vpop.permute.xlu1 %1928 }
 0x339   : > { %v1933_v25 = vsel %vm1859_vm1, %v1929_v39, %v1931_v18  ;;  %v1927_v23 = vpop.permute.xlu0 %1926 }
 0x33a   : > { %v1937_v9 = vsel %vm3127_vm9, %v1933_v25, 0.0  ;;  %v1932_v41 = vsel %vm1859_vm1, %v1927_v23, %v1929_v39 }
 0x33b   : > { %v1936_v29 = vsel %vm3149_vm11, %v1932_v41, 0.0  ;;  %v1941_v12 = vmul.f32 %v1939_v42, %v1937_v9  ;;  %v1947_v56 = vmul.f32 %v1945_v49, %v1937_v9  ;;  %v1953_v36 = vmul.f32 %v1951_v7, %v1937_v9 }
 0x33c   : > { %v1959_v19 = vmul.f32 %v1957_v46, %v1937_v9  ;;  %v1940_v24 = vmul.f32 %v1939_v42, %v1936_v29  ;;  %v1946_v27 = vmul.f32 %v1945_v49, %v1936_v29  ;;  %v1952_v5 = vmul.f32 %v1951_v7, %v1936_v29 }
 0x33d   : > { %v1958_v28 = vmul.f32 %v1957_v46, %v1936_v29  ;;  %v1943_v42 = vadd.f32 %v1941_v12, %v1907_v38  ;;  %v1949_v2 = vadd.f32 %v1947_v56, %v1913_v17  ;;  %v1955_v26 = vadd.f32 %v1953_v36, %v1919_v3 }
 0x33e   : > { %v1961_v57 = vadd.f32 %v1959_v19, %v1925_v14  ;;  %v1942_v37 = vadd.f32 %v1940_v24, %v1906_v48  ;;  %v1948_v4 = vadd.f32 %v1946_v27, %v1912_v1  ;;  %v1954_v53 = vadd.f32 %v1952_v5, %v1918_v63 }
 0x33f   : > { %v1960_v21 = vadd.f32 %v1958_v28, %v1924_v15 }
 0x340   : > { %v1965_v54 = vpop.permute.xlu1 %1964 }
 0x341   : > { %v1969_v11 = vsel %vm1859_vm1, %v1965_v54, %v1967_v52  ;;  %v1963_v44 = vpop.permute.xlu0 %1962 }
 0x342   : > { %v1973_v49 = vsel %vm3127_vm9, %v1969_v11, 0.0  ;;  %v1968_v7 = vsel %vm1859_vm1, %v1963_v44, %v1965_v54 }
 0x343   : > { %v1977_v46 = vmul.f32 %v1975_v62, %v1973_v49  ;;  %v1983_v55 = vmul.f32 %v1981_v8, %v1973_v49  ;;  %v1989_v18 = vmul.f32 %v1987_v0, %v1973_v49  ;;  %v1995_v22 = vmul.f32 %v1993_v16, %v1973_v49 }
 0x344   : > { %v1972_v10 = vsel %vm3149_vm11, %v1968_v7, 0.0 }
 0x345   : > { %v1979_v51 = vadd.f32 %v1977_v46, %v1943_v42  ;;  %v1985_v13 = vadd.f32 %v1983_v55, %v1949_v2  ;;  %v1991_v20 = vadd.f32 %v1989_v18, %v1955_v26  ;;  %v1997_v47 = vadd.f32 %v1995_v22, %v1961_v57 }
 0x346   : > { %v1976_v39 = vmul.f32 %v1975_v62, %v1972_v10  ;;  %v1982_v31 = vmul.f32 %v1981_v8, %v1972_v10  ;;  %v1988_v59 = vmul.f32 %v1987_v0, %v1972_v10  ;;  %v1994_v61 = vmul.f32 %v1993_v16, %v1972_v10 }
 0x347   : > { %v2000_v25 = vrot.slane %v1979_v51, 7  ;;  %v2011_v60 = vrot.slane %v1985_v13, 7  ;;  %v2018_v23 = vrot.slane %v1991_v20, 7  ;;  %v2025_v30 = vrot.slane %v1997_v47, 7 }
 0x348   : > { %v1978_v35 = vadd.f32 %v1976_v39, %v1942_v37  ;;  %v1984_v9 = vadd.f32 %v1982_v31, %v1948_v4  ;;  %v1990_v41 = vadd.f32 %v1988_v59, %v1954_v53  ;;  %v1996_v45 = vadd.f32 %v1994_v61, %v1960_v21 }
 0x34a   : > { %v2002_v62 = vsel %vm2001_vm2, %v1978_v35, %v2000_v25  ;;  %v2012_v8 = vsel %vm2001_vm2, %v1984_v9, %v2011_v60  ;;  %v2019_v0 = vsel %vm2001_vm2, %v1990_v41, %v2018_v23  ;;  %v2026_v16 = vsel %vm2001_vm2, %v1996_v45, %v2025_v30 }
 0x34b   : > { %2008 = vst.msk [vmem:[%s149_s15] ss:$4 sm:$0x3] %vm4174_vm3, %v2002_v62 }
 0x34c   : > { %2272 = vst.msk [vmem:[%s149_s15 + $0x1] ss:$4 sm:$0x3] %vm4174_vm3, %v2012_v8 }
 0x34d   : > { %2273 = vst.msk [vmem:[%s149_s15 + $0x2] ss:$4 sm:$0x3] %vm4174_vm3, %v2019_v0 }
 0x34e   : > { %2274 = vst.msk [vmem:[%s149_s15 + $0x3] ss:$4 sm:$0x3] %vm4174_vm3, %v2026_v16 }
 0x34f   : > { %2426 = shalt.err (!%p2423_p4)
}
 0x350   : > { %2284 = dma.vmem_to_hbm [thread:$0]  (%p2557_p11), %s2045_s26, 128, %s2047_s9, %s2031_s5  }
 0x351 PF: > { %s2058_s28 = sand.u32 1, %s2455_s20   ;;  %p4404_p7 = scmp.ge.s32.totalorder %s2467_s1, 2 }
 0x352   : > { %s2059_s23 = scalar_lea.sflag [#allocation8], %s2058_s28 }
 0x353   : > { %p2291_p5 = pnand %p4404_p7, %p2561_p12 }
 0x355   : > { %p2292_p8 = pneg %p2291_p5 }
 0x357   : > { %2450 = dma.done.wait (%p2292_p8), %s2059_s23, 128  }
 0x358   : > { %2452 = vsyncadd (%p2292_p8), %s2059_s23, 4294967168  ;;  %p29_p10 = scmp.ge.s32.totalorder %s2532_s24, 4   ;;  %s4405_s20 = smov %s2459_s0 }
 0x359   : > { %s4406_s0 = smov %s2463_s21  ;;  %s4407_s21 = smov %s2544_s27 }
 0x35a   : > { %s4408_s1 = smov %s2532_s24  ;;  %31 = sbr.rel (!%p29_p10) target bundleno = 12 (0xc), region = 75 }
 0x35f   :  { %2065 = vsyncpa [#allocation7], 1 }
 0x360   :  { %2067 = vsyncpa [#allocation7 + $0x1], 1 }
 0x361   :  { %2068 = vsyncpa [#allocation8], 1 }
 0x362   :  { %2070 = vsyncpa [#allocation8 + $0x1], 1 }

</bundles_post_ra>
